<compile_context>
chip_gen: v7x
topology: tpu7x:2x2x1
jax: 0.10.0
libtpu: 0.0.40
codegen_flags: <defaults>
</compile_context>

<pallas_src>
import jax
import jax.numpy as jnp
from jax.experimental import pallas as pl
from jax.experimental.pallas import tpu as pltpu

MAXPOOL = 5  # nn.MaxPool1d(5)


def cnn_kernel(xcat_ref, wcat_ref, bconv_ref, w12_ref, b12_ref, out_ref):
    """One TB-row batch tile per grid step.

    xcat_ref : (P, MAXPOOL, TB, K*V) bf16  im2col rows; slab [p, m] holds conv position
                                           l = p*MAXPOOL + m for all TB batch rows
    wcat_ref : (K*V, V) bf16               conv weight, wcat[k*V+vi, vo] = W[vo, vi, k]
    bconv_ref: (1, V)   f32                conv bias
    w12_ref  : (P, V)   bf16               fused dense weight (dense_out o dense_hidn)
    b12_ref  : (1, 1)   f32                fused dense bias
    out_ref  : (1, TB)  f32                lane-dense output row for this batch tile
    """
    P, MP, TB, KV = xcat_ref.shape
    V = wcat_ref.shape[1]

    wcat = wcat_ref[...]       # hoisted once; VMEM-resident across the unrolled loops
    bconv = bconv_ref[...]
    w12 = w12_ref[...]

    acc = jnp.zeros((1, TB), jnp.float32)
    for p in range(P):            # static unroll: P pooling windows
        pooled = None
        for m in range(MP):       # static unroll: 5 positions per window
            # Conv1d as one MXU matmul per position (bf16 operands, f32 accumulation).
            y = jnp.dot(xcat_ref[p, m, :, :], wcat,
                        preferred_element_type=jnp.float32)            # (TB, V)
            y = jnp.maximum(y + bconv, 0.0)                            # bias + ReLU, f32 VPU
            pooled = y if pooled is None else jnp.maximum(pooled, y)   # MaxPool1d window max
        # Fused dense head: contract the V lanes with window p's weights -> (1, TB) row.
        acc += jax.lax.dot_general(
            w12[p:p + 1, :], pooled.astype(w12.dtype),
            (((1,), (1,)), ((), ())), preferred_element_type=jnp.float32)
    out_ref[...] = (acc + b12_ref[...]).astype(out_ref.dtype)          # single lane-dense store


def cnn_pallas(x_bvl, params, *, batch_tile=128):
    """Forward pass.  x_bvl: (B, vocab_size, max_seq_len) one-hot NCL input -> (B, 1)."""
    wc, bc, w1, b1, w2, b2 = params
    B, V, L = x_bvl.shape
    Cout, Cin, K = wc.shape
    pad = (K - 1) // 2            # TODO(synk): reproduces PyTorch padding=1 only for odd K
    P = L // MAXPOOL
    L_used = P * MAXPOOL          # MaxPool1d(5) drops trailing conv outputs
    H = w1.shape[0]
    F = V * P
    assert w1.shape[1] == F, "requires vocab_size*(input_dim//4) == vocab_size*(seq_len//5)"

    # Batch tile: multiple of 8 sublanes; 128 keeps the (1, TB) output block lane-dense
    # and 128-aligned even for multi-step grids.
    TB = max(8, batch_tile)
    B_pad = int(pl.cdiv(B, TB)) * TB

    # ------- XLA-side layout plumbing (fuses under jit; nothing is re-laid-out in-kernel) ----
    x = jnp.transpose(x_bvl, (0, 2, 1)).astype(jnp.float32)            # (B, L, V) channels-last
    xpad = jnp.pad(x, ((0, B_pad - B), (pad, pad), (0, 0)))            # batch pad + conv halo
    # im2col for the L_used conv positions kept by pooling: x_cat[b,l,k*V+vi] = xpad[b,l+k,vi]
    x_cat = jnp.concatenate([xpad[:, k:k + L_used, :] for k in range(K)], axis=-1)
    # Regroup so slab [p, m] holds conv position l = p*MAXPOOL + m for every batch row.
    x_cat = x_cat.reshape(B_pad, P, MAXPOOL, K * Cin)
    x_cat = jnp.transpose(x_cat, (1, 2, 0, 3)).astype(jnp.bfloat16)    # (P, MAXPOOL, B_pad, K*V)

    wcat = jnp.transpose(wc, (2, 1, 0)).reshape(K * Cin, Cout).astype(jnp.bfloat16)
    bconv = bc.reshape(1, Cout).astype(jnp.float32)

    # Eval-mode fusion (dropout == identity): dense_out(dense_hidn(x)) == x @ w12 + b12.
    # TODO(synk): train-mode stochastic dropout is not implemented; it would require
    # keeping the two matmuls separate and masking the hidden activations.
    # PyTorch flattens (B, V, P) as v*P + p; the kernel's window-major order is p*V + v.
    w1r = jnp.transpose(w1.reshape(H, V, P), (2, 1, 0)).reshape(F, H)  # (F, H)
    w12 = (w1r @ w2.reshape(H, 1)).reshape(P, V).astype(jnp.bfloat16)  # (P, V)
    b12 = (b1 @ w2.reshape(H, 1) + b2).reshape(1, 1).astype(jnp.float32)

    grid = (B_pad // TB,)
    out = pl.pallas_call(
        cnn_kernel,
        out_shape=jax.ShapeDtypeStruct((1, B_pad), jnp.float32),
        grid=grid,
        in_specs=[
            pl.BlockSpec((P, MAXPOOL, TB, K * Cin), lambda i: (0, 0, i, 0)),  # batch-tiled input
            pl.BlockSpec((K * Cin, Cout), lambda i: (0, 0)),                  # weights: constant
            pl.BlockSpec((1, Cout), lambda i: (0, 0)),                        #   index maps =>
            pl.BlockSpec((P, Cout), lambda i: (0, 0)),                        #   DMA'd once,
            pl.BlockSpec((1, 1), lambda i: (0, 0)),                           #   VMEM-resident
        ],
        out_specs=pl.BlockSpec((1, TB), lambda i: (0, i)),                    # lane-dense output
        compiler_params=pltpu.CompilerParams(
            dimension_semantics=("parallel",),      # v7x: batch tiles across both TensorCores
            vmem_limit_bytes=32 * 1024 * 1024,      # explicit scoped-VMEM budget (v5e/v6e/v7x)
        ),
    )(x_cat, wcat, bconv, w12, b12)

    return jnp.transpose(out[:, :B])                # (B, 1)


def cnn_reference(x_bvl, params):
    """Pure-JAX f32 reference matching the PyTorch forward (eval mode)."""
    wc, bc, w1, b1, w2, b2 = params
    K = wc.shape[-1]
    pad = (K - 1) // 2
    y = jax.lax.conv_general_dilated(
        x_bvl, wc, window_strides=(1,), padding=[(pad, pad)],
        dimension_numbers=("NCH", "OIH", "NCH"))
    y = jax.nn.relu(y + bc[None, :, None])
    B, V, L = y.shape
    P = L // MAXPOOL
    y = y[:, :, :P * MAXPOOL].reshape(B, V, P, MAXPOOL).max(axis=-1)   # MaxPool1d(5)
    flat = y.reshape(B, V * P)                                         # Flatten (v-major)
    h = flat @ w1.T + b1                                               # dense_hidn
    return h @ w2.T + b2                                               # dense_out


if __name__ == "__main__":
    # Shapes consistent with the module: vocab_size V=4, max_seq_len L=20, input_dim=16
    # (so input_dim//4 == L//5 == 4), hidn_dim H=32, kernel_size K=3, batch B=2.
    B, V, L, H, K = 2, 4, 20, 32, 3
    input_dim = 16
    P = L // MAXPOOL
    assert P == input_dim // 4      # shape consistency the PyTorch module relies on

    key = jax.random.PRNGKey(0)
    k_wc, k_bc, k_w1, k_b1, k_w2, k_b2, k_x = jax.random.split(key, 7)

    # Deterministic synthetic parameters (shapes from CNN.__init__)
    wc = 0.1 * jax.random.normal(k_wc, (V, V, K), jnp.float32)          # Conv1d weight (Cout, Cin, K)
    bc = 0.1 * jax.random.normal(k_bc, (V,), jnp.float32)               # Conv1d bias
    w1 = 0.1 * jax.random.normal(k_w1, (H, V * (input_dim // 4)), jnp.float32)  # dense_hidn
    b1 = 0.1 * jax.random.normal(k_b1, (H,), jnp.float32)
    w2 = 0.1 * jax.random.normal(k_w2, (1, H), jnp.float32)             # dense_out
    b2 = 0.1 * jax.random.normal(k_b2, (1,), jnp.float32)
    params = (wc, bc, w1, b1, w2, b2)

    # One-hot sequence input, NCL = (B, vocab, seq)
    idx = jax.random.randint(k_x, (B, L), 0, V)
    x = jax.nn.one_hot(idx, V, axis=1).astype(jnp.float32)              # (B, V, L)

    out = jax.block_until_ready(jax.jit(cnn_pallas)(x, params))
    ref = cnn_reference(x, params)

    assert out.shape == (B, 1), out.shape
    # bf16 MXU operands vs. the f32 reference -> compare at bf16-level tolerance
    assert jnp.allclose(out, ref, rtol=1e-2, atol=1e-2), (out, ref)
    print("KERNEL_OK")
</pallas_src>

<mosaic_0001>
module attributes {stable_mosaic.version = 11 : i64} {
  func.func @cnn_kernel(%arg0: i32, %arg1: memref<4x5x128x12xbf16, #tpu.memory_space<vmem>>, %arg2: memref<12x4xbf16, #tpu.memory_space<vmem>>, %arg3: memref<1x4xf32, #tpu.memory_space<vmem>>, %arg4: memref<4x4xbf16, #tpu.memory_space<vmem>>, %arg5: memref<1x1xf32, #tpu.memory_space<vmem>>, %arg6: memref<1x128xf32, #tpu.memory_space<vmem>>) attributes {dimension_semantics = [#tpu.dimension_semantics<parallel>], iteration_bounds = array<i64: 1>, scalar_prefetch = 0 : i64, scratch_operands = 0 : i64, tpu.core_type = #tpu.core_type<tc>, window_params = [{transform_indices = @transform_0, window_bounds = array<i64: 4, 5, 128, 12>}, {pipeline_mode = #tpu.pipeline_mode<synchronous>, transform_indices = @transform_1, window_bounds = array<i64: 12, 4>}, {pipeline_mode = #tpu.pipeline_mode<synchronous>, transform_indices = @transform_2, window_bounds = array<i64: 1, 4>}, {pipeline_mode = #tpu.pipeline_mode<synchronous>, transform_indices = @transform_3, window_bounds = array<i64: 4, 4>}, {pipeline_mode = #tpu.pipeline_mode<synchronous>, transform_indices = @transform_4, window_bounds = array<i64: 1, 1>}, {transform_indices = @transform_5, window_bounds = array<i64: 1, 128>}]} {
    %c0 = arith.constant 0 : index
    %c0_0 = arith.constant 0 : index
    %0 = vector.load %arg2[%c0, %c0_0] : memref<12x4xbf16, #tpu.memory_space<vmem>>, vector<12x4xbf16>
    %c0_1 = arith.constant 0 : index
    %c0_2 = arith.constant 0 : index
    %1 = vector.load %arg3[%c0_1, %c0_2] : memref<1x4xf32, #tpu.memory_space<vmem>>, vector<1x4xf32>
    %c0_3 = arith.constant 0 : index
    %c0_4 = arith.constant 0 : index
    %2 = vector.load %arg4[%c0_3, %c0_4] : memref<4x4xbf16, #tpu.memory_space<vmem>>, vector<4x4xbf16>
    %cst = arith.constant 0.000000e+00 : f32
    %3 = vector.broadcast %cst : f32 to vector<1x128xf32>
    %c0_5 = arith.constant 0 : index
    %c0_6 = arith.constant 0 : index
    %c0_7 = arith.constant 0 : index
    %c0_8 = arith.constant 0 : index
    %4 = vector.load %arg1[%c0_5, %c0_6, %c0_7, %c0_8] : memref<4x5x128x12xbf16, #tpu.memory_space<vmem>>, vector<1x1x128x12xbf16>
    %5 = vector.shape_cast %4 : vector<1x1x128x12xbf16> to vector<128x12xbf16>
    %cst_9 = arith.constant dense<0.000000e+00> : vector<128x4xf32>
    %6 = tpu.matmul %5, %0, %cst_9 {dimension_numbers = #tpu.dot_dimension_numbers<[1], [0], [0], [1], [0, 0, 1, 1], [], []>} : vector<128x12xbf16>, vector<12x4xbf16>, vector<128x4xf32> -> vector<128x4xf32>
    %7 = vector.broadcast %1 : vector<1x4xf32> to vector<128x4xf32>
    %8 = arith.addf %6, %7 : vector<128x4xf32>
    %cst_10 = arith.constant 0.000000e+00 : f32
    %9 = vector.broadcast %cst_10 : f32 to vector<128x4xf32>
    %10 = arith.maximumf %8, %9 : vector<128x4xf32>
    %c0_11 = arith.constant 0 : index
    %c1 = arith.constant 1 : index
    %c0_12 = arith.constant 0 : index
    %c0_13 = arith.constant 0 : index
    %11 = vector.load %arg1[%c0_11, %c1, %c0_12, %c0_13] : memref<4x5x128x12xbf16, #tpu.memory_space<vmem>>, vector<1x1x128x12xbf16>
    %12 = vector.shape_cast %11 : vector<1x1x128x12xbf16> to vector<128x12xbf16>
    %cst_14 = arith.constant dense<0.000000e+00> : vector<128x4xf32>
    %13 = tpu.matmul %12, %0, %cst_14 {dimension_numbers = #tpu.dot_dimension_numbers<[1], [0], [0], [1], [0, 0, 1, 1], [], []>} : vector<128x12xbf16>, vector<12x4xbf16>, vector<128x4xf32> -> vector<128x4xf32>
    %14 = vector.broadcast %1 : vector<1x4xf32> to vector<128x4xf32>
    %15 = arith.addf %13, %14 : vector<128x4xf32>
    %cst_15 = arith.constant 0.000000e+00 : f32
    %16 = vector.broadcast %cst_15 : f32 to vector<128x4xf32>
    %17 = arith.maximumf %15, %16 : vector<128x4xf32>
    %18 = arith.maximumf %10, %17 : vector<128x4xf32>
    %c0_16 = arith.constant 0 : index
    %c2 = arith.constant 2 : index
    %c0_17 = arith.constant 0 : index
    %c0_18 = arith.constant 0 : index
    %19 = vector.load %arg1[%c0_16, %c2, %c0_17, %c0_18] : memref<4x5x128x12xbf16, #tpu.memory_space<vmem>>, vector<1x1x128x12xbf16>
    %20 = vector.shape_cast %19 : vector<1x1x128x12xbf16> to vector<128x12xbf16>
    %cst_19 = arith.constant dense<0.000000e+00> : vector<128x4xf32>
    %21 = tpu.matmul %20, %0, %cst_19 {dimension_numbers = #tpu.dot_dimension_numbers<[1], [0], [0], [1], [0, 0, 1, 1], [], []>} : vector<128x12xbf16>, vector<12x4xbf16>, vector<128x4xf32> -> vector<128x4xf32>
    %22 = vector.broadcast %1 : vector<1x4xf32> to vector<128x4xf32>
    %23 = arith.addf %21, %22 : vector<128x4xf32>
    %cst_20 = arith.constant 0.000000e+00 : f32
    %24 = vector.broadcast %cst_20 : f32 to vector<128x4xf32>
    %25 = arith.maximumf %23, %24 : vector<128x4xf32>
    %26 = arith.maximumf %18, %25 : vector<128x4xf32>
    %c0_21 = arith.constant 0 : index
    %c3 = arith.constant 3 : index
    %c0_22 = arith.constant 0 : index
    %c0_23 = arith.constant 0 : index
    %27 = vector.load %arg1[%c0_21, %c3, %c0_22, %c0_23] : memref<4x5x128x12xbf16, #tpu.memory_space<vmem>>, vector<1x1x128x12xbf16>
    %28 = vector.shape_cast %27 : vector<1x1x128x12xbf16> to vector<128x12xbf16>
    %cst_24 = arith.constant dense<0.000000e+00> : vector<128x4xf32>
    %29 = tpu.matmul %28, %0, %cst_24 {dimension_numbers = #tpu.dot_dimension_numbers<[1], [0], [0], [1], [0, 0, 1, 1], [], []>} : vector<128x12xbf16>, vector<12x4xbf16>, vector<128x4xf32> -> vector<128x4xf32>
    %30 = vector.broadcast %1 : vector<1x4xf32> to vector<128x4xf32>
    %31 = arith.addf %29, %30 : vector<128x4xf32>
    %cst_25 = arith.constant 0.000000e+00 : f32
    %32 = vector.broadcast %cst_25 : f32 to vector<128x4xf32>
    %33 = arith.maximumf %31, %32 : vector<128x4xf32>
    %34 = arith.maximumf %26, %33 : vector<128x4xf32>
    %c0_26 = arith.constant 0 : index
    %c4 = arith.constant 4 : index
    %c0_27 = arith.constant 0 : index
    %c0_28 = arith.constant 0 : index
    %35 = vector.load %arg1[%c0_26, %c4, %c0_27, %c0_28] : memref<4x5x128x12xbf16, #tpu.memory_space<vmem>>, vector<1x1x128x12xbf16>
    %36 = vector.shape_cast %35 : vector<1x1x128x12xbf16> to vector<128x12xbf16>
    %cst_29 = arith.constant dense<0.000000e+00> : vector<128x4xf32>
    %37 = tpu.matmul %36, %0, %cst_29 {dimension_numbers = #tpu.dot_dimension_numbers<[1], [0], [0], [1], [0, 0, 1, 1], [], []>} : vector<128x12xbf16>, vector<12x4xbf16>, vector<128x4xf32> -> vector<128x4xf32>
    %38 = vector.broadcast %1 : vector<1x4xf32> to vector<128x4xf32>
    %39 = arith.addf %37, %38 : vector<128x4xf32>
    %cst_30 = arith.constant 0.000000e+00 : f32
    %40 = vector.broadcast %cst_30 : f32 to vector<128x4xf32>
    %41 = arith.maximumf %39, %40 : vector<128x4xf32>
    %42 = arith.maximumf %34, %41 : vector<128x4xf32>
    %43 = vector.extract_strided_slice %2 {offsets = [0, 0], sizes = [1, 4], strides = [1, 1]} : vector<4x4xbf16> to vector<1x4xbf16>
    %44 = arith.truncf %42 : vector<128x4xf32> to vector<128x4xbf16>
    %cst_31 = arith.constant dense<0.000000e+00> : vector<1x128xf32>
    %45 = tpu.matmul %43, %44, %cst_31 {dimension_numbers = #tpu.dot_dimension_numbers<[1], [1], [0], [0], [0, 0, 1, 0], [], []>} : vector<1x4xbf16>, vector<128x4xbf16>, vector<1x128xf32> -> vector<1x128xf32>
    %46 = arith.addf %3, %45 : vector<1x128xf32>
    %c1_32 = arith.constant 1 : index
    %c0_33 = arith.constant 0 : index
    %c0_34 = arith.constant 0 : index
    %c0_35 = arith.constant 0 : index
    %47 = vector.load %arg1[%c1_32, %c0_33, %c0_34, %c0_35] : memref<4x5x128x12xbf16, #tpu.memory_space<vmem>>, vector<1x1x128x12xbf16>
    %48 = vector.shape_cast %47 : vector<1x1x128x12xbf16> to vector<128x12xbf16>
    %cst_36 = arith.constant dense<0.000000e+00> : vector<128x4xf32>
    %49 = tpu.matmul %48, %0, %cst_36 {dimension_numbers = #tpu.dot_dimension_numbers<[1], [0], [0], [1], [0, 0, 1, 1], [], []>} : vector<128x12xbf16>, vector<12x4xbf16>, vector<128x4xf32> -> vector<128x4xf32>
    %50 = vector.broadcast %1 : vector<1x4xf32> to vector<128x4xf32>
    %51 = arith.addf %49, %50 : vector<128x4xf32>
    %cst_37 = arith.constant 0.000000e+00 : f32
    %52 = vector.broadcast %cst_37 : f32 to vector<128x4xf32>
    %53 = arith.maximumf %51, %52 : vector<128x4xf32>
    %c1_38 = arith.constant 1 : index
    %c1_39 = arith.constant 1 : index
    %c0_40 = arith.constant 0 : index
    %c0_41 = arith.constant 0 : index
    %54 = vector.load %arg1[%c1_38, %c1_39, %c0_40, %c0_41] : memref<4x5x128x12xbf16, #tpu.memory_space<vmem>>, vector<1x1x128x12xbf16>
    %55 = vector.shape_cast %54 : vector<1x1x128x12xbf16> to vector<128x12xbf16>
    %cst_42 = arith.constant dense<0.000000e+00> : vector<128x4xf32>
    %56 = tpu.matmul %55, %0, %cst_42 {dimension_numbers = #tpu.dot_dimension_numbers<[1], [0], [0], [1], [0, 0, 1, 1], [], []>} : vector<128x12xbf16>, vector<12x4xbf16>, vector<128x4xf32> -> vector<128x4xf32>
    %57 = vector.broadcast %1 : vector<1x4xf32> to vector<128x4xf32>
    %58 = arith.addf %56, %57 : vector<128x4xf32>
    %cst_43 = arith.constant 0.000000e+00 : f32
    %59 = vector.broadcast %cst_43 : f32 to vector<128x4xf32>
    %60 = arith.maximumf %58, %59 : vector<128x4xf32>
    %61 = arith.maximumf %53, %60 : vector<128x4xf32>
    %c1_44 = arith.constant 1 : index
    %c2_45 = arith.constant 2 : index
    %c0_46 = arith.constant 0 : index
    %c0_47 = arith.constant 0 : index
    %62 = vector.load %arg1[%c1_44, %c2_45, %c0_46, %c0_47] : memref<4x5x128x12xbf16, #tpu.memory_space<vmem>>, vector<1x1x128x12xbf16>
    %63 = vector.shape_cast %62 : vector<1x1x128x12xbf16> to vector<128x12xbf16>
    %cst_48 = arith.constant dense<0.000000e+00> : vector<128x4xf32>
    %64 = tpu.matmul %63, %0, %cst_48 {dimension_numbers = #tpu.dot_dimension_numbers<[1], [0], [0], [1], [0, 0, 1, 1], [], []>} : vector<128x12xbf16>, vector<12x4xbf16>, vector<128x4xf32> -> vector<128x4xf32>
    %65 = vector.broadcast %1 : vector<1x4xf32> to vector<128x4xf32>
    %66 = arith.addf %64, %65 : vector<128x4xf32>
    %cst_49 = arith.constant 0.000000e+00 : f32
    %67 = vector.broadcast %cst_49 : f32 to vector<128x4xf32>
    %68 = arith.maximumf %66, %67 : vector<128x4xf32>
    %69 = arith.maximumf %61, %68 : vector<128x4xf32>
    %c1_50 = arith.constant 1 : index
    %c3_51 = arith.constant 3 : index
    %c0_52 = arith.constant 0 : index
    %c0_53 = arith.constant 0 : index
    %70 = vector.load %arg1[%c1_50, %c3_51, %c0_52, %c0_53] : memref<4x5x128x12xbf16, #tpu.memory_space<vmem>>, vector<1x1x128x12xbf16>
    %71 = vector.shape_cast %70 : vector<1x1x128x12xbf16> to vector<128x12xbf16>
    %cst_54 = arith.constant dense<0.000000e+00> : vector<128x4xf32>
    %72 = tpu.matmul %71, %0, %cst_54 {dimension_numbers = #tpu.dot_dimension_numbers<[1], [0], [0], [1], [0, 0, 1, 1], [], []>} : vector<128x12xbf16>, vector<12x4xbf16>, vector<128x4xf32> -> vector<128x4xf32>
    %73 = vector.broadcast %1 : vector<1x4xf32> to vector<128x4xf32>
    %74 = arith.addf %72, %73 : vector<128x4xf32>
    %cst_55 = arith.constant 0.000000e+00 : f32
    %75 = vector.broadcast %cst_55 : f32 to vector<128x4xf32>
    %76 = arith.maximumf %74, %75 : vector<128x4xf32>
    %77 = arith.maximumf %69, %76 : vector<128x4xf32>
    %c1_56 = arith.constant 1 : index
    %c4_57 = arith.constant 4 : index
    %c0_58 = arith.constant 0 : index
    %c0_59 = arith.constant 0 : index
    %78 = vector.load %arg1[%c1_56, %c4_57, %c0_58, %c0_59] : memref<4x5x128x12xbf16, #tpu.memory_space<vmem>>, vector<1x1x128x12xbf16>
    %79 = vector.shape_cast %78 : vector<1x1x128x12xbf16> to vector<128x12xbf16>
    %cst_60 = arith.constant dense<0.000000e+00> : vector<128x4xf32>
    %80 = tpu.matmul %79, %0, %cst_60 {dimension_numbers = #tpu.dot_dimension_numbers<[1], [0], [0], [1], [0, 0, 1, 1], [], []>} : vector<128x12xbf16>, vector<12x4xbf16>, vector<128x4xf32> -> vector<128x4xf32>
    %81 = vector.broadcast %1 : vector<1x4xf32> to vector<128x4xf32>
    %82 = arith.addf %80, %81 : vector<128x4xf32>
    %cst_61 = arith.constant 0.000000e+00 : f32
    %83 = vector.broadcast %cst_61 : f32 to vector<128x4xf32>
    %84 = arith.maximumf %82, %83 : vector<128x4xf32>
    %85 = arith.maximumf %77, %84 : vector<128x4xf32>
    %86 = vector.extract_strided_slice %2 {offsets = [1, 0], sizes = [1, 4], strides = [1, 1]} : vector<4x4xbf16> to vector<1x4xbf16>
    %87 = arith.truncf %85 : vector<128x4xf32> to vector<128x4xbf16>
    %cst_62 = arith.constant dense<0.000000e+00> : vector<1x128xf32>
    %88 = tpu.matmul %86, %87, %cst_62 {dimension_numbers = #tpu.dot_dimension_numbers<[1], [1], [0], [0], [0, 0, 1, 0], [], []>} : vector<1x4xbf16>, vector<128x4xbf16>, vector<1x128xf32> -> vector<1x128xf32>
    %89 = arith.addf %46, %88 : vector<1x128xf32>
    %c2_63 = arith.constant 2 : index
    %c0_64 = arith.constant 0 : index
    %c0_65 = arith.constant 0 : index
    %c0_66 = arith.constant 0 : index
    %90 = vector.load %arg1[%c2_63, %c0_64, %c0_65, %c0_66] : memref<4x5x128x12xbf16, #tpu.memory_space<vmem>>, vector<1x1x128x12xbf16>
    %91 = vector.shape_cast %90 : vector<1x1x128x12xbf16> to vector<128x12xbf16>
    %cst_67 = arith.constant dense<0.000000e+00> : vector<128x4xf32>
    %92 = tpu.matmul %91, %0, %cst_67 {dimension_numbers = #tpu.dot_dimension_numbers<[1], [0], [0], [1], [0, 0, 1, 1], [], []>} : vector<128x12xbf16>, vector<12x4xbf16>, vector<128x4xf32> -> vector<128x4xf32>
    %93 = vector.broadcast %1 : vector<1x4xf32> to vector<128x4xf32>
    %94 = arith.addf %92, %93 : vector<128x4xf32>
    %cst_68 = arith.constant 0.000000e+00 : f32
    %95 = vector.broadcast %cst_68 : f32 to vector<128x4xf32>
    %96 = arith.maximumf %94, %95 : vector<128x4xf32>
    %c2_69 = arith.constant 2 : index
    %c1_70 = arith.constant 1 : index
    %c0_71 = arith.constant 0 : index
    %c0_72 = arith.constant 0 : index
    %97 = vector.load %arg1[%c2_69, %c1_70, %c0_71, %c0_72] : memref<4x5x128x12xbf16, #tpu.memory_space<vmem>>, vector<1x1x128x12xbf16>
    %98 = vector.shape_cast %97 : vector<1x1x128x12xbf16> to vector<128x12xbf16>
    %cst_73 = arith.constant dense<0.000000e+00> : vector<128x4xf32>
    %99 = tpu.matmul %98, %0, %cst_73 {dimension_numbers = #tpu.dot_dimension_numbers<[1], [0], [0], [1], [0, 0, 1, 1], [], []>} : vector<128x12xbf16>, vector<12x4xbf16>, vector<128x4xf32> -> vector<128x4xf32>
    %100 = vector.broadcast %1 : vector<1x4xf32> to vector<128x4xf32>
    %101 = arith.addf %99, %100 : vector<128x4xf32>
    %cst_74 = arith.constant 0.000000e+00 : f32
    %102 = vector.broadcast %cst_74 : f32 to vector<128x4xf32>
    %103 = arith.maximumf %101, %102 : vector<128x4xf32>
    %104 = arith.maximumf %96, %103 : vector<128x4xf32>
    %c2_75 = arith.constant 2 : index
    %c2_76 = arith.constant 2 : index
    %c0_77 = arith.constant 0 : index
    %c0_78 = arith.constant 0 : index
    %105 = vector.load %arg1[%c2_75, %c2_76, %c0_77, %c0_78] : memref<4x5x128x12xbf16, #tpu.memory_space<vmem>>, vector<1x1x128x12xbf16>
    %106 = vector.shape_cast %105 : vector<1x1x128x12xbf16> to vector<128x12xbf16>
    %cst_79 = arith.constant dense<0.000000e+00> : vector<128x4xf32>
    %107 = tpu.matmul %106, %0, %cst_79 {dimension_numbers = #tpu.dot_dimension_numbers<[1], [0], [0], [1], [0, 0, 1, 1], [], []>} : vector<128x12xbf16>, vector<12x4xbf16>, vector<128x4xf32> -> vector<128x4xf32>
    %108 = vector.broadcast %1 : vector<1x4xf32> to vector<128x4xf32>
    %109 = arith.addf %107, %108 : vector<128x4xf32>
    %cst_80 = arith.constant 0.000000e+00 : f32
    %110 = vector.broadcast %cst_80 : f32 to vector<128x4xf32>
    %111 = arith.maximumf %109, %110 : vector<128x4xf32>
    %112 = arith.maximumf %104, %111 : vector<128x4xf32>
    %c2_81 = arith.constant 2 : index
    %c3_82 = arith.constant 3 : index
    %c0_83 = arith.constant 0 : index
    %c0_84 = arith.constant 0 : index
    %113 = vector.load %arg1[%c2_81, %c3_82, %c0_83, %c0_84] : memref<4x5x128x12xbf16, #tpu.memory_space<vmem>>, vector<1x1x128x12xbf16>
    %114 = vector.shape_cast %113 : vector<1x1x128x12xbf16> to vector<128x12xbf16>
    %cst_85 = arith.constant dense<0.000000e+00> : vector<128x4xf32>
    %115 = tpu.matmul %114, %0, %cst_85 {dimension_numbers = #tpu.dot_dimension_numbers<[1], [0], [0], [1], [0, 0, 1, 1], [], []>} : vector<128x12xbf16>, vector<12x4xbf16>, vector<128x4xf32> -> vector<128x4xf32>
    %116 = vector.broadcast %1 : vector<1x4xf32> to vector<128x4xf32>
    %117 = arith.addf %115, %116 : vector<128x4xf32>
    %cst_86 = arith.constant 0.000000e+00 : f32
    %118 = vector.broadcast %cst_86 : f32 to vector<128x4xf32>
    %119 = arith.maximumf %117, %118 : vector<128x4xf32>
    %120 = arith.maximumf %112, %119 : vector<128x4xf32>
    %c2_87 = arith.constant 2 : index
    %c4_88 = arith.constant 4 : index
    %c0_89 = arith.constant 0 : index
    %c0_90 = arith.constant 0 : index
    %121 = vector.load %arg1[%c2_87, %c4_88, %c0_89, %c0_90] : memref<4x5x128x12xbf16, #tpu.memory_space<vmem>>, vector<1x1x128x12xbf16>
    %122 = vector.shape_cast %121 : vector<1x1x128x12xbf16> to vector<128x12xbf16>
    %cst_91 = arith.constant dense<0.000000e+00> : vector<128x4xf32>
    %123 = tpu.matmul %122, %0, %cst_91 {dimension_numbers = #tpu.dot_dimension_numbers<[1], [0], [0], [1], [0, 0, 1, 1], [], []>} : vector<128x12xbf16>, vector<12x4xbf16>, vector<128x4xf32> -> vector<128x4xf32>
    %124 = vector.broadcast %1 : vector<1x4xf32> to vector<128x4xf32>
    %125 = arith.addf %123, %124 : vector<128x4xf32>
    %cst_92 = arith.constant 0.000000e+00 : f32
    %126 = vector.broadcast %cst_92 : f32 to vector<128x4xf32>
    %127 = arith.maximumf %125, %126 : vector<128x4xf32>
    %128 = arith.maximumf %120, %127 : vector<128x4xf32>
    %129 = vector.extract_strided_slice %2 {offsets = [2, 0], sizes = [1, 4], strides = [1, 1]} : vector<4x4xbf16> to vector<1x4xbf16>
    %130 = arith.truncf %128 : vector<128x4xf32> to vector<128x4xbf16>
    %cst_93 = arith.constant dense<0.000000e+00> : vector<1x128xf32>
    %131 = tpu.matmul %129, %130, %cst_93 {dimension_numbers = #tpu.dot_dimension_numbers<[1], [1], [0], [0], [0, 0, 1, 0], [], []>} : vector<1x4xbf16>, vector<128x4xbf16>, vector<1x128xf32> -> vector<1x128xf32>
    %132 = arith.addf %89, %131 : vector<1x128xf32>
    %c3_94 = arith.constant 3 : index
    %c0_95 = arith.constant 0 : index
    %c0_96 = arith.constant 0 : index
    %c0_97 = arith.constant 0 : index
    %133 = vector.load %arg1[%c3_94, %c0_95, %c0_96, %c0_97] : memref<4x5x128x12xbf16, #tpu.memory_space<vmem>>, vector<1x1x128x12xbf16>
    %134 = vector.shape_cast %133 : vector<1x1x128x12xbf16> to vector<128x12xbf16>
    %cst_98 = arith.constant dense<0.000000e+00> : vector<128x4xf32>
    %135 = tpu.matmul %134, %0, %cst_98 {dimension_numbers = #tpu.dot_dimension_numbers<[1], [0], [0], [1], [0, 0, 1, 1], [], []>} : vector<128x12xbf16>, vector<12x4xbf16>, vector<128x4xf32> -> vector<128x4xf32>
    %136 = vector.broadcast %1 : vector<1x4xf32> to vector<128x4xf32>
    %137 = arith.addf %135, %136 : vector<128x4xf32>
    %cst_99 = arith.constant 0.000000e+00 : f32
    %138 = vector.broadcast %cst_99 : f32 to vector<128x4xf32>
    %139 = arith.maximumf %137, %138 : vector<128x4xf32>
    %c3_100 = arith.constant 3 : index
    %c1_101 = arith.constant 1 : index
    %c0_102 = arith.constant 0 : index
    %c0_103 = arith.constant 0 : index
    %140 = vector.load %arg1[%c3_100, %c1_101, %c0_102, %c0_103] : memref<4x5x128x12xbf16, #tpu.memory_space<vmem>>, vector<1x1x128x12xbf16>
    %141 = vector.shape_cast %140 : vector<1x1x128x12xbf16> to vector<128x12xbf16>
    %cst_104 = arith.constant dense<0.000000e+00> : vector<128x4xf32>
    %142 = tpu.matmul %141, %0, %cst_104 {dimension_numbers = #tpu.dot_dimension_numbers<[1], [0], [0], [1], [0, 0, 1, 1], [], []>} : vector<128x12xbf16>, vector<12x4xbf16>, vector<128x4xf32> -> vector<128x4xf32>
    %143 = vector.broadcast %1 : vector<1x4xf32> to vector<128x4xf32>
    %144 = arith.addf %142, %143 : vector<128x4xf32>
    %cst_105 = arith.constant 0.000000e+00 : f32
    %145 = vector.broadcast %cst_105 : f32 to vector<128x4xf32>
    %146 = arith.maximumf %144, %145 : vector<128x4xf32>
    %147 = arith.maximumf %139, %146 : vector<128x4xf32>
    %c3_106 = arith.constant 3 : index
    %c2_107 = arith.constant 2 : index
    %c0_108 = arith.constant 0 : index
    %c0_109 = arith.constant 0 : index
    %148 = vector.load %arg1[%c3_106, %c2_107, %c0_108, %c0_109] : memref<4x5x128x12xbf16, #tpu.memory_space<vmem>>, vector<1x1x128x12xbf16>
    %149 = vector.shape_cast %148 : vector<1x1x128x12xbf16> to vector<128x12xbf16>
    %cst_110 = arith.constant dense<0.000000e+00> : vector<128x4xf32>
    %150 = tpu.matmul %149, %0, %cst_110 {dimension_numbers = #tpu.dot_dimension_numbers<[1], [0], [0], [1], [0, 0, 1, 1], [], []>} : vector<128x12xbf16>, vector<12x4xbf16>, vector<128x4xf32> -> vector<128x4xf32>
    %151 = vector.broadcast %1 : vector<1x4xf32> to vector<128x4xf32>
    %152 = arith.addf %150, %151 : vector<128x4xf32>
    %cst_111 = arith.constant 0.000000e+00 : f32
    %153 = vector.broadcast %cst_111 : f32 to vector<128x4xf32>
    %154 = arith.maximumf %152, %153 : vector<128x4xf32>
    %155 = arith.maximumf %147, %154 : vector<128x4xf32>
    %c3_112 = arith.constant 3 : index
    %c3_113 = arith.constant 3 : index
    %c0_114 = arith.constant 0 : index
    %c0_115 = arith.constant 0 : index
    %156 = vector.load %arg1[%c3_112, %c3_113, %c0_114, %c0_115] : memref<4x5x128x12xbf16, #tpu.memory_space<vmem>>, vector<1x1x128x12xbf16>
    %157 = vector.shape_cast %156 : vector<1x1x128x12xbf16> to vector<128x12xbf16>
    %cst_116 = arith.constant dense<0.000000e+00> : vector<128x4xf32>
    %158 = tpu.matmul %157, %0, %cst_116 {dimension_numbers = #tpu.dot_dimension_numbers<[1], [0], [0], [1], [0, 0, 1, 1], [], []>} : vector<128x12xbf16>, vector<12x4xbf16>, vector<128x4xf32> -> vector<128x4xf32>
    %159 = vector.broadcast %1 : vector<1x4xf32> to vector<128x4xf32>
    %160 = arith.addf %158, %159 : vector<128x4xf32>
    %cst_117 = arith.constant 0.000000e+00 : f32
    %161 = vector.broadcast %cst_117 : f32 to vector<128x4xf32>
    %162 = arith.maximumf %160, %161 : vector<128x4xf32>
    %163 = arith.maximumf %155, %162 : vector<128x4xf32>
    %c3_118 = arith.constant 3 : index
    %c4_119 = arith.constant 4 : index
    %c0_120 = arith.constant 0 : index
    %c0_121 = arith.constant 0 : index
    %164 = vector.load %arg1[%c3_118, %c4_119, %c0_120, %c0_121] : memref<4x5x128x12xbf16, #tpu.memory_space<vmem>>, vector<1x1x128x12xbf16>
    %165 = vector.shape_cast %164 : vector<1x1x128x12xbf16> to vector<128x12xbf16>
    %cst_122 = arith.constant dense<0.000000e+00> : vector<128x4xf32>
    %166 = tpu.matmul %165, %0, %cst_122 {dimension_numbers = #tpu.dot_dimension_numbers<[1], [0], [0], [1], [0, 0, 1, 1], [], []>} : vector<128x12xbf16>, vector<12x4xbf16>, vector<128x4xf32> -> vector<128x4xf32>
    %167 = vector.broadcast %1 : vector<1x4xf32> to vector<128x4xf32>
    %168 = arith.addf %166, %167 : vector<128x4xf32>
    %cst_123 = arith.constant 0.000000e+00 : f32
    %169 = vector.broadcast %cst_123 : f32 to vector<128x4xf32>
    %170 = arith.maximumf %168, %169 : vector<128x4xf32>
    %171 = arith.maximumf %163, %170 : vector<128x4xf32>
    %172 = vector.extract_strided_slice %2 {offsets = [3, 0], sizes = [1, 4], strides = [1, 1]} : vector<4x4xbf16> to vector<1x4xbf16>
    %173 = arith.truncf %171 : vector<128x4xf32> to vector<128x4xbf16>
    %cst_124 = arith.constant dense<0.000000e+00> : vector<1x128xf32>
    %174 = tpu.matmul %172, %173, %cst_124 {dimension_numbers = #tpu.dot_dimension_numbers<[1], [1], [0], [0], [0, 0, 1, 0], [], []>} : vector<1x4xbf16>, vector<128x4xbf16>, vector<1x128xf32> -> vector<1x128xf32>
    %175 = arith.addf %132, %174 : vector<1x128xf32>
    %c0_125 = arith.constant 0 : index
    %c0_126 = arith.constant 0 : index
    %176 = vector.load %arg5[%c0_125, %c0_126] : memref<1x1xf32, #tpu.memory_space<vmem>>, vector<1x1xf32>
    %177 = vector.broadcast %176 : vector<1x1xf32> to vector<1x128xf32>
    %178 = arith.addf %175, %177 : vector<1x128xf32>
    %c0_127 = arith.constant 0 : index
    %c0_128 = arith.constant 0 : index
    %179 = vector.load %arg6[%c0_127, %c0_128] : memref<1x128xf32, #tpu.memory_space<vmem>>, vector<1x128xf32>
    tpu.vector_store %arg6[%c0_127, %c0_128], %178 {strides = array<i32>} : memref<1x128xf32, #tpu.memory_space<vmem>>, vector<1x128xf32>,
    return
  }
  func.func @transform_0(%arg0: i32) -> (i32, i32, i32, i32) {
    %c0_i32 = arith.constant 0 : i32
    %c0_i32_0 = arith.constant 0 : i32
    %c0_i32_1 = arith.constant 0 : i32
    %c0_i32_2 = arith.constant 0 : i32
    return %c0_i32, %c0_i32_0, %arg0, %c0_i32_1 : i32, i32, i32, i32
  }
  func.func @transform_1(%arg0: i32) -> (i32, i32) {
    %c0_i32 = arith.constant 0 : i32
    %c0_i32_0 = arith.constant 0 : i32
    %c0_i32_1 = arith.constant 0 : i32
    return %c0_i32, %c0_i32_0 : i32, i32
  }
  func.func @transform_2(%arg0: i32) -> (i32, i32) {
    %c0_i32 = arith.constant 0 : i32
    %c0_i32_0 = arith.constant 0 : i32
    %c0_i32_1 = arith.constant 0 : i32
    return %c0_i32, %c0_i32_0 : i32, i32
  }
  func.func @transform_3(%arg0: i32) -> (i32, i32) {
    %c0_i32 = arith.constant 0 : i32
    %c0_i32_0 = arith.constant 0 : i32
    %c0_i32_1 = arith.constant 0 : i32
    return %c0_i32, %c0_i32_0 : i32, i32
  }
  func.func @transform_4(%arg0: i32) -> (i32, i32) {
    %c0_i32 = arith.constant 0 : i32
    %c0_i32_0 = arith.constant 0 : i32
    %c0_i32_1 = arith.constant 0 : i32
    return %c0_i32, %c0_i32_0 : i32, i32
  }
  func.func @transform_5(%arg0: i32) -> (i32, i32) {
    %c0_i32 = arith.constant 0 : i32
    %c0_i32_0 = arith.constant 0 : i32
    return %c0_i32, %arg0 : i32, i32
  }
}

</mosaic_0001>

<bundles_post_ra>
// kernel: cnn_pallas.1
= control target key start
LH: loop header
LB: loop body
LE: loop exit
PB: predicated region body
PF: predicated region fallthrough
CT: control target
= control target key end

     0   :  { %vm119_vm0 = vcmask 1045504   ;;  %vm94_vm1 = vcmask 97280   ;;  %vm5990_vm2 = vmmov 0   ;;  %vm2137_vm3 = vcmask 31744   ;;  %s7882_s1 = inlined_call_operand.vmem [shape: bf16[12,4], index: 1, kind: input, shape index: {}]   ;;  %s7883_s0 = inlined_call_operand.vmem [shape: bf16[4,5,128,12], index: 0, kind: input, shape index: {}]   ;;  %s7884_s2 = inlined_call_operand.vmem [shape: f32[1,4], index: 2, kind: input, shape index: {}]   ;;  %s7885_s3 = inlined_call_operand.vmem [shape: bf16[4,4], index: 3, kind: input, shape index: {}]   ;;  %s7886_s4 = inlined_call_operand.<no memory space> [shape: f32[1,1], index: 4, kind: input, shape index: {}]   ;;  %s7887_s5 = inlined_call_operand.vmem [shape: f32[1,128], index: 5, kind: output, shape index: {}]  }
   0x1   :  { %v6026_v0 = vld [vmem:[%s7882_s1] sm:$0x3f]   ;;  %v5826_v3 = vld [vmem:[%s7883_s0 + $0x8] sm:$0xff]   ;;  %v5827_v4 = vld [vmem:[%s7883_s0 + $0x10] sm:$0xff]  }
   0x2   :  { %v5825_v1 = vld [vmem:[%s7883_s0] sm:$0xff]   ;;  %5798 = vmatprep.subr.msk.bf16.mxu0 %vm119_vm0, %v6026_v0  ;;  %v6035_v2 = vsel %vm119_vm0, %v6026_v0, 0  ;;  %5800 = vmatprep.subr.msk.bf16.mxu1 %vm119_vm0, %v6026_v0  ;;  %v5828_v5 = vld [vmem:[%s7883_s0 + $0x50] sm:$0xff]   ;;  %v5830_v6 = vld [vmem:[%s7883_s0 + $0x58] sm:$0xff]  }
   0x3   :  { %5357 = vmatpush3.bf16.msra.mxu0 %v6035_v2  ;;  %5358 = vmatprep.mubr.msk.bf16.mxu0 %vm94_vm1, %v5825_v1  ;;  %v5832_v7 = vld [vmem:[%s7883_s0 + $0x60] sm:$0xff]   ;;  %v5829_v8 = vld [vmem:[%s7883_s0 + $0x18] sm:$0xff]   ;;  %v5834_v10 = vld [vmem:[%s7883_s0 + $0x68] sm:$0xff]  }
   0x4   :  { %5799 = vmatprep.subr.msk.bf16.mxu0 %vm119_vm0, %v6026_v0  ;;  %5797 = vmatpush3.bf16.msra.mxu1 %v6035_v2  ;;  %v5831_v9 = vld [vmem:[%s7883_s0 + $0x20] sm:$0xff]   ;;  %v5836_v11 = vld [vmem:[%s7883_s0 + $0x70] sm:$0xff]   ;;  %v5833_v12 = vld [vmem:[%s7883_s0 + $0x28] sm:$0xff]  }
   0x5   :  { %5802 = vmatprep.subr.msk.bf16.mxu1 %vm119_vm0, %v6026_v0  ;;  %5380 = vmatprep.mubr.msk.bf16.mxu1 %vm94_vm1, %v5828_v5  ;;  %v5835_v13 = vld [vmem:[%s7883_s0 + $0x30] sm:$0xff]   ;;  %v5838_v14 = vld [vmem:[%s7883_s0 + $0x78] sm:$0xff]   ;;  %v5841_v15 = vld [vmem:[%s7883_s0 + $0xc0] sm:$0xff]  }
   0x6   :  { %5359 = vmatmul.mubr.msk.bf16.vlgmr.msra.gmra.mrb[0].mxu0 %vm94_vm1, %v5826_v3  ;;  %v5837_v16 = vld [vmem:[%s7883_s0 + $0x38] sm:$0xff]   ;;  %v5839_v17 = vld [vmem:[%s7883_s0 + $0x40] sm:$0xff]   ;;  %v5843_v18 = vld [vmem:[%s7883_s0 + $0xc8] sm:$0xff]  }
   0x7   :  { %5375 = vmatpush3.bf16.msra.mxu0 %v6035_v2  ;;  %5362 = vmatprep.mubr.msk.bf16.mxu0 %vm94_vm1, %v5827_v4  ;;  %v5845_v19 = vld [vmem:[%s7883_s0 + $0xd0] sm:$0xff]   ;;  %v5840_v20 = vld [vmem:[%s7883_s0 + $0x48] sm:$0xff]   ;;  %v5842_v21 = vld [vmem:[%s7883_s0 + $0x80] sm:$0xff]  }
   0x8   :  { %5381 = vmatmul.mubr.msk.bf16.vlgmr.msra.gmra.mrb[0].mxu1 %vm94_vm1, %v5830_v6  ;;  %5801 = vmatprep.subr.msk.bf16.mxu0 %vm119_vm0, %v6026_v0  ;;  %v5847_v22 = vld [vmem:[%s7883_s0 + $0xd8] sm:$0xff]   ;;  %v5849_v23 = vld [vmem:[%s7883_s0 + $0xe0] sm:$0xff]   ;;  %v5844_v24 = vld [vmem:[%s7883_s0 + $0x88] sm:$0xff]  }
   0x9   :  { %5411 = vmatpush3.bf16.msra.mxu1 %v6035_v2  ;;  %5384 = vmatprep.mubr.msk.bf16.mxu1 %vm94_vm1, %v5832_v7  ;;  %v5846_v25 = vld [vmem:[%s7883_s0 + $0x90] sm:$0xff]   ;;  %v5851_v26 = vld [vmem:[%s7883_s0 + $0xe8] sm:$0xff]   ;;  %v5848_v28 = vld [vmem:[%s7883_s0 + $0x98] sm:$0xff]  }
   0xa   :  { %5804 = vmatprep.subr.msk.bf16.mxu1 %vm119_vm0, %v6026_v0  ;;  %v5853_v27 = vld [vmem:[%s7883_s0 + $0xf0] sm:$0xff]   ;;  %v5850_v29 = vld [vmem:[%s7883_s0 + $0xa0] sm:$0xff]   ;;  %v5855_v30 = vld [vmem:[%s7883_s0 + $0xf8] sm:$0xff]  }
   0xb   :  { %v5857_v31 = vld [vmem:[%s7883_s0 + $0x140] sm:$0xff]   ;;  %v5852_v32 = vld [vmem:[%s7883_s0 + $0xa8] sm:$0xff]   ;;  %v5854_v33 = vld [vmem:[%s7883_s0 + $0xb0] sm:$0xff]  }
   0xc   :  { %v5859_v34 = vld [vmem:[%s7883_s0 + $0x148] sm:$0xff]   ;;  %v5861_v35 = vld [vmem:[%s7883_s0 + $0x150] sm:$0xff]   ;;  %v5856_v36 = vld [vmem:[%s7883_s0 + $0xb8] sm:$0xff]  }
   0xd   :  { %v5858_v37 = vld [vmem:[%s7883_s0 + $0x100] sm:$0xff]   ;;  %v5863_v38 = vld [vmem:[%s7883_s0 + $0x158] sm:$0xff]   ;;  %v5860_v40 = vld [vmem:[%s7883_s0 + $0x108] sm:$0xff]  }
   0xe   :  { %5363 = vmatmul.mubr.msk.bf16.gmra.mrb[4].mxu0 %vm94_vm1, %v5829_v8  ;;  %v5865_v39 = vld [vmem:[%s7883_s0 + $0x160] sm:$0xff]   ;;  %v5862_v41 = vld [vmem:[%s7883_s0 + $0x110] sm:$0xff]   ;;  %v5867_v42 = vld [vmem:[%s7883_s0 + $0x168] sm:$0xff]  }
   0xf   :  { %5366 = vmatprep.mubr.msk.bf16.mxu0 %vm94_vm1, %v5831_v9  ;;  %v5869_v43 = vld [vmem:[%s7883_s0 + $0x170] sm:$0xff]   ;;  %v5864_v44 = vld [vmem:[%s7883_s0 + $0x118] sm:$0xff]   ;;  %v5866_v45 = vld [vmem:[%s7883_s0 + $0x120] sm:$0xff]  }
  0x10   :  { %5385 = vmatmul.mubr.msk.bf16.gmra.mrb[4].mxu1 %vm94_vm1, %v5834_v10  ;;  %v5871_v46 = vld [vmem:[%s7883_s0 + $0x178] sm:$0xff]   ;;  %v5873_v47 = vld [vmem:[%s7883_s0 + $0x1c0] sm:$0xff]   ;;  %v5868_v48 = vld [vmem:[%s7883_s0 + $0x128] sm:$0xff]  }
  0x11   :  { %5388 = vmatprep.mubr.msk.bf16.mxu1 %vm94_vm1, %v5836_v11  ;;  %v5870_v49 = vld [vmem:[%s7883_s0 + $0x130] sm:$0xff]   ;;  %v5875_v50 = vld [vmem:[%s7883_s0 + $0x1c8] sm:$0xff]   ;;  %v5872_v52 = vld [vmem:[%s7883_s0 + $0x138] sm:$0xff]  }
  0x12   :  { %v5877_v51 = vld [vmem:[%s7883_s0 + $0x1d0] sm:$0xff]   ;;  %v5874_v53 = vld [vmem:[%s7883_s0 + $0x180] sm:$0xff]   ;;  %v5879_v54 = vld [vmem:[%s7883_s0 + $0x1d8] sm:$0xff]  }
  0x13   :  { %v5881_v55 = vld [vmem:[%s7883_s0 + $0x1e0] sm:$0xff]   ;;  %v5876_v56 = vld [vmem:[%s7883_s0 + $0x188] sm:$0xff]   ;;  %v5878_v57 = vld [vmem:[%s7883_s0 + $0x190] sm:$0xff]  }
  0x14   :  { %v5883_v58 = vld [vmem:[%s7883_s0 + $0x1e8] sm:$0xff]   ;;  %v5885_v59 = vld [vmem:[%s7883_s0 + $0x1f0] sm:$0xff]   ;;  %v5880_v60 = vld [vmem:[%s7883_s0 + $0x198] sm:$0xff]  }
  0x15   :  { %v5882_v61 = vld [vmem:[%s7883_s0 + $0x1a0] sm:$0xff]   ;;  %v5887_v62 = vld [vmem:[%s7883_s0 + $0x1f8] sm:$0xff]   ;;  %v5886_v1 = vld [vmem:[%s7883_s0 + $0x1b0] sm:$0xff]  }
  0x16   :  { %5367 = vmatmul.mubr.msk.bf16.gmra.mrb[8].mxu0 %vm94_vm1, %v5833_v12  ;;  %v5889_v63 = vld [vmem:[%s7883_s0 + $0x240] sm:$0xff]   ;;  %v5891_v3 = vld [vmem:[%s7883_s0 + $0x248] sm:$0xff]   ;;  %v5895_v4 = vld [vmem:[%s7883_s0 + $0x250] sm:$0xff]  }
  0x17   :  { %5370 = vmatprep.mubr.msk.bf16.mxu0 %vm94_vm1, %v5835_v13  ;;  %v5888_v5 = vld [vmem:[%s7883_s0 + $0x1b8] sm:$0xff]   ;;  %v5890_v6 = vld [vmem:[%s7883_s0 + $0x200] sm:$0xff]   ;;  %v5892_v9 = vld [vmem:[%s7883_s0 + $0x208] sm:$0xff]  }
  0x18   :  { %5389 = vmatmul.mubr.msk.bf16.gmra.mrb[8].mxu1 %vm94_vm1, %v5838_v14  ;;  %v5896_v7 = vld [vmem:[%s7883_s0 + $0x258] sm:$0xff]   ;;  %v5899_v8 = vld [vmem:[%s7883_s0 + $0x260] sm:$0xff]   ;;  %v5893_v10 = vld [vmem:[%s7883_s0 + $0x210] sm:$0xff]  }
  0x19   :  { %5412 = vmatprep.mubr.msk.bf16.mxu1 %vm94_vm1, %v5841_v15  ;;  %v5900_v11 = vld [vmem:[%s7883_s0 + $0x268] sm:$0xff]   ;;  %v5903_v12 = vld [vmem:[%s7883_s0 + $0x270] sm:$0xff]   ;;  %v5894_v13 = vld [vmem:[%s7883_s0 + $0x218] sm:$0xff]  }
  0x1a   :  { %v5897_v14 = vld [vmem:[%s7883_s0 + $0x220] sm:$0xff]   ;;  %v5904_v15 = vld [vmem:[%s7883_s0 + $0x278] sm:$0xff]  }
  0x1e   :  { %5371 = vmatmul.mubr.msk.bf16.gmra.mrb[12].mxu0 %vm94_vm1, %v5837_v16  ;;  %v5898_v16 = vld [vmem:[%s7883_s0 + $0x228] sm:$0xff]  }
  0x1f   :  { %5376 = vmatprep.mubr.msk.bf16.mxu0 %vm94_vm1, %v5839_v17  ;;  %v5901_v17 = vld [vmem:[%s7883_s0 + $0x230] sm:$0xff]  }
  0x20   :  { %5413 = vmatmul.mubr.msk.bf16.vlgmr.msra.gmra.mrb[12].mxu1 %vm94_vm1, %v5843_v18  ;;  %v5902_v18 = vld [vmem:[%s7883_s0 + $0x238] sm:$0xff]  }
  0x21   :  { %5447 = vmatpush3.bf16.msra.mxu1 %v6035_v2  ;;  %5416 = vmatprep.mubr.msk.bf16.mxu1 %vm94_vm1, %v5845_v19  ;;  %v7889_v19 = vmov 0.0  }
  0x22   :  { %5806 = vmatprep.subr.msk.bf16.mxu1 %vm119_vm0, %v6026_v0 }
  0x26   :  { %5377 = vmatmul.mubr.msk.bf16.vlgmr.msra.gmra.mrb[16].mxu0 %vm94_vm1, %v5840_v20 }
  0x27   :  { %5393 = vmatpush3.bf16.msra.mxu0 %v6035_v2  ;;  %5394 = vmatprep.mubr.msk.bf16.mxu0 %vm94_vm1, %v5842_v21 }
  0x28   :  { %5803 = vmatprep.subr.msk.bf16.mxu0 %vm119_vm0, %v6026_v0  ;;  %5417 = vmatmul.mubr.msk.bf16.gmra.mrb[16].mxu1 %vm94_vm1, %v5847_v22 }
  0x29   :  { %5420 = vmatprep.mubr.msk.bf16.mxu1 %vm94_vm1, %v5849_v23 }
  0x2e   :  { %5395 = vmatmul.mubr.msk.bf16.vlgmr.msra.gmra.mrb[20].mxu0 %vm94_vm1, %v5844_v24 }
  0x2f   :  { %5429 = vmatpush3.bf16.msra.mxu0 %v6035_v2  ;;  %5398 = vmatprep.mubr.msk.bf16.mxu0 %vm94_vm1, %v5846_v25 }
  0x30   :  { %5421 = vmatmul.mubr.msk.bf16.gmra.mrb[20].mxu1 %vm94_vm1, %v5851_v26  ;;  %5805 = vmatprep.subr.msk.bf16.mxu0 %vm119_vm0, %v6026_v0  ;;  %v6398_v26 = vld [vmem:[%s7884_s2] ss:$0 sm:$0xff] }
  0x31   :  { %5424 = vmatprep.mubr.msk.bf16.mxu1 %vm94_vm1, %v5853_v27 }
  0x36   :  { %5399 = vmatmul.mubr.msk.bf16.gmra.mrb[24].mxu0 %vm94_vm1, %v5848_v28 }
  0x37   :  { %5402 = vmatprep.mubr.msk.bf16.mxu0 %vm94_vm1, %v5850_v29 }
  0x38   :  { %5425 = vmatmul.mubr.msk.bf16.gmra.mrb[24].mxu1 %vm94_vm1, %v5855_v30 }
  0x39   :  { %5448 = vmatprep.mubr.msk.bf16.mxu1 %vm94_vm1, %v5857_v31 }
  0x3e   :  { %5403 = vmatmul.mubr.msk.bf16.gmra.mrb[28].mxu0 %vm94_vm1, %v5852_v32 }
  0x3f   :  { %5406 = vmatprep.mubr.msk.bf16.mxu0 %vm94_vm1, %v5854_v33 }
  0x40   :  { %5449 = vmatmul.mubr.msk.bf16.vlgmr.msra.gmra.mrb[28].mxu1 %vm94_vm1, %v5859_v34 }
  0x41   :  { %5483 = vmatpush3.bf16.msra.mxu1 %v6035_v2  ;;  %5452 = vmatprep.mubr.msk.bf16.mxu1 %vm94_vm1, %v5861_v35 }
  0x42   :  { %5808 = vmatprep.subr.msk.bf16.mxu1 %vm119_vm0, %v6026_v0 }
  0x46   :  { %5407 = vmatmul.mubr.msk.bf16.gmra.mrb[32].mxu0 %vm94_vm1, %v5856_v36 }
  0x47   :  { %5430 = vmatprep.mubr.msk.bf16.mxu0 %vm94_vm1, %v5858_v37 }
  0x48   :  { %5453 = vmatmul.mubr.msk.bf16.gmra.mrb[32].mxu1 %vm94_vm1, %v5863_v38 }
  0x49   :  { %5456 = vmatprep.mubr.msk.bf16.mxu1 %vm94_vm1, %v5865_v39 }
  0x4e   :  { %5431 = vmatmul.mubr.msk.bf16.vlgmr.msra.gmra.mrb[36].mxu0 %vm94_vm1, %v5860_v40 }
  0x4f   :  { %5465 = vmatpush3.bf16.msra.mxu0 %v6035_v2  ;;  %5434 = vmatprep.mubr.msk.bf16.mxu0 %vm94_vm1, %v5862_v41 }
  0x50   :  { %5457 = vmatmul.mubr.msk.bf16.gmra.mrb[36].mxu1 %vm94_vm1, %v5867_v42  ;;  %5807 = vmatprep.subr.msk.bf16.mxu0 %vm119_vm0, %v6026_v0  ;;  %v5884_v0 = vld [vmem:[%s7883_s0 + $0x1a8] sm:$0xff]  }
  0x51   :  { %5460 = vmatprep.mubr.msk.bf16.mxu1 %vm94_vm1, %v5869_v43 }
  0x56   :  { %5435 = vmatmul.mubr.msk.bf16.gmra.mrb[40].mxu0 %vm94_vm1, %v5864_v44 }
  0x57   :  { %5438 = vmatprep.mubr.msk.bf16.mxu0 %vm94_vm1, %v5866_v45 }
  0x58   :  { %5461 = vmatmul.mubr.msk.bf16.gmra.mrb[40].mxu1 %vm94_vm1, %v5871_v46 }
  0x59   :  { %5484 = vmatprep.mubr.msk.bf16.mxu1 %vm94_vm1, %v5873_v47 }
  0x5e   :  { %5439 = vmatmul.mubr.msk.bf16.gmra.mrb[44].mxu0 %vm94_vm1, %v5868_v48 }
  0x5f   :  { %5442 = vmatprep.mubr.msk.bf16.mxu0 %vm94_vm1, %v5870_v49 }
  0x60   :  { %5485 = vmatmul.mubr.msk.bf16.vlgmr.msra.gmra.mrb[44].mxu1 %vm94_vm1, %v5875_v50 }
  0x61   :  { %5519 = vmatpush3.bf16.msra.mxu1 %v6035_v2  ;;  %5488 = vmatprep.mubr.msk.bf16.mxu1 %vm94_vm1, %v5877_v51 }
  0x62   :  { %5556 = vmatprep.subr.bf16.mxu1 %v7889_v19 }
  0x66   :  { %5443 = vmatmul.mubr.msk.bf16.gmra.mrb[48].mxu0 %vm94_vm1, %v5872_v52 }
  0x67   :  { %5466 = vmatprep.mubr.msk.bf16.mxu0 %vm94_vm1, %v5874_v53 }
  0x68   :  { %5489 = vmatmul.mubr.msk.bf16.gmra.mrb[48].mxu1 %vm94_vm1, %v5879_v54 }
  0x69   :  { %5492 = vmatprep.mubr.msk.bf16.mxu1 %vm94_vm1, %v5881_v55 }
  0x6e   :  { %5467 = vmatmul.mubr.msk.bf16.vlgmr.msra.gmra.mrb[52].mxu0 %vm94_vm1, %v5876_v56 }
  0x6f   :  { %5501 = vmatpush3.bf16.msra.mxu0 %v6035_v2  ;;  %5470 = vmatprep.mubr.msk.bf16.mxu0 %vm94_vm1, %v5878_v57 }
  0x70   :  { %5493 = vmatmul.mubr.msk.bf16.gmra.mrb[52].mxu1 %vm94_vm1, %v5883_v58  ;;  %5536 = vmatprep.subr.bf16.mxu0 %v7889_v19 }
  0x71   :  { %5496 = vmatprep.mubr.msk.bf16.mxu1 %vm94_vm1, %v5885_v59 }
  0x76   :  { %5471 = vmatmul.mubr.msk.bf16.gmra.mrb[56].mxu0 %vm94_vm1, %v5880_v60 }
  0x77   :  { %5474 = vmatprep.mubr.msk.bf16.mxu0 %vm94_vm1, %v5882_v61 }
  0x78   :  { %5497 = vmatmul.mubr.msk.bf16.gmra.mrb[56].mxu1 %vm94_vm1, %v5887_v62 }
  0x79   :  { %5520 = vmatprep.mubr.msk.bf16.mxu1 %vm94_vm1, %v5889_v63 }
  0x7e   :  { %5475 = vmatmul.mubr.msk.bf16.gmra.mrb[60].mxu0 %vm94_vm1, %v5884_v0 }
  0x7f   :  { %5478 = vmatprep.mubr.msk.bf16.mxu0 %vm94_vm1, %v5886_v1 }
  0x80   :  { %5521 = vmatmul.mubr.msk.bf16.vlgmr.msra.gmra.mrb[60].mxu1 %vm94_vm1, %v5891_v3 }
  0x81   :  { %5524 = vmatprep.mubr.msk.bf16.mxu1 %vm94_vm1, %v5895_v4 }
  0x86   :  { %5479 = vmatmul.mubr.msk.bf16.gmra.mrb[64].mxu0 %vm94_vm1, %v5888_v5 }
  0x87   :  { %5502 = vmatprep.mubr.msk.bf16.mxu0 %vm94_vm1, %v5890_v6 }
  0x88   :  { %5525 = vmatmul.mubr.msk.bf16.gmra.mrb[64].mxu1 %vm94_vm1, %v5896_v7 }
  0x89   :  { %5528 = vmatprep.mubr.msk.bf16.mxu1 %vm94_vm1, %v5899_v8 }
  0x8e   :  { %5503 = vmatmul.mubr.msk.bf16.vlgmr.msra.gmra.mrb[68].mxu0 %vm94_vm1, %v5892_v9 }
  0x8f   :  { %5506 = vmatprep.mubr.msk.bf16.mxu0 %vm94_vm1, %v5893_v10 }
  0x90   :  { %5529 = vmatmul.mubr.msk.bf16.gmra.mrb[68].mxu1 %vm94_vm1, %v5900_v11 }
  0x91   :  { %5532 = vmatprep.mubr.msk.bf16.mxu1 %vm94_vm1, %v5903_v12 }
  0x96   :  { %5507 = vmatmul.mubr.msk.bf16.gmra.mrb[72].mxu0 %vm94_vm1, %v5894_v13 }
  0x97   :  { %5510 = vmatprep.mubr.msk.bf16.mxu0 %vm94_vm1, %v5897_v14 }
  0x98   :  { %5533 = vmatmul.mubr.msk.bf16.gmra.mrb[72].mxu1 %vm94_vm1, %v5904_v15 }
  0x99   :  { %5572 = vmatprep.mubr.msk.bf16.mxu1 %vm5990_vm2, %v7889_v19 }
  0x9e   :  { %5511 = vmatmul.mubr.msk.bf16.gmra.mrb[76].mxu0 %vm94_vm1, %v5898_v16 }
  0x9f   :  { %5514 = vmatprep.mubr.msk.bf16.mxu0 %vm94_vm1, %v5901_v17 }
  0xa6   :  { %5515 = vmatmul.mubr.msk.bf16.gmra.mrb[80].mxu0 %vm94_vm1, %v5902_v18 }
  0xa7   :  { %5552 = vmatprep.mubr.msk.bf16.mxu0 %vm5990_vm2, %v7889_v19 }
  0xd9   :  { %v6387_v20 = vpop.f32.mrb[0].mxu0 }
  0xda   :  { %v6389_v21 = vpop.f32.mrb[1].mxu0 }
  0xdb   :  { %v6391_v22 = vpop.f32.mrb[2].mxu0  ;;  %v5382_v23 = vpop.f32.mrb[0].mxu1 }
  0xdc   :  { %v6393_v24 = vpop.f32.mrb[3].mxu0  ;;  %v367_v25 = vpop.f32.mrb[1].mxu1  ;;  %v376_v28 = vadd.f32 %v5382_v23, %v6398_v26 }
  0xdd   :  { %v5383_v27 = vpop.f32.mrb[2].mxu1  ;;  %v368_v30 = vadd.f32 %v6398_v26, %v367_v25 }
  0xde   :  { %v370_v29 = vpop.f32.mrb[3].mxu1  ;;  %v379_v31 = vadd.f32 %v5383_v27, %v6398_v26  ;;  %v420_v35 = vmax.f32 %v376_v28, 0.0 }
  0xdf   :  { %v371_v33 = vadd.f32 %v6398_v26, %v370_v29  ;;  %v418_v38 = vmax.f32 %v368_v30, 0.0 }
  0xe0   :  { %v421_v43 = vmax.f32 %v379_v31, 0.0 }
  0xe1   :  { %v5364_v32 = vpop.f32.mrb[4].mxu0  ;;  %v419_v48 = vmax.f32 %v371_v33, 0.0 }
  0xe2   :  { %v182_v34 = vadd.f32 %v5364_v32, %v6398_v26  ;;  %v173_v36 = vpop.f32.mrb[5].mxu0 }
  0xe3   :  { %v174_v37 = vadd.f32 %v6398_v26, %v173_v36  ;;  %v5365_v39 = vpop.f32.mrb[6].mxu0  ;;  %v5386_v40 = vpop.f32.mrb[4].mxu1 }
  0xe4   :  { %v226_v41 = vmax.f32 %v182_v34, 0.0  ;;  %v185_v42 = vadd.f32 %v5365_v39, %v6398_v26  ;;  %v176_v44 = vpop.f32.mrb[7].mxu0  ;;  %v383_v45 = vpop.f32.mrb[5].mxu1  ;;  %v392_v52 = vadd.f32 %v5386_v40, %v6398_v26 }
  0xe5   :  { %v224_v46 = vmax.f32 %v174_v37, 0.0  ;;  %v177_v47 = vadd.f32 %v6398_v26, %v176_v44  ;;  %v5387_v49 = vpop.f32.mrb[6].mxu1  ;;  %v384_v56 = vadd.f32 %v6398_v26, %v383_v45 }
  0xe6   :  { %v6408_v50 = vmax.f32 %v226_v41, %v420_v35  ;;  %v227_v51 = vmax.f32 %v185_v42, 0.0  ;;  %v386_v53 = vpop.f32.mrb[7].mxu1  ;;  %v395_v58 = vadd.f32 %v5387_v49, %v6398_v26  ;;  %v424_v63 = vmax.f32 %v392_v52, 0.0 }
  0xe7   :  { %v6411_v54 = vmax.f32 %v224_v46, %v418_v38  ;;  %v225_v55 = vmax.f32 %v177_v47, 0.0  ;;  %v387_v61 = vadd.f32 %v6398_v26, %v386_v53  ;;  %v422_v3 = vmax.f32 %v384_v56, 0.0 }
  0xe8   :  { %v6414_v57 = vmax.f32 %v227_v51, %v421_v43  ;;  %v425_v8 = vmax.f32 %v395_v58, 0.0  ;;  %v166_v56 = vadd.f32 %v6387_v20, %v6398_v26 }
  0xe9   :  { %v6417_v59 = vmax.f32 %v225_v55, %v419_v48  ;;  %v5368_v60 = vpop.f32.mrb[8].mxu0  ;;  %v423_v13 = vmax.f32 %v387_v61, 0.0 }
  0xea   :  { %v198_v62 = vadd.f32 %v5368_v60, %v6398_v26  ;;  %v189_v0 = vpop.f32.mrb[9].mxu0  ;;  %v158_v60 = vadd.f32 %v6398_v26, %v6389_v21 }
  0xeb   :  { %v190_v1 = vadd.f32 %v6398_v26, %v189_v0  ;;  %v5369_v4 = vpop.f32.mrb[10].mxu0  ;;  %v5390_v5 = vpop.f32.mrb[8].mxu1 }
  0xec   :  { %v230_v6 = vmax.f32 %v198_v62, 0.0  ;;  %v201_v7 = vadd.f32 %v5369_v4, %v6398_v26  ;;  %v192_v9 = vpop.f32.mrb[11].mxu0  ;;  %v399_v10 = vpop.f32.mrb[9].mxu1  ;;  %v408_v17 = vadd.f32 %v5390_v5, %v6398_v26 }
  0xed   :  { %v228_v11 = vmax.f32 %v190_v1, 0.0  ;;  %v193_v12 = vadd.f32 %v6398_v26, %v192_v9  ;;  %v5391_v14 = vpop.f32.mrb[10].mxu1  ;;  %v400_v27 = vadd.f32 %v6398_v26, %v399_v10  ;;  %v220_v10 = vmax.f32 %v158_v60, 0.0 }
  0xee   :  { %v6424_v15 = vmax.f32 %v230_v6, %v424_v63  ;;  %v231_v16 = vmax.f32 %v201_v7, 0.0  ;;  %v402_v18 = vpop.f32.mrb[11].mxu1  ;;  %v411_v29 = vadd.f32 %v5391_v14, %v6398_v26  ;;  %v428_v34 = vmax.f32 %v408_v17, 0.0 }
  0xef   :  { %v6427_v23 = vmax.f32 %v228_v11, %v422_v3  ;;  %v229_v25 = vmax.f32 %v193_v12, 0.0  ;;  %v403_v32 = vadd.f32 %v6398_v26, %v402_v18  ;;  %v426_v37 = vmax.f32 %v400_v27, 0.0 }
  0xf0   :  { %v6430_v28 = vmax.f32 %v231_v16, %v425_v8  ;;  %v429_v42 = vmax.f32 %v411_v29, 0.0  ;;  %v169_v63 = vadd.f32 %v6391_v22, %v6398_v26  ;;  %v161_v3 = vadd.f32 %v6398_v26, %v6393_v24 }
  0xf1   :  { %v6433_v30 = vmax.f32 %v229_v25, %v423_v13  ;;  %v5372_v31 = vpop.f32.mrb[12].mxu0  ;;  %v427_v47 = vmax.f32 %v403_v32, 0.0  ;;  %v222_v6 = vmax.f32 %v166_v56, 0.0 }
  0xf2   :  { %v214_v33 = vadd.f32 %v5372_v31, %v6398_v26  ;;  %v205_v35 = vpop.f32.mrb[13].mxu0  ;;  %v223_v13 = vmax.f32 %v169_v63, 0.0  ;;  %v221_v24 = vmax.f32 %v161_v3, 0.0 }
  0xf3   :  { %v206_v36 = vadd.f32 %v6398_v26, %v205_v35  ;;  %v5373_v38 = vpop.f32.mrb[14].mxu0  ;;  %v5414_v39 = vpop.f32.mrb[12].mxu1 }
  0xf4   :  { %v234_v40 = vmax.f32 %v214_v33, 0.0  ;;  %v217_v41 = vadd.f32 %v5373_v38, %v6398_v26  ;;  %v208_v43 = vpop.f32.mrb[15].mxu0  ;;  %v771_v44 = vpop.f32.mrb[13].mxu1  ;;  %v780_v29 = vadd.f32 %v5414_v39, %v6398_v26 }
  0xf5   :  { %v232_v45 = vmax.f32 %v206_v36, 0.0  ;;  %v209_v46 = vadd.f32 %v6398_v26, %v208_v43  ;;  %v5415_v48 = vpop.f32.mrb[14].mxu1  ;;  %v772_v33 = vadd.f32 %v6398_v26, %v771_v44 }
  0xf6   :  { %v6440_v49 = vmax.f32 %v234_v40, %v428_v34  ;;  %v235_v51 = vmax.f32 %v217_v41, 0.0  ;;  %v774_v52 = vpop.f32.mrb[15].mxu1  ;;  %v836_v40 = vmax.f32 %v780_v29, 0.0 }
  0xf7   :  { %v6442_v53 = vmax.f32 %v232_v45, %v426_v37  ;;  %v233_v55 = vmax.f32 %v209_v46, 0.0  ;;  %v834_v39 = vmax.f32 %v772_v33, 0.0 }
  0xf8   :  { %v6446_v58 = vmax.f32 %v235_v51, %v429_v42  ;;  %v783_v42 = vadd.f32 %v5415_v48, %v6398_v26  ;;  %v775_v51 = vadd.f32 %v6398_v26, %v774_v52 }
  0xf9   :  { %v6450_v61 = vmax.f32 %v233_v55, %v427_v47  ;;  %v5378_v62 = vpop.f32.mrb[16].mxu0 }
  0xfa   :  { %v360_v0 = vadd.f32 %v5378_v62, %v6398_v26  ;;  %v351_v1 = vpop.f32.mrb[17].mxu0 }
  0xfb   :  { %v352_v4 = vadd.f32 %v6398_v26, %v351_v1  ;;  %v5379_v20 = vpop.f32.mrb[18].mxu0  ;;  %v5418_v5 = vpop.f32.mrb[16].mxu1  ;;  %v837_v1 = vmax.f32 %v783_v42, 0.0 }
  0xfc   :  { %v416_v7 = vmax.f32 %v360_v0, 0.0  ;;  %v363_v21 = vadd.f32 %v5379_v20, %v6398_v26  ;;  %v354_v8 = vpop.f32.mrb[19].mxu0  ;;  %v787_v9 = vpop.f32.mrb[17].mxu1  ;;  %v796_v48 = vadd.f32 %v5418_v5, %v6398_v26  ;;  %v835_v20 = vmax.f32 %v775_v51, 0.0 }
  0xfd   :  { %v414_v11 = vmax.f32 %v352_v4, 0.0  ;;  %v355_v22 = vadd.f32 %v6398_v26, %v354_v8  ;;  %v5419_v12 = vpop.f32.mrb[18].mxu1 }
  0xfe   :  { %v432_v14 = vmax.f32 %v222_v6, %v416_v7  ;;  %v417_v16 = vmax.f32 %v363_v21, 0.0  ;;  %v790_v17 = vpop.f32.mrb[19].mxu1  ;;  %v788_v21 = vadd.f32 %v6398_v26, %v787_v9  ;;  %v840_v5 = vmax.f32 %v796_v48, 0.0 }
  0xff   :  { %v430_v18 = vmax.f32 %v220_v10, %v414_v11  ;;  %v415_v25 = vmax.f32 %v355_v22, 0.0 }
 0x100   :  { %v433_v27 = vmax.f32 %v223_v13, %v417_v16  ;;  %v838_v29 = vmax.f32 %v788_v21, 0.0 }
 0x101   :  { %v431_v31 = vmax.f32 %v221_v24, %v415_v25  ;;  %v5396_v32 = vpop.f32.mrb[20].mxu0 }
 0x102   :  { %v570_v34 = vadd.f32 %v5396_v32, %v6398_v26  ;;  %v561_v35 = vpop.f32.mrb[21].mxu0  ;;  %v791_v32 = vadd.f32 %v6398_v26, %v790_v17 }
 0x103   :  { %v562_v36 = vadd.f32 %v6398_v26, %v561_v35  ;;  %v5397_v37 = vpop.f32.mrb[22].mxu0  ;;  %v5422_v38 = vpop.f32.mrb[20].mxu1 }
 0x104   :  { %v626_v41 = vmax.f32 %v570_v34, 0.0  ;;  %v573_v43 = vadd.f32 %v5397_v37, %v6398_v26  ;;  %v564_v45 = vpop.f32.mrb[23].mxu0  ;;  %v803_v46 = vpop.f32.mrb[21].mxu1 }
 0x105   :  { %v624_v47 = vmax.f32 %v562_v36, 0.0  ;;  %v565_v44 = vadd.f32 %v6398_v26, %v564_v45  ;;  %v5423_v55 = vpop.f32.mrb[22].mxu1  ;;  %v804_v51 = vadd.f32 %v6398_v26, %v803_v46 }
 0x106   :  { %v642_v56 = vmax.f32 %v432_v14, %v626_v41  ;;  %v627_v60 = vmax.f32 %v573_v43, 0.0  ;;  %v806_v62 = vpop.f32.mrb[23].mxu1  ;;  %v812_v43 = vadd.f32 %v5422_v38, %v6398_v26 }
 0x107   :  { %v640_v63 = vmax.f32 %v430_v18, %v624_v47  ;;  %v625_v0 = vmax.f32 %v565_v44, 0.0  ;;  %v799_v18 = vadd.f32 %v5419_v12, %v6398_v26 }
 0x108   :  { %v643_v3 = vmax.f32 %v433_v27, %v627_v60  ;;  %v6469_v4 = vmax.f32 %v642_v56, %v836_v40 }
 0x109   :  { %v641_v6 = vmax.f32 %v431_v31, %v625_v0  ;;  %v5400_v7 = vpop.f32.mrb[24].mxu0  ;;  %v6472_v52 = vmax.f32 %v640_v63, %v834_v39  ;;  %v841_v42 = vmax.f32 %v799_v18, 0.0  ;;  %v839_v39 = vmax.f32 %v791_v32, 0.0 }
 0x10a   :  { %v586_v8 = vadd.f32 %v5400_v7, %v6398_v26  ;;  %v577_v10 = vpop.f32.mrb[25].mxu0  ;;  %v6475_v11 = vmax.f32 %v643_v3, %v837_v1  ;;  %v844_v0 = vmax.f32 %v812_v43, 0.0  ;;  %v807_v7 = vadd.f32 %v6398_v26, %v806_v62 }
 0x10b   :  { %v578_v22 = vadd.f32 %v6398_v26, %v577_v10  ;;  %v5401_v13 = vpop.f32.mrb[26].mxu0  ;;  %v5426_v14 = vpop.f32.mrb[24].mxu1  ;;  %v6478_v16 = vmax.f32 %v641_v6, %v835_v20  ;;  %v842_v20 = vmax.f32 %v804_v51, 0.0 }
 0x10c   :  { %v630_v24 = vmax.f32 %v586_v8, 0.0  ;;  %v589_v25 = vadd.f32 %v5401_v13, %v6398_v26  ;;  %v580_v9 = vpop.f32.mrb[27].mxu0  ;;  %v819_v27 = vpop.f32.mrb[25].mxu1  ;;  %v843_v62 = vmax.f32 %v807_v7, 0.0 }
 0x10d   :  { %v628_v31 = vmax.f32 %v578_v22, 0.0  ;;  %v581_v33 = vadd.f32 %v6398_v26, %v580_v9  ;;  %v5427_v34 = vpop.f32.mrb[26].mxu1  ;;  %v820_v32 = vadd.f32 %v6398_v26, %v819_v27 }
 0x10e   :  { %v646_v35 = vmax.f32 %v6408_v50, %v630_v24  ;;  %v631_v36 = vmax.f32 %v589_v25, 0.0  ;;  %v822_v37 = vpop.f32.mrb[27].mxu1  ;;  %v828_v25 = vadd.f32 %v5426_v14, %v6398_v26 }
 0x10f   :  { %v644_v40 = vmax.f32 %v6411_v54, %v628_v31  ;;  %v629_v41 = vmax.f32 %v581_v33, 0.0 }
 0x110   :  { %v647_v12 = vmax.f32 %v6414_v57, %v631_v36  ;;  %v6488_v45 = vmax.f32 %v646_v35, %v840_v5 }
 0x111   :  { %v645_v17 = vmax.f32 %v6417_v59, %v629_v41  ;;  %v5404_v47 = vpop.f32.mrb[28].mxu0  ;;  %v6492_v44 = vmax.f32 %v644_v40, %v838_v29  ;;  %v815_v59 = vadd.f32 %v5423_v55, %v6398_v26  ;;  %v848_v41 = vmax.f32 %v828_v25, 0.0 }
 0x112   :  { %v602_v50 = vadd.f32 %v5404_v47, %v6398_v26  ;;  %v593_v56 = vpop.f32.mrb[29].mxu0  ;;  %v6495_v54 = vmax.f32 %v647_v12, %v841_v42  ;;  %v823_v47 = vadd.f32 %v6398_v26, %v822_v37 }
 0x113   :  { %v594_v60 = vadd.f32 %v6398_v26, %v593_v56  ;;  %v5405_v57 = vpop.f32.mrb[30].mxu0  ;;  %v6498_v63 = vpop.f32.mrb[28].mxu1  ;;  %v6500_v38 = vmax.f32 %v645_v17, %v839_v39  ;;  %v845_v24 = vmax.f32 %v815_v59, 0.0  ;;  %v846_v39 = vmax.f32 %v820_v32, 0.0 }
 0x114   :  { %v634_v1 = vmax.f32 %v602_v50, 0.0  ;;  %v605_v46 = vadd.f32 %v5405_v57, %v6398_v26  ;;  %v596_v3 = vpop.f32.mrb[31].mxu0  ;;  %v6504_v48 = vpop.f32.mrb[29].mxu1 }
 0x115   :  { %v632_v6 = vmax.f32 %v594_v60, 0.0  ;;  %v597_v21 = vadd.f32 %v6398_v26, %v596_v3  ;;  %v6508_v8 = vpop.f32.mrb[30].mxu1  ;;  %v847_v3 = vmax.f32 %v823_v47, 0.0 }
 0x116   :  { %v650_v10 = vmax.f32 %v6424_v15, %v634_v1  ;;  %v635_v22 = vmax.f32 %v605_v46, 0.0  ;;  %v6511_v13 = vpop.f32.mrb[31].mxu1 }
 0x117   :  { %v648_v55 = vmax.f32 %v6427_v23, %v632_v6  ;;  %v633_v5 = vmax.f32 %v597_v21, 0.0 }
 0x118   :  { %v651_v18 = vmax.f32 %v6430_v28, %v635_v22  ;;  %v6516_v9 = vmax.f32 %v650_v10, %v844_v0 }
 0x119   :  { %v649_v29 = vmax.f32 %v6433_v30, %v633_v5  ;;  %v5408_v31 = vpop.f32.mrb[32].mxu0  ;;  %v6520_v15 = vmax.f32 %v648_v55, %v842_v20  ;;  %v831_v30 = vadd.f32 %v5427_v34, %v6398_v26 }
 0x11a   :  { %v618_v33 = vadd.f32 %v5408_v31, %v6398_v26  ;;  %v609_v35 = vpop.f32.mrb[33].mxu0  ;;  %v6523_v23 = vmax.f32 %v651_v18, %v845_v24 }
 0x11b   :  { %v610_v36 = vadd.f32 %v6398_v26, %v609_v35  ;;  %v5409_v28 = vpop.f32.mrb[34].mxu0  ;;  %v6526_v40 = vpop.f32.mrb[32].mxu1  ;;  %v6528_v14 = vmax.f32 %v649_v29, %v843_v62  ;;  %v849_v1 = vmax.f32 %v831_v30, 0.0 }
 0x11c   :  { %v638_v42 = vmax.f32 %v618_v33, 0.0  ;;  %v621_v27 = vadd.f32 %v5409_v28, %v6398_v26  ;;  %v612_v12 = vpop.f32.mrb[35].mxu0  ;;  %v6532_v43 = vpop.f32.mrb[33].mxu1 }
 0x11d   :  { %v636_v17 = vmax.f32 %v610_v36, 0.0  ;;  %v613_v51 = vadd.f32 %v6398_v26, %v612_v12  ;;  %v6536_v50 = vpop.f32.mrb[34].mxu1 }
 0x11e   :  { %v654_v56 = vmax.f32 %v6440_v49, %v638_v42  ;;  %v639_v60 = vmax.f32 %v621_v27, 0.0  ;;  %v6539_v57 = vpop.f32.mrb[35].mxu1 }
 0x11f   :  { %v652_v34 = vmax.f32 %v6442_v53, %v636_v17  ;;  %v637_v0 = vmax.f32 %v613_v51, 0.0 }
 0x120   :  { %v655_v59 = vmax.f32 %v6446_v58, %v639_v60  ;;  %v6543_v46 = vmax.f32 %v654_v56, %v848_v41 }
 0x121   :  { %v653_v37 = vmax.f32 %v6450_v61, %v637_v0  ;;  %v5432_v20 = vpop.f32.mrb[36].mxu0  ;;  %v6546_v6 = vmax.f32 %v652_v34, %v846_v39 }
 0x122   :  { %v990_v7 = vadd.f32 %v5432_v20, %v6398_v26  ;;  %v981_v49 = vpop.f32.mrb[37].mxu0  ;;  %v6549_v21 = vmax.f32 %v655_v59, %v849_v1 }
 0x123   :  { %v982_v10 = vadd.f32 %v6398_v26, %v981_v49  ;;  %v5433_v53 = vpop.f32.mrb[38].mxu0  ;;  %v6552_v22 = vpop.f32.mrb[36].mxu1  ;;  %v6554_v55 = vmax.f32 %v653_v37, %v847_v3 }
 0x124   :  { %v1046_v58 = vmax.f32 %v990_v7, 0.0  ;;  %v993_v5 = vadd.f32 %v5433_v53, %v6398_v26  ;;  %v984_v24 = vpop.f32.mrb[39].mxu0  ;;  %v6557_v61 = vpop.f32.mrb[37].mxu1 }
 0x125   :  { %v1044_v18 = vmax.f32 %v982_v10, 0.0  ;;  %v985_v25 = vadd.f32 %v6398_v26, %v984_v24  ;;  %v6560_v62 = vpop.f32.mrb[38].mxu1 }
 0x126   :  { %v1062_v29 = vmax.f32 %v6469_v4, %v1046_v58  ;;  %v1047_v31 = vmax.f32 %v993_v5, 0.0  ;;  %v6563_v32 = vpop.f32.mrb[39].mxu1 }
 0x127   :  { %v1060_v33 = vmax.f32 %v6472_v52, %v1044_v18  ;;  %v1045_v35 = vmax.f32 %v985_v25, 0.0 }
 0x128   :  { %v1063_v36 = vmax.f32 %v6475_v11, %v1047_v31 }
 0x129   :  { %v1061_v28 = vmax.f32 %v6478_v16, %v1045_v35  ;;  %v5436_v41 = vpop.f32.mrb[40].mxu0 }
 0x12a   :  { %v1077_v42 = vpack.c.bf16 %v1063_v36, %v1062_v29  ;;  %v1006_v4 = vadd.f32 %v5436_v41, %v6398_v26  ;;  %v997_v30 = vpop.f32.mrb[41].mxu0 }
 0x12b   :  { %v1076_v27 = vpack.c.bf16 %v1061_v28, %v1060_v33  ;;  %v998_v52 = vadd.f32 %v6398_v26, %v997_v30  ;;  %v5437_v12 = vpop.f32.mrb[42].mxu0  ;;  %v6574_v11 = vpop.f32.mrb[40].mxu1 }
 0x12c   :  { %v1050_v16 = vmax.f32 %v1006_v4, 0.0  ;;  %v1009_v39 = vadd.f32 %v5437_v12, %v6398_v26  ;;  %v1000_v17 = vpop.f32.mrb[43].mxu0  ;;  %v6577_v47 = vpop.f32.mrb[41].mxu1  ;;  %v2212_v33 = vsel %vm2137_vm3, %v1077_v42, 0 }
 0x12d   :  { %v1048_v51 = vmax.f32 %v998_v52, 0.0  ;;  %v1001_v56 = vadd.f32 %v6398_v26, %v1000_v17  ;;  %v2209_v60 = vsel %vm2137_vm3, %v1076_v27, 0  ;;  %v6581_v34 = vpop.f32.mrb[42].mxu1 }
 0x12e   :  { %v6584_v0 = vmax.f32 %v6488_v45, %v1050_v16  ;;  %v1051_v1 = vmax.f32 %v1009_v39, 0.0  ;;  %5557 = vmatpush3.bf16.xpose.msra.mxu1 %v2209_v60  ;;  %v6586_v59 = vpop.f32.mrb[43].mxu1 }
 0x12f   :  { %v1064_v3 = vmax.f32 %v6492_v44, %v1048_v51  ;;  %v1049_v37 = vmax.f32 %v1001_v56, 0.0  ;;  %5558 = vmatprep.subr.bf16.mxu1 %v7889_v19 }
 0x130   :  { %v6591_v20 = vmax.f32 %v6495_v54, %v1051_v1 }
 0x131   :  { %v1065_v7 = vmax.f32 %v6500_v38, %v1049_v37  ;;  %v5440_v49 = vpop.f32.mrb[44].mxu0 }
 0x132   :  { %v1079_v10 = vpack.c.bf16 %v6591_v20, %v6584_v0  ;;  %v1022_v45 = vadd.f32 %v5440_v49, %v6398_v26  ;;  %v1013_v53 = vpop.f32.mrb[45].mxu0 }
 0x133   :  { %v1078_v58 = vpack.c.bf16 %v1065_v7, %v1064_v3  ;;  %v1014_v5 = vadd.f32 %v6398_v26, %v1013_v53  ;;  %v5441_v24 = vpop.f32.mrb[46].mxu0  ;;  %v5486_v44 = vpop.f32.mrb[44].mxu1  ;;  %v1200_v3 = vadd.f32 %v6398_v26, %v6504_v48  ;;  %v1211_v53 = vadd.f32 %v6508_v8, %v6398_v26 }
 0x134   :  { %v1054_v18 = vmax.f32 %v1022_v45, 0.0  ;;  %v1025_v25 = vadd.f32 %v5441_v24, %v6398_v26  ;;  %v1016_v29 = vpop.f32.mrb[47].mxu0  ;;  %v1603_v54 = vpop.f32.mrb[45].mxu1 }
 0x135   :  { %v1052_v31 = vmax.f32 %v1014_v5, 0.0  ;;  %v1017_v38 = vadd.f32 %v6398_v26, %v1016_v29  ;;  %v5487_v35 = vpop.f32.mrb[46].mxu1  ;;  %v2215_v49 = vsel %vm2137_vm3, %v1078_v58, 0  ;;  %v1612_v29 = vadd.f32 %v5486_v44, %v6398_v26 }
 0x136   :  { %v6602_v36 = vmax.f32 %v6516_v9, %v1054_v18  ;;  %v1055_v28 = vmax.f32 %v1025_v25, 0.0  ;;  %5559 = vmatpush3.bf16.xpose.msra.mxu1 %v2212_v33  ;;  %v1606_v41 = vpop.f32.mrb[47].mxu1  ;;  %v1262_v8 = vmax.f32 %v1200_v3, 0.0  ;;  %v1265_v33 = vmax.f32 %v1211_v53, 0.0 }
 0x137   :  { %v6605_v4 = vmax.f32 %v6520_v15, %v1052_v31  ;;  %v1053_v30 = vmax.f32 %v1017_v38, 0.0  ;;  %5560 = vmatprep.subr.bf16.mxu1 %v7889_v19  ;;  %v1607_v3 = vadd.f32 %v6398_v26, %v1606_v41 }
 0x138   :  { %v6609_v27 = vmax.f32 %v6523_v23, %v1055_v28  ;;  %v1208_v23 = vadd.f32 %v6498_v63, %v6398_v26  ;;  %v6652_v28 = vadd.f32 %v6526_v40, %v6398_v26  ;;  %v2218_v40 = vsel %vm2137_vm3, %v1079_v10, 0 }
 0x139   :  { %v6612_v52 = vmax.f32 %v6528_v14, %v1053_v30  ;;  %v5444_v42 = vpop.f32.mrb[48].mxu0  ;;  %v1227_v10 = vadd.f32 %v6536_v50, %v6398_v26  ;;  %v1667_v50 = vmax.f32 %v1607_v3, 0.0 }
 0x13a   :  { %v1081_v9 = vpack.c.bf16 %v6609_v27, %v6602_v36  ;;  %v1038_v12 = vadd.f32 %v5444_v42, %v6398_v26  ;;  %v1029_v16 = vpop.f32.mrb[49].mxu0  ;;  %v1264_v25 = vmax.f32 %v1208_v23, 0.0  ;;  %v1268_v53 = vmax.f32 %v6652_v28, 0.0 }
 0x13b   :  { %v1080_v15 = vpack.c.bf16 %v6612_v52, %v6605_v4  ;;  %v1030_v39 = vadd.f32 %v6398_v26, %v1029_v16  ;;  %v5445_v17 = vpop.f32.mrb[50].mxu0  ;;  %v5490_v51 = vpop.f32.mrb[48].mxu1  ;;  %v1668_v16 = vmax.f32 %v1612_v29, 0.0  ;;  %v1269_v28 = vmax.f32 %v1227_v10, 0.0 }
 0x13c   :  { %v1058_v56 = vmax.f32 %v1038_v12, 0.0  ;;  %v1041_v14 = vadd.f32 %v5445_v17, %v6398_v26  ;;  %v1032_v60 = vpop.f32.mrb[51].mxu0  ;;  %v1619_v1 = vpop.f32.mrb[49].mxu1  ;;  %v1615_v17 = vadd.f32 %v5487_v35, %v6398_v26  ;;  %v1232_v10 = vadd.f32 %v6398_v26, %v6557_v61 }
 0x13d   :  { %v1056_v37 = vmax.f32 %v1030_v39, 0.0  ;;  %v1033_v7 = vadd.f32 %v6398_v26, %v1032_v60  ;;  %v6627_v45 = vpop.f32.mrb[50].mxu1 }
 0x13e   :  { %v6632_v63 = vmax.f32 %v6543_v46, %v1058_v56  ;;  %v1059_v5 = vmax.f32 %v1041_v14, 0.0  ;;  %5561 = vmatpush3.bf16.xpose.msra.mxu1 %v2215_v49  ;;  %v6634_v24 = vpop.f32.mrb[51].mxu1  ;;  %v1203_v46 = vadd.f32 %v6398_v26, %v6511_v13  ;;  %v6659_v13 = vadd.f32 %v6398_v26, %v6532_v43 }
 0x13f   :  { %v6637_v18 = vmax.f32 %v6546_v6, %v1056_v37  ;;  %v1057_v48 = vmax.f32 %v1033_v7, 0.0  ;;  %5562 = vmatprep.subr.bf16.mxu1 %v7889_v19  ;;  %v1604_v6 = vadd.f32 %v6398_v26, %v1603_v54  ;;  %v1669_v41 = vmax.f32 %v1615_v17, 0.0 }
 0x140   :  { %v6641_v58 = vmax.f32 %v6549_v21, %v1059_v5  ;;  %v1263_v20 = vmax.f32 %v1203_v46, 0.0  ;;  %v1266_v5 = vmax.f32 %v6659_v13, 0.0  ;;  %v1628_v46 = vadd.f32 %v5490_v51, %v6398_v26 }
 0x141   :  { %v6647_v31 = vmax.f32 %v6554_v55, %v1057_v48  ;;  %v5468_v38 = vpop.f32.mrb[52].mxu0  ;;  %v1666_v14 = vmax.f32 %v1604_v6, 0.0  ;;  %v1240_v51 = vadd.f32 %v6552_v22, %v6398_v26  ;;  %v1623_v4 = vadd.f32 %v6398_v26, %v6634_v24 }
 0x142   :  { %v1083_v21 = vpack.c.bf16 %v6641_v58, %v6632_v63  ;;  %v1402_v44 = vadd.f32 %v5468_v38, %v6398_v26  ;;  %v1393_v30 = vpop.f32.mrb[53].mxu0 }
 0x143   :  { %v1082_v55 = vpack.c.bf16 %v6647_v31, %v6637_v18  ;;  %v1394_v54 = vadd.f32 %v6398_v26, %v1393_v30  ;;  %v5469_v42 = vpop.f32.mrb[54].mxu0  ;;  %v6668_v12 = vpop.f32.mrb[52].mxu1  ;;  %v1620_v30 = vadd.f32 %v6398_v26, %v1619_v1  ;;  %v2221_v1 = vsel %vm2137_vm3, %v1080_v15, 0 }
 0x144   :  { %v1458_v39 = vmax.f32 %v1402_v44, 0.0  ;;  %v1405_v43 = vadd.f32 %v5469_v42, %v6398_v26  ;;  %v1396_v23 = vpop.f32.mrb[55].mxu0  ;;  %v6672_v56 = vpop.f32.mrb[53].mxu1  ;;  %v1671_v61 = vmax.f32 %v1623_v4, 0.0  ;;  %v1248_v4 = vadd.f32 %v6398_v26, %v6577_v47 }
 0x145   :  { %v1456_v60 = vmax.f32 %v1394_v54, 0.0  ;;  %v1397_v37 = vadd.f32 %v6398_v26, %v1396_v23  ;;  %v6676_v0 = vpop.f32.mrb[54].mxu1  ;;  %v1631_v23 = vadd.f32 %v6627_v45, %v6398_v26  ;;  %v1670_v3 = vmax.f32 %v1620_v30, 0.0 }
 0x146   :  { %v1474_v7 = vmax.f32 %v1264_v25, %v1458_v39  ;;  %v1459_v49 = vmax.f32 %v1405_v43, 0.0  ;;  %5563 = vmatpush3.bf16.xpose.msra.mxu1 %v2218_v40  ;;  %v6680_v35 = vpop.f32.mrb[55].mxu1  ;;  %v1636_v30 = vadd.f32 %v6398_v26, %v6672_v56  ;;  %v2224_v56 = vsel %vm2137_vm3, %v1081_v9, 0 }
 0x147   :  { %v1472_v48 = vmax.f32 %v1262_v8, %v1456_v60  ;;  %v1457_v29 = vmax.f32 %v1397_v37, 0.0  ;;  %5564 = vmatprep.subr.bf16.mxu1 %v7889_v19  ;;  %v1219_v8 = vadd.f32 %v6398_v26, %v6539_v57  ;;  %v1672_v57 = vmax.f32 %v1628_v46, 0.0 }
 0x148   :  { %v1475_v38 = vmax.f32 %v1265_v33, %v1459_v49  ;;  %v6686_v6 = vmax.f32 %v1474_v7, %v1668_v16  ;;  %v1673_v24 = vmax.f32 %v1631_v23, 0.0  ;;  %v1639_v36 = vadd.f32 %v6398_v26, %v6680_v35 }
 0x149   :  { %v1473_v25 = vmax.f32 %v1263_v20, %v1457_v29  ;;  %v5472_v44 = vpop.f32.mrb[56].mxu0  ;;  %v6689_v54 = vmax.f32 %v1472_v48, %v1666_v14  ;;  %v1267_v20 = vmax.f32 %v1219_v8, 0.0  ;;  %v1272_v48 = vmax.f32 %v1240_v51, 0.0 }
 0x14a   :  { %v1418_v13 = vadd.f32 %v5472_v44, %v6398_v26  ;;  %v1409_v42 = vpop.f32.mrb[57].mxu0  ;;  %v6694_v40 = vmax.f32 %v1475_v38, %v1669_v41  ;;  %v1243_v29 = vadd.f32 %v6560_v62, %v6398_v26  ;;  %v1270_v62 = vmax.f32 %v1232_v10, 0.0 }
 0x14b   :  { %v1410_v33 = vadd.f32 %v6398_v26, %v1409_v42  ;;  %v5473_v16 = vpop.f32.mrb[58].mxu0  ;;  %v6703_v39 = vpop.f32.mrb[56].mxu1  ;;  %v6705_v17 = vmax.f32 %v1473_v25, %v1667_v50  ;;  %v1644_v50 = vadd.f32 %v6668_v12, %v6398_v26  ;;  %v1256_v12 = vadd.f32 %v6574_v11, %v6398_v26 }
 0x14c   :  { %v1462_v43 = vmax.f32 %v1418_v13, 0.0  ;;  %v1421_v14 = vadd.f32 %v5473_v16, %v6398_v26  ;;  %v1412_v22 = vpop.f32.mrb[59].mxu0  ;;  %v6710_v60 = vpop.f32.mrb[57].mxu1 }
 0x14d   :  { %v1460_v37 = vmax.f32 %v1410_v33, 0.0  ;;  %v1413_v52 = vadd.f32 %v6398_v26, %v1412_v22  ;;  %v6715_v15 = vpop.f32.mrb[58].mxu1  ;;  %v1674_v22 = vmax.f32 %v1636_v30, 0.0 }
 0x14e   :  { %v1478_v7 = vmax.f32 %v1268_v53, %v1462_v43  ;;  %v1463_v45 = vmax.f32 %v1421_v14, 0.0  ;;  %5565 = vmatpush3.bf16.xpose.msra.mxu1 %v2221_v1  ;;  %v6719_v49 = vpop.f32.mrb[59].mxu1  ;;  %v1647_v43 = vadd.f32 %v6676_v0, %v6398_v26 }
 0x14f   :  { %v1476_v41 = vmax.f32 %v1266_v5, %v1460_v37  ;;  %v1461_v38 = vmax.f32 %v1413_v52, 0.0  ;;  %5566 = vmatprep.subr.bf16.mxu1 %v7889_v19  ;;  %v1235_v5 = vadd.f32 %v6398_v26, %v6563_v32  ;;  %v1676_v32 = vmax.f32 %v1644_v50, 0.0 }
 0x150   :  { %v1479_v46 = vmax.f32 %v1269_v28, %v1463_v45  ;;  %v6726_v25 = vmax.f32 %v1478_v7, %v1672_v57  ;;  %v1273_v37 = vmax.f32 %v1243_v29, 0.0  ;;  %v1276_v7 = vmax.f32 %v1256_v12, 0.0 }
 0x151   :  { %v1477_v53 = vmax.f32 %v1267_v20, %v1461_v38  ;;  %v5476_v44 = vpop.f32.mrb[60].mxu0  ;;  %v6730_v8 = vmax.f32 %v1476_v41, %v1670_v3  ;;  %v1271_v10 = vmax.f32 %v1235_v5, 0.0  ;;  %v1677_v35 = vmax.f32 %v1647_v43, 0.0 }
 0x152   :  { %v1434_v13 = vadd.f32 %v5476_v44, %v6398_v26  ;;  %v1425_v28 = vpop.f32.mrb[61].mxu0  ;;  %v6735_v42 = vmax.f32 %v1479_v46, %v1673_v24  ;;  %v1660_v24 = vadd.f32 %v6703_v39, %v6398_v26  ;;  %v1675_v46 = vmax.f32 %v1639_v36, 0.0 }
 0x153   :  { %v1426_v51 = vadd.f32 %v6398_v26, %v1425_v28  ;;  %v5477_v33 = vpop.f32.mrb[62].mxu0  ;;  %v6744_v16 = vpop.f32.mrb[60].mxu1  ;;  %v6746_v1 = vmax.f32 %v1477_v53, %v1671_v61  ;;  %v1652_v50 = vadd.f32 %v6398_v26, %v6710_v60  ;;  %v1274_v53 = vmax.f32 %v1248_v4, 0.0 }
 0x154   :  { %v1466_v57 = vmax.f32 %v1434_v13, 0.0  ;;  %v1437_v23 = vadd.f32 %v5477_v33, %v6398_v26  ;;  %v1428_v11 = vpop.f32.mrb[63].mxu0  ;;  %v6751_v14 = vpop.f32.mrb[61].mxu1  ;;  %v1259_v44 = vadd.f32 %v6581_v34, %v6398_v26  ;;  %v1251_v39 = vadd.f32 %v6398_v26, %v6586_v59 }
 0x155   :  { %v1464_v3 = vmax.f32 %v1426_v51, 0.0  ;;  %v1429_v27 = vadd.f32 %v6398_v26, %v1428_v11  ;;  %v6756_v9 = vpop.f32.mrb[62].mxu1  ;;  %v2227_v60 = vsel %vm2137_vm3, %v1082_v55, 0  ;;  %v1680_v34 = vmax.f32 %v1660_v24, 0.0 }
 0x156   :  { %v1482_v52 = vmax.f32 %v1272_v48, %v1466_v57  ;;  %v1467_v0 = vmax.f32 %v1437_v23, 0.0  ;;  %5567 = vmatpush3.bf16.xpose.msra.mxu1 %v2224_v56  ;;  %v6760_v20 = vpop.f32.mrb[63].mxu1  ;;  %v1663_v56 = vadd.f32 %v6715_v15, %v6398_v26  ;;  %v1678_v43 = vmax.f32 %v1652_v50, 0.0 }
 0x157   :  { %v1480_v45 = vmax.f32 %v1270_v62, %v1464_v3  ;;  %v1465_v41 = vmax.f32 %v1429_v27, 0.0  ;;  %5568 = vmatprep.subr.bf16.mxu1 %v7889_v19  ;;  %v1655_v11 = vadd.f32 %v6398_v26, %v6719_v49  ;;  %v1277_v55 = vmax.f32 %v1259_v44, 0.0 }
 0x158   :  { %v1483_v38 = vmax.f32 %v1273_v37, %v1467_v0  ;;  %v6765_v29 = vmax.f32 %v1482_v52, %v1676_v32  ;;  %v1275_v27 = vmax.f32 %v1251_v39, 0.0  ;;  %v1681_v4 = vmax.f32 %v1663_v56, 0.0 }
 0x159   :  { %v1481_v47 = vmax.f32 %v1271_v10, %v1465_v41  ;;  %v5480_v48 = vpop.f32.mrb[64].mxu0  ;;  %v6769_v61 = vmax.f32 %v1480_v45, %v1674_v22  ;;  %v2032_v0 = vadd.f32 %v6744_v16, %v6398_v26  ;;  %v1679_v49 = vmax.f32 %v1655_v11, 0.0 }
 0x15a   :  { %v1450_v30 = vadd.f32 %v5480_v48, %v6398_v26  ;;  %v1441_v62 = vpop.f32.mrb[65].mxu0  ;;  %v6774_v5 = vmax.f32 %v1483_v38, %v1677_v35  ;;  %v2230_v48 = vsel %vm2137_vm3, %v1083_v21, 0 }
 0x15b   :  { %v1442_v13 = vadd.f32 %v6398_v26, %v1441_v62  ;;  %v5481_v28 = vpop.f32.mrb[66].mxu0  ;;  %v5526_v12 = vpop.f32.mrb[64].mxu1  ;;  %v6783_v51 = vmax.f32 %v1481_v47, %v1675_v46 }
 0x15c   :  { %v1470_v33 = vmax.f32 %v1450_v30, 0.0  ;;  %v1453_v32 = vadd.f32 %v5481_v28, %v6398_v26  ;;  %v1444_v57 = vpop.f32.mrb[67].mxu0  ;;  %v2039_v59 = vpop.f32.mrb[65].mxu1 }
 0x15d   :  { %v1468_v23 = vmax.f32 %v1442_v13, 0.0  ;;  %v1445_v18 = vadd.f32 %v6398_v26, %v1444_v57  ;;  %v5527_v31 = vpop.f32.mrb[66].mxu1  ;;  %v6834_v57 = vld [vmem:[%s7882_s1] sm:$0x3f]  }
 0x15e   :  { %v1486_v22 = vmax.f32 %v1276_v7, %v1470_v33  ;;  %v1471_v3 = vmax.f32 %v1453_v32, 0.0  ;;  %5569 = vmatpush3.bf16.xpose.msra.mxu1 %v2227_v60  ;;  %v2042_v36 = vpop.f32.mrb[67].mxu1  ;;  %v6799_v7 = vld [vmem:[%s7884_s2] ss:$0 sm:$0xff] }
 0x15f   :  { %v1484_v37 = vmax.f32 %v1274_v53, %v1468_v23  ;;  %v1469_v15 = vmax.f32 %v1445_v18, 0.0  ;;  %5570 = vmatprep.subr.bf16.mxu1 %v7889_v19  ;;  %v2024_v35 = vadd.f32 %v6799_v7, %v6751_v14  ;;  %v2088_v14 = vmax.f32 %v2032_v0, 0.0 }
 0x160   :  { %v1487_v52 = vmax.f32 %v1277_v55, %v1471_v3  ;;  %v6794_v10 = vmax.f32 %v1486_v22, %v1680_v34  ;;  %v2035_v30 = vadd.f32 %v6799_v7, %v6756_v9  ;;  %v2027_v63 = vadd.f32 %v6799_v7, %v6760_v20 }
 0x161   :  { %v1485_v45 = vmax.f32 %v1275_v27, %v1469_v15  ;;  %v5504_v41 = vpop.f32.mrb[68].mxu0  ;;  %v6803_v38 = vmax.f32 %v1484_v37, %v1678_v43  ;;  %v2086_v28 = vmax.f32 %v2024_v35, 0.0  ;;  %v2048_v23 = vadd.f32 %v6799_v7, %v5526_v12 }
 0x162   :  { %v1822_v24 = vadd.f32 %v6799_v7, %v5504_v41  ;;  %v1813_v46 = vpop.f32.mrb[69].mxu0  ;;  %v6806_v47 = vmax.f32 %v1487_v52, %v1681_v4  ;;  %v2089_v43 = vmax.f32 %v2035_v30, 0.0  ;;  %v2087_v18 = vmax.f32 %v2027_v63, 0.0 }
 0x163   :  { %v1814_v26 = vadd.f32 %v6799_v7, %v1813_v46  ;;  %v5505_v16 = vpop.f32.mrb[70].mxu0  ;;  %v6813_v50 = vpop.f32.mrb[68].mxu1  ;;  %v6815_v53 = vmax.f32 %v1485_v45, %v1679_v49  ;;  %v2040_v22 = vadd.f32 %v6799_v7, %v2039_v59  ;;  %v2051_v15 = vadd.f32 %v6799_v7, %v5527_v31 }
 0x164   :  { %v1878_v44 = vmax.f32 %v1822_v24, 0.0  ;;  %v1825_v62 = vadd.f32 %v6799_v7, %v5505_v16  ;;  %v1816_v39 = vpop.f32.mrb[71].mxu0  ;;  %v6820_v13 = vpop.f32.mrb[69].mxu1  ;;  %v2092_v45 = vmax.f32 %v2048_v23, 0.0  ;;  %v6863_v24 = vld [vmem:[%s7885_s3] sm:$0x3] }
 0x165   :  { %v1876_v60 = vmax.f32 %v1814_v26, 0.0  ;;  %v1817_v58 = vadd.f32 %v6799_v7, %v1816_v39  ;;  %v6825_v21 = vpop.f32.mrb[70].mxu1  ;;  %v2090_v26 = vmax.f32 %v2040_v22, 0.0  ;;  %v2093_v30 = vmax.f32 %v2051_v15, 0.0 }
 0x166   :  { %v1894_v34 = vmax.f32 %v6686_v6, %v1878_v44  ;;  %v1879_v33 = vmax.f32 %v1825_v62, 0.0  ;;  %5571 = vmatpush3.bf16.xpose.msra.mxu1 %v2230_v48  ;;  %v6828_v56 = vpop.f32.mrb[71].mxu1 }
 0x167   :  { %v1892_v9 = vmax.f32 %v6689_v54, %v1876_v60  ;;  %v1877_v32 = vmax.f32 %v1817_v58, 0.0  ;;  %5810 = vmatprep.subr.msk.bf16.mxu1 %vm119_vm0, %v6834_v57 }
 0x168   :  { %v6838_v20 = vmax.f32 %v1894_v34, %v2088_v14  ;;  %v1895_v6 = vmax.f32 %v6694_v40, %v1879_v33  ;;  %v5906_v40 = vld [vmem:[%s7883_s0 + $0x2c0] sm:$0xff]   ;;  %v2064_v34 = vadd.f32 %v6799_v7, %v6813_v50  ;;  %v5910_v50 = vld [vmem:[%s7883_s0 + $0x2d0] sm:$0xff]  }
 0x169   :  { %v2102_v11 = vmax.f32 %v1892_v9, %v2086_v28  ;;  %v1893_v54 = vmax.f32 %v6705_v17, %v1877_v32  ;;  %v5508_v55 = vpop.f32.mrb[72].mxu0  ;;  %v2043_v17 = vadd.f32 %v6799_v7, %v2042_v36  ;;  %v2056_v32 = vadd.f32 %v6799_v7, %v6820_v13 }
 0x16a   :  { %v6844_v3 = vmax.f32 %v1895_v6, %v2089_v43  ;;  %v1838_v27 = vadd.f32 %v6799_v7, %v5508_v55  ;;  %v1829_v37 = vpop.f32.mrb[73].mxu0 }
 0x16b   :  { %v2103_v4 = vmax.f32 %v1893_v54, %v2087_v18  ;;  %v1830_v12 = vadd.f32 %v6799_v7, %v1829_v37  ;;  %v5509_v52 = vpop.f32.mrb[74].mxu0  ;;  %v6853_v0 = vpop.f32.mrb[72].mxu1  ;;  %v2091_v60 = vmax.f32 %v2043_v17, 0.0  ;;  %v2059_v18 = vadd.f32 %v6799_v7, %v6828_v56 }
 0x16c   :  { %v1882_v59 = vmax.f32 %v1838_v27, 0.0  ;;  %v1841_v49 = vadd.f32 %v6799_v7, %v5509_v52  ;;  %v1832_v41 = vpop.f32.mrb[75].mxu0  ;;  %v2119_v31 = vpack.c.bf16 %v6844_v3, %v6838_v20  ;;  %v6858_v35 = vpop.f32.mrb[73].mxu1  ;;  %v2096_v3 = vmax.f32 %v2064_v34, 0.0 }
 0x16d   :  { %v1880_v46 = vmax.f32 %v1830_v12, 0.0  ;;  %v1833_v36 = vadd.f32 %v6799_v7, %v1832_v41  ;;  %v2118_v16 = vpack.c.bf16 %v2103_v4, %v2102_v11  ;;  %v6866_v48 = vpop.f32.mrb[74].mxu1  ;;  %5573 = vmatmul.mubr.msk.bf16.vlgmr.msra.gmra.mrb[76].mxu1 %vm2137_vm3, %v6863_v24 }
 0x16e   :  { %v1898_v14 = vmax.f32 %v6726_v25, %v1882_v59  ;;  %v1883_v44 = vmax.f32 %v1841_v49, 0.0  ;;  %v6871_v62 = vpop.f32.mrb[75].mxu1  ;;  %5595 = vmatpush3.bf16.msra.mxu1 %v6035_v2  ;;  %5596 = vmatprep.mubr.msk.bf16.mxu1 %vm94_vm1, %v5906_v40  ;;  %v2094_v40 = vmax.f32 %v2056_v32, 0.0  ;;  %v2095_v59 = vmax.f32 %v2059_v18, 0.0 }
 0x16f   :  { %v1896_v39 = vmax.f32 %v6730_v8, %v1880_v46  ;;  %v1881_v28 = vmax.f32 %v1833_v36, 0.0  ;;  %v2142_v63 = vsel %vm2137_vm3, %v2118_v16, 0  ;;  %5812 = vmatprep.subr.msk.bf16.mxu1 %vm119_vm0, %v6834_v57  ;;  %v2145_v49 = vsel %vm2137_vm3, %v2119_v31, 0  ;;  %v5912_v31 = vld [vmem:[%s7883_s0 + $0x2d8] sm:$0xff]  }
 0x170   :  { %v1899_v58 = vmax.f32 %v6735_v42, %v1883_v44  ;;  %v6880_v25 = vmax.f32 %v1898_v14, %v2092_v45  ;;  %5537 = vmatpush3.bf16.xpose.msra.mxu0 %v2142_v63  ;;  %v5908_v42 = vld [vmem:[%s7883_s0 + $0x2c8] sm:$0xff]  }
 0x171   :  { %v1897_v33 = vmax.f32 %v6746_v1, %v1881_v28  ;;  %v6885_v9 = vmax.f32 %v1896_v39, %v2090_v26  ;;  %v5512_v8 = vpop.f32.mrb[76].mxu0  ;;  %5538 = vmatprep.subr.bf16.mxu0 %v7889_v19  ;;  %v2067_v1 = vadd.f32 %v6799_v7, %v6825_v21  ;;  %v2075_v39 = vadd.f32 %v6799_v7, %v6871_v62 }
 0x172   :  { %v6893_v20 = vmax.f32 %v1899_v58, %v2093_v30  ;;  %v1854_v43 = vadd.f32 %v6799_v7, %v5512_v8  ;;  %v1845_v6 = vpop.f32.mrb[77].mxu0 }
 0x173   :  { %v2107_v23 = vmax.f32 %v1897_v33, %v2091_v60  ;;  %v1846_v13 = vadd.f32 %v6799_v7, %v1845_v6  ;;  %v5513_v11 = vpop.f32.mrb[78].mxu0  ;;  %v2097_v56 = vmax.f32 %v2067_v1, 0.0  ;;  %v2099_v1 = vmax.f32 %v2075_v39, 0.0  ;;  %v5926_v39 = vld [vmem:[%s7883_s0 + $0x318] sm:$0xff]  }
 0x174   :  { %v2121_v54 = vpack.c.bf16 %v6893_v20, %v6880_v25  ;;  %v1886_v55 = vmax.f32 %v1854_v43, 0.0  ;;  %v1857_v22 = vadd.f32 %v6799_v7, %v5513_v11  ;;  %v1848_v27 = vpop.f32.mrb[79].mxu0  ;;  %v5924_v25 = vld [vmem:[%s7883_s0 + $0x348] sm:$0xff]   ;;  %v5927_v20 = vld [vmem:[%s7883_s0 + $0x350] sm:$0xff]  }
 0x175   :  { %v2120_v21 = vpack.c.bf16 %v2107_v23, %v6885_v9  ;;  %v1884_v37 = vmax.f32 %v1846_v13, 0.0  ;;  %v1849_v15 = vadd.f32 %v6799_v7, %v1848_v27  ;;  %5597 = vmatmul.mubr.msk.bf16.vlgmr.msra.gmra.mrb[80].mxu1 %vm94_vm1, %v5908_v42 }
 0x176   :  { %v1902_v4 = vmax.f32 %v6765_v29, %v1886_v55  ;;  %v1887_v12 = vmax.f32 %v1857_v22, 0.0  ;;  %5600 = vmatprep.mubr.msk.bf16.mxu1 %vm94_vm1, %v5910_v50  ;;  %5631 = vmatpush3.bf16.msra.mxu1 %v6035_v2  ;;  %v2080_v29 = vadd.f32 %v6799_v7, %v6853_v0  ;;  %v2083_v0 = vadd.f32 %v6799_v7, %v6866_v48 }
 0x177   :  { %v1900_v52 = vmax.f32 %v6769_v61, %v1884_v37  ;;  %v1885_v17 = vmax.f32 %v1849_v15, 0.0  ;;  %5666 = vmatprep.subr.bf16.mxu1 %v7889_v19  ;;  %v2072_v61 = vadd.f32 %v6799_v7, %v6858_v35  ;;  %v2148_v50 = vsel %vm2137_vm3, %v2120_v21, 0  ;;  %v5923_v21 = vld [vmem:[%s7883_s0 + $0x340] sm:$0xff]   ;;  %v5928_v15 = vld [vmem:[%s7883_s0 + $0x358] sm:$0xff]  }
 0x178   :  { %v1903_v45 = vmax.f32 %v6774_v5, %v1887_v12  ;;  %v6917_v41 = vmax.f32 %v1902_v4, %v2096_v3  ;;  %5539 = vmatpush3.bf16.xpose.msra.mxu0 %v2145_v49  ;;  %v2100_v58 = vmax.f32 %v2080_v29, 0.0  ;;  %v2101_v43 = vmax.f32 %v2083_v0, 0.0  ;;  %v5932_v49 = vld [vmem:[%s7883_s0 + $0x368] sm:$0xff]   ;;  %v5917_v0 = vld [vmem:[%s7883_s0 + $0x2b0] sm:$0xff]  }
 0x179   :  { %v1901_v46 = vmax.f32 %v6783_v51, %v1885_v17  ;;  %v2110_v36 = vmax.f32 %v1900_v52, %v2094_v40  ;;  %v5516_v26 = vpop.f32.mrb[80].mxu0  ;;  %5540 = vmatprep.subr.bf16.mxu0 %v7889_v19  ;;  %v5914_v51 = vld [vmem:[%s7883_s0 + $0x2e0] sm:$0xff]   ;;  %v2098_v8 = vmax.f32 %v2072_v61, 0.0  ;;  %v5991_v4 = vmov 1983009808  }
 0x17a   :  { %v2113_v5 = vmax.f32 %v1903_v45, %v2097_v56  ;;  %v1870_v16 = vadd.f32 %v6799_v7, %v5516_v26  ;;  %v1861_v14 = vpop.f32.mrb[81].mxu0  ;;  %v5931_v40 = vld [vmem:[%s7883_s0 + $0x360] sm:$0xff]   ;;  %v2128_v12 = vunpack.c.l.s4 %v5991_v4  ;;  %v2130_v56 = vlaneseq  ;;  %v5935_v45 = vld [vmem:[%s7883_s0 + $0x370] sm:$0xff]  }
 0x17b   :  { %v2111_v44 = vmax.f32 %v1901_v46, %v2095_v59  ;;  %v1862_v35 = vadd.f32 %v6799_v7, %v1861_v14  ;;  %v5517_v30 = vpop.f32.mrb[82].mxu0  ;;  %v5905_v61 = vld [vmem:[%s7883_s0 + $0x280] sm:$0xff]   ;;  %v5915_v14 = vld [vmem:[%s7883_s0 + $0x2a8] sm:$0xff]  }
 0x17c   :  { %v2123_v28 = vpack.c.bf16 %v2113_v5, %v6917_v41  ;;  %v1890_v60 = vmax.f32 %v1870_v16, 0.0  ;;  %v1873_v63 = vadd.f32 %v6799_v7, %v5517_v30  ;;  %v1864_v34 = vpop.f32.mrb[83].mxu0  ;;  %v2129_v17 = vunpack.c.0.s8 %v2128_v12  ;;  %v5911_v5 = vld [vmem:[%s7883_s0 + $0x298] sm:$0xff]   ;;  %v5913_v16 = vld [vmem:[%s7883_s0 + $0x2a0] sm:$0xff]   ;;  %v5925_v30 = vld [vmem:[%s7883_s0 + $0x310] sm:$0xff]  }
 0x17d   :  { %v2122_v33 = vpack.c.bf16 %v2111_v44, %v2110_v36  ;;  %v1888_v48 = vmax.f32 %v1862_v35, 0.0  ;;  %v1865_v9 = vadd.f32 %v6799_v7, %v1864_v34  ;;  %5601 = vmatmul.mubr.msk.bf16.gmra.mrb[84].mxu1 %vm94_vm1, %v5912_v31  ;;  %v6990_v59 = vshrl.u32 %v2130_v56, 7  ;;  %v5936_v36 = vld [vmem:[%s7883_s0 + $0x378] sm:$0xff]   ;;  %v5909_v31 = vld [vmem:[%s7883_s0 + $0x290] sm:$0xff]   ;;  %v5921_v44 = vld [vmem:[%s7883_s0 + $0x300] sm:$0xff]  }
 0x17e   :  { %v1906_v32 = vmax.f32 %v6794_v10, %v1890_v60  ;;  %v1891_v42 = vmax.f32 %v1873_v63, 0.0  ;;  %5604 = vmatprep.mubr.msk.bf16.mxu1 %vm94_vm1, %v5914_v51  ;;  %v5916_v10 = vld [vmem:[%s7883_s0 + $0x2e8] sm:$0xff]   ;;  %v5919_v51 = vld [vmem:[%s7883_s0 + $0x2b8] sm:$0xff]   ;;  %v5933_v63 = vld [vmem:[%s7883_s0 + $0x330] sm:$0xff]  }
 0x17f   :  { %v1904_v62 = vmax.f32 %v6803_v38, %v1888_v48  ;;  %v1889_v6 = vmax.f32 %v1865_v9, 0.0  ;;  %v5918_v38 = vld [vmem:[%s7883_s0 + $0x2f0] sm:$0xff]   ;;  %v2154_v37 = vsel %vm2137_vm3, %v2122_v33, 0  ;;  %7893 = vst [vmem:[#allocation3_spill] sm:$0xff] %v6990_v59  ;;  %v2132_v41 = vsub.s32 %v2129_v17, %v6990_v59  ;;  %v5922_v35 = vld [vmem:[%s7883_s0 + $0x308] sm:$0xff]   ;;  %v5937_v34 = vld [vmem:[%s7883_s0 + $0x380] sm:$0xff]  }
 0x180   :  { %v1907_v23 = vmax.f32 %v6806_v47, %v1891_v42  ;;  %v2116_v13 = vmax.f32 %v1906_v32, %v2100_v58  ;;  %5541 = vmatpush3.bf16.xpose.msra.mxu0 %v2148_v50  ;;  %v2151_v47 = vsel %vm2137_vm3, %v2121_v54, 0  ;;  %v2157_v54 = vsel %vm2137_vm3, %v2123_v28, 0  ;;  %v5929_v28 = vld [vmem:[%s7883_s0 + $0x320] sm:$0xff]   ;;  %v5930_v60 = vld [vmem:[%s7883_s0 + $0x328] sm:$0xff]   ;;  %v5934_v58 = vld [vmem:[%s7883_s0 + $0x338] sm:$0xff]  }
 0x181   :  { %v1905_v11 = vmax.f32 %v6815_v53, %v1889_v6  ;;  %v2114_v18 = vmax.f32 %v1904_v62, %v2098_v8  ;;  %5542 = vmatprep.subr.bf16.mxu0 %v7889_v19  ;;  %v5920_v53 = vld [vmem:[%s7883_s0 + $0x2f8] sm:$0xff]   ;;  %v7004_v46 = vrot.slane %v6863_v24, %v2132_v41  ;;  %v5907_v24 = vld [vmem:[%s7883_s0 + $0x288] sm:$0xff]   ;;  %v5939_v48 = vld [vmem:[%s7883_s0 + $0x390] sm:$0xff]  }
 0x182   :  { %v2117_v55 = vmax.f32 %v1907_v23, %v2101_v43  ;;  %v5938_v33 = vld [vmem:[%s7883_s0 + $0x388] sm:$0xff]   ;;  %v5940_v9 = vld [vmem:[%s7883_s0 + $0x398] sm:$0xff]   ;;  %v5941_v8 = vld [vmem:[%s7883_s0 + $0x3a0] sm:$0xff]  }
 0x183   :  { %v2115_v22 = vmax.f32 %v1905_v11, %v2099_v1  ;;  %7894 = vst [vmem:[#allocation4_spill] sm:$0xff] %v7004_v46  ;;  %v7888_v26 = vshrl.u32 %v7004_v46, 16  ;;  %v5942_v32 = vld [vmem:[%s7883_s0 + $0x3a8] sm:$0xff]   ;;  %v5943_v42 = vld [vmem:[%s7883_s0 + $0x3b0] sm:$0xff]   ;;  %v5944_v43 = vld [vmem:[%s7883_s0 + $0x3b8] sm:$0xff]  }
 0x184   :  { %v2125_v3 = vpack.c.bf16 %v2117_v55, %v2116_v13  ;;  %v5946_v41 = vld [vmem:[%s7883_s0 + $0x3c8] sm:$0xff]  }
 0x185   :  { %v2124_v27 = vpack.c.bf16 %v2115_v22, %v2114_v18  ;;  %5605 = vmatmul.mubr.msk.bf16.gmra.mrb[88].mxu1 %vm94_vm1, %v5916_v10 }
 0x186   :  { %5608 = vmatprep.mubr.msk.bf16.mxu1 %vm94_vm1, %v5918_v38  ;;  %v2163_v29 = vsel %vm2137_vm3, %v2125_v3, 0 }
 0x187   :  { %v2160_v52 = vsel %vm2137_vm3, %v2124_v27, 0 }
 0x188   :  { %5543 = vmatpush3.bf16.xpose.msra.mxu0 %v2151_v47 }
 0x189   :  { %5544 = vmatprep.subr.bf16.mxu0 %v7889_v19 }
 0x18d   :  { %5609 = vmatmul.mubr.msk.bf16.gmra.mrb[92].mxu1 %vm94_vm1, %v5920_v53 }
 0x18e   :  { %5632 = vmatprep.mubr.msk.bf16.mxu1 %vm94_vm1, %v5923_v21 }
 0x190   :  { %5545 = vmatpush3.bf16.xpose.msra.mxu0 %v2154_v37 }
 0x191   :  { %5546 = vmatprep.subr.bf16.mxu0 %v7889_v19 }
 0x195   :  { %5633 = vmatmul.mubr.msk.bf16.vlgmr.msra.gmra.mrb[96].mxu1 %vm94_vm1, %v5924_v25 }
 0x196   :  { %5636 = vmatprep.mubr.msk.bf16.mxu1 %vm94_vm1, %v5927_v20 }
 0x198   :  { %5547 = vmatpush3.bf16.xpose.msra.mxu0 %v2157_v54 }
 0x199   :  { %5548 = vmatprep.subr.bf16.mxu0 %v7889_v19 }
 0x19d   :  { %5637 = vmatmul.mubr.msk.bf16.gmra.mrb[100].mxu1 %vm94_vm1, %v5928_v15 }
 0x19e   :  { %5640 = vmatprep.mubr.msk.bf16.mxu1 %vm94_vm1, %v5931_v40 }
 0x1a0   :  { %5549 = vmatpush3.bf16.xpose.msra.mxu0 %v2160_v52 }
 0x1a1   :  { %5550 = vmatprep.subr.bf16.mxu0 %v7889_v19 }
 0x1a5   :  { %5641 = vmatmul.mubr.msk.bf16.gmra.mrb[104].mxu1 %vm94_vm1, %v5932_v49  ;;  %v5945_v49 = vld [vmem:[%s7883_s0 + $0x3c0] sm:$0xff]  }
 0x1a6   :  { %5644 = vmatprep.mubr.msk.bf16.mxu1 %vm94_vm1, %v5935_v45 }
 0x1a8   :  { %5551 = vmatpush3.bf16.xpose.msra.mxu0 %v2163_v29 }
 0x1a9   :  { %5809 = vmatprep.subr.msk.bf16.mxu0 %vm119_vm0, %v6834_v57 }
 0x1ad   :  { %5645 = vmatmul.mubr.msk.bf16.gmra.mrb[108].mxu1 %vm94_vm1, %v5936_v36 }
 0x1ae   :  { %5682 = vmatprep.mubr.msk.bf16.mxu1 %vm5990_vm2, %v7889_v19 }
 0x1af   :  { %5553 = vmatmul.mubr.msk.bf16.vlgmr.msra.gmra.mrb[84].mxu0 %vm2137_vm3, %v7888_v26 }
 0x1b0   :  { %5577 = vmatpush3.bf16.msra.mxu0 %v6035_v2  ;;  %5578 = vmatprep.mubr.msk.bf16.mxu0 %vm94_vm1, %v5905_v61 }
 0x1b1   :  { %5811 = vmatprep.subr.msk.bf16.mxu0 %vm119_vm0, %v6834_v57 }
 0x1b7   :  { %5579 = vmatmul.mubr.msk.bf16.vlgmr.msra.gmra.mrb[88].mxu0 %vm94_vm1, %v5907_v24  ;;  %v5947_v24 = vld [vmem:[%s7883_s0 + $0x3d0] sm:$0xff]  }
 0x1b8   :  { %5613 = vmatpush3.bf16.msra.mxu0 %v6035_v2  ;;  %5582 = vmatprep.mubr.msk.bf16.mxu0 %vm94_vm1, %v5909_v31 }
 0x1b9   :  { %5813 = vmatprep.subr.msk.bf16.mxu0 %vm119_vm0, %v6834_v57 }
 0x1bf   :  { %5583 = vmatmul.mubr.msk.bf16.gmra.mrb[92].mxu0 %vm94_vm1, %v5911_v5  ;;  %v5948_v5 = vld [vmem:[%s7883_s0 + $0x3d8] sm:$0xff]  }
 0x1c0   :  { %5586 = vmatprep.mubr.msk.bf16.mxu0 %vm94_vm1, %v5913_v16 }
 0x1c7   :  { %5587 = vmatmul.mubr.msk.bf16.gmra.mrb[96].mxu0 %vm94_vm1, %v5915_v14 }
 0x1c8   :  { %5590 = vmatprep.mubr.msk.bf16.mxu0 %vm94_vm1, %v5917_v0 }
 0x1cf   :  { %5591 = vmatmul.mubr.msk.bf16.gmra.mrb[100].mxu0 %vm94_vm1, %v5919_v51 }
 0x1d0   :  { %5614 = vmatprep.mubr.msk.bf16.mxu0 %vm94_vm1, %v5921_v44 }
 0x1d7   :  { %5615 = vmatmul.mubr.msk.bf16.vlgmr.msra.gmra.mrb[104].mxu0 %vm94_vm1, %v5922_v35 }
 0x1d8   :  { %5649 = vmatpush3.bf16.msra.mxu0 %v6035_v2  ;;  %5618 = vmatprep.mubr.msk.bf16.mxu0 %vm94_vm1, %v5925_v30 }
 0x1d9   :  { %5814 = vmatprep.subr.msk.bf16.mxu0 %vm119_vm0, %v6834_v57 }
 0x1df   :  { %5619 = vmatmul.mubr.msk.bf16.gmra.mrb[108].mxu0 %vm94_vm1, %v5926_v39 }
 0x1e0   :  { %5622 = vmatprep.mubr.msk.bf16.mxu0 %vm94_vm1, %v5929_v28  ;;  %v5949_v28 = vld [vmem:[%s7883_s0 + $0x3e0] sm:$0xff]  }
 0x1e7   :  { %5623 = vmatmul.mubr.msk.bf16.gmra.mrb[112].mxu0 %vm94_vm1, %v5930_v60 }
 0x1e8   :  { %5626 = vmatprep.mubr.msk.bf16.mxu0 %vm94_vm1, %v5933_v63  ;;  %v5950_v63 = vld [vmem:[%s7883_s0 + $0x3e8] sm:$0xff]  }
 0x1ef   :  { %5627 = vmatmul.mubr.msk.bf16.gmra.mrb[116].mxu0 %vm94_vm1, %v5934_v58 }
 0x1f0   :  { %5650 = vmatprep.mubr.msk.bf16.mxu0 %vm94_vm1, %v5937_v34 }
 0x1f7   :  { %5651 = vmatmul.mubr.msk.bf16.vlgmr.msra.gmra.mrb[120].mxu0 %vm94_vm1, %v5938_v33 }
 0x1f8   :  { %5654 = vmatprep.mubr.msk.bf16.mxu0 %vm94_vm1, %v5939_v48  ;;  %5687 = vmatpush3.bf16.msra.mxu0 %v6035_v2 }
 0x1f9   :  { %5816 = vmatprep.subr.msk.bf16.mxu0 %vm119_vm0, %v6834_v57 }
 0x1ff   :  { %5655 = vmatmul.mubr.msk.bf16.gmra.mrb[124].mxu0 %vm94_vm1, %v5940_v9 }
 0x200   :  { %5658 = vmatprep.mubr.msk.bf16.mxu0 %vm94_vm1, %v5941_v8 }
 0x207   :  { %5659 = vmatmul.mubr.msk.bf16.gmra.mrb[128].mxu0 %vm94_vm1, %v5942_v32 }
 0x208   :  { %5662 = vmatprep.mubr.msk.bf16.mxu0 %vm94_vm1, %v5943_v42 }
 0x20f   :  { %5663 = vmatmul.mubr.msk.bf16.gmra.mrb[132].mxu0 %vm94_vm1, %v5944_v43 }
 0x210   :  { %5688 = vmatprep.mubr.msk.bf16.mxu0 %vm94_vm1, %v5945_v49 }
 0x217   :  { %5689 = vmatmul.mubr.msk.bf16.vlgmr.msra.gmra.mrb[136].mxu0 %vm94_vm1, %v5946_v41 }
 0x218   :  { %5723 = vmatpush3.bf16.msra.mxu0 %v6035_v2  ;;  %5692 = vmatprep.mubr.msk.bf16.mxu0 %vm94_vm1, %v5947_v24  ;;  %v5951_v24 = vld [vmem:[%s7883_s0 + $0x3f0] sm:$0xff]  }
 0x219   :  { %5818 = vmatprep.subr.msk.bf16.mxu0 %vm119_vm0, %v6834_v57 }
 0x21f   :  { %5693 = vmatmul.mubr.msk.bf16.gmra.mrb[140].mxu0 %vm94_vm1, %v5948_v5 }
 0x220   :  { %5696 = vmatprep.mubr.msk.bf16.mxu0 %vm94_vm1, %v5949_v28 }
 0x227   :  { %5697 = vmatmul.mubr.msk.bf16.gmra.mrb[144].mxu0 %vm94_vm1, %v5950_v63 }
 0x228   :  { %5700 = vmatprep.mubr.msk.bf16.mxu0 %vm94_vm1, %v5951_v24 }
 0x240   :  { %v2266_v62 = vpop.f32.mrb[76].mxu1 }
 0x241   :  { %v5574_v6 = vpop.f32.mrb[77].mxu1 }
 0x242   :  { %v2269_v1 = vpop.f32.mrb[78].mxu1 }
 0x243   :  { %v5575_v50 = vpop.f32.mrb[79].mxu1 }
 0x248   :  { %v5598_v23 = vpop.f32.mrb[80].mxu1 }
 0x249   :  { %v2581_v13 = vpop.f32.mrb[81].mxu1  ;;  %v2590_v39 = vadd.f32 %v6799_v7, %v5598_v23 }
 0x24a   :  { %v5599_v11 = vpop.f32.mrb[82].mxu1  ;;  %v2582_v60 = vadd.f32 %v6799_v7, %v2581_v13 }
 0x24b   :  { %v2584_v18 = vpop.f32.mrb[83].mxu1  ;;  %v2593_v58 = vadd.f32 %v6799_v7, %v5599_v11  ;;  %v2646_v9 = vmax.f32 %v2590_v39, 0.0 }
 0x24c   :  { %v2585_v33 = vadd.f32 %v6799_v7, %v2584_v18  ;;  %v2644_v42 = vmax.f32 %v2582_v60, 0.0 }
 0x24d   :  { %v2647_v1 = vmax.f32 %v2593_v58, 0.0 }
 0x24e   :  { %v2645_v11 = vmax.f32 %v2585_v33, 0.0 }
 0x250   :  { %v7126_v10 = vpop.f32.mrb[84].mxu1 }
 0x251   :  { %v7128_v55 = vpop.f32.mrb[85].mxu1  ;;  %v2606_v41 = vadd.f32 %v6799_v7, %v7126_v10 }
 0x252   :  { %v7130_v38 = vpop.f32.mrb[86].mxu1 }
 0x253   :  { %v7132_v22 = vpop.f32.mrb[87].mxu1  ;;  %v2650_v63 = vmax.f32 %v2606_v41, 0.0 }
 0x254   :  { %v2601_v28 = vadd.f32 %v6799_v7, %v7132_v22 }
 0x258   :  { %v7134_v3 = vpop.f32.mrb[88].mxu1 }
 0x259   :  { %v7136_v27 = vpop.f32.mrb[89].mxu1 }
 0x25a   :  { %v7138_v47 = vpop.f32.mrb[90].mxu1 }
 0x25b   :  { %v7140_v53 = vpop.f32.mrb[91].mxu1  ;;  %v2625_v41 = vadd.f32 %v6799_v7, %v7138_v47 }
 0x260   :  { %v7142_v21 = vpop.f32.mrb[92].mxu1 }
 0x261   :  { %v7144_v37 = vpop.f32.mrb[93].mxu1 }
 0x262   :  { %v7146_v25 = vpop.f32.mrb[94].mxu1 }
 0x263   :  { %v7148_v20 = vpop.f32.mrb[95].mxu1 }
 0x268   :  { %v7150_v54 = vpop.f32.mrb[96].mxu1 }
 0x269   :  { %v7152_v15 = vpop.f32.mrb[97].mxu1 }
 0x26a   :  { %v7154_v40 = vpop.f32.mrb[98].mxu1 }
 0x26b   :  { %v7156_v4 = vpop.f32.mrb[99].mxu1 }
 0x270   :  { %v7158_v12 = vpop.f32.mrb[100].mxu1 }
 0x271   :  { %v7160_v56 = vpop.f32.mrb[101].mxu1 }
 0x272   :  { %v7162_v52 = vpop.f32.mrb[102].mxu1 }
 0x273   :  { %v7164_v17 = vpop.f32.mrb[103].mxu1 }
 0x278   :  { %v7169_v45 = vpop.f32.mrb[104].mxu1 }
 0x279   :  { %v7174_v29 = vpop.f32.mrb[105].mxu1 }
 0x27a   :  { %v7177_v36 = vpop.f32.mrb[106].mxu1 }
 0x27b   :  { %v7180_v61 = vpop.f32.mrb[107].mxu1 }
 0x280   :  { %v7188_v31 = vpop.f32.mrb[108].mxu1 }
 0x281   :  { %v7193_v16 = vpop.f32.mrb[109].mxu1 }
 0x282   :  { %v2199_v14 = vpop.f32.mrb[84].mxu0  ;;  %v7196_v0 = vpop.f32.mrb[110].mxu1 }
 0x283   :  { %v7199_v57 = vadd.f32 %v2266_v62, %v2199_v14  ;;  %v5554_v51 = vpop.f32.mrb[85].mxu0  ;;  %v7201_v44 = vpop.f32.mrb[111].mxu1 }
 0x284   :  { %v2202_v35 = vpop.f32.mrb[86].mxu0  ;;  %v2598_v51 = vadd.f32 %v6799_v7, %v7128_v55  ;;  %v5952_v55 = vld [vmem:[%s7883_s0 + $0x3f8] sm:$0xff]  }
 0x285   :  { %v5555_v30 = vpop.f32.mrb[87].mxu0  ;;  %5701 = vmatmul.mubr.msk.bf16.gmra.mrb[148].mxu0 %vm94_vm1, %v5952_v55  ;;  %v2655_v55 = vmax.f32 %v2625_v41, 0.0 }
 0x286   :  { %v2609_v30 = vadd.f32 %v6799_v7, %v7130_v38  ;;  %v2648_v33 = vmax.f32 %v2598_v51, 0.0 }
 0x28a   :  { %v5580_v34 = vpop.f32.mrb[88].mxu0 }
 0x28b   :  { %v2396_v48 = vadd.f32 %v6799_v7, %v5580_v34  ;;  %v2387_v8 = vpop.f32.mrb[89].mxu0 }
 0x28c   :  { %v2388_v32 = vadd.f32 %v6799_v7, %v2387_v8  ;;  %v5581_v43 = vpop.f32.mrb[90].mxu0  ;;  %v2651_v8 = vmax.f32 %v2609_v30, 0.0 }
 0x28d   :  { %v2452_v62 = vmax.f32 %v2396_v48, 0.0  ;;  %v2399_v6 = vadd.f32 %v6799_v7, %v5581_v43  ;;  %v2390_v50 = vpop.f32.mrb[91].mxu0  ;;  %v2649_v43 = vmax.f32 %v2601_v28, 0.0 }
 0x28e   :  { %v2450_v23 = vmax.f32 %v2388_v32, 0.0  ;;  %v2391_v13 = vadd.f32 %v6799_v7, %v2390_v50  ;;  %v5954_v50 = vld [vmem:[%s7883_s0 + $0x440] sm:$0xff]  }
 0x28f   :  { %v7219_v18 = vmax.f32 %v2452_v62, %v2646_v9  ;;  %v2453_v49 = vmax.f32 %v2399_v6, 0.0  ;;  %5724 = vmatprep.mubr.msk.bf16.mxu0 %vm94_vm1, %v5954_v50 }
 0x290   :  { %v7226_v5 = vmax.f32 %v2450_v23, %v2644_v42  ;;  %v2451_v14 = vmax.f32 %v2391_v13, 0.0 }
 0x291   :  { %v7230_v35 = vmax.f32 %v2453_v49, %v2647_v1  ;;  %v2622_v1 = vadd.f32 %v6799_v7, %v7134_v3 }
 0x292   :  { %v7235_v39 = vmax.f32 %v2451_v14, %v2645_v11  ;;  %v5584_v10 = vpop.f32.mrb[92].mxu0  ;;  %v2614_v11 = vadd.f32 %v6799_v7, %v7136_v27  ;;  %v2617_v14 = vadd.f32 %v6799_v7, %v7140_v53  ;;  %v5956_v27 = vld [vmem:[%s7883_s0 + $0x448] sm:$0xff]  }
 0x293   :  { %v2412_v60 = vadd.f32 %v6799_v7, %v5584_v10  ;;  %v2403_v58 = vpop.f32.mrb[93].mxu0  ;;  %v2654_v30 = vmax.f32 %v2622_v1, 0.0  ;;  %5725 = vmatmul.mubr.msk.bf16.vlgmr.msra.gmra.mrb[152].mxu0 %vm94_vm1, %v5956_v27  ;;  %v2641_v1 = vadd.f32 %v6799_v7, %v7146_v25 }
 0x294   :  { %v2404_v34 = vadd.f32 %v6799_v7, %v2403_v58  ;;  %v5585_v38 = vpop.f32.mrb[94].mxu0  ;;  %5759 = vmatpush3.bf16.msra.mxu0 %v6035_v2 }
 0x295   :  { %v2456_v48 = vmax.f32 %v2412_v60, 0.0  ;;  %v2415_v9 = vadd.f32 %v6799_v7, %v5585_v38  ;;  %v2406_v32 = vpop.f32.mrb[95].mxu0  ;;  %v2652_v60 = vmax.f32 %v2614_v11, 0.0  ;;  %v2653_v38 = vmax.f32 %v2617_v14, 0.0 }
 0x296   :  { %v2454_v22 = vmax.f32 %v2404_v34, 0.0  ;;  %v2407_v42 = vadd.f32 %v6799_v7, %v2406_v32  ;;  %v5958_v32 = vld [vmem:[%s7883_s0 + $0x450] sm:$0xff]   ;;  %v2659_v27 = vmax.f32 %v2641_v1, 0.0  ;;  %v3013_v1 = vadd.f32 %v6799_v7, %v7154_v40 }
 0x297   :  { %v7247_v62 = vmax.f32 %v2456_v48, %v2650_v63  ;;  %v2457_v6 = vmax.f32 %v2415_v9, 0.0  ;;  %5728 = vmatprep.mubr.msk.bf16.mxu0 %vm94_vm1, %v5958_v32  ;;  %v3002_v32 = vadd.f32 %v6799_v7, %v7152_v15 }
 0x298   :  { %v7254_v23 = vmax.f32 %v2454_v22, %v2648_v33  ;;  %v2455_v13 = vmax.f32 %v2407_v42, 0.0 }
 0x299   :  { %v7258_v49 = vmax.f32 %v2457_v6, %v2651_v8  ;;  %v2638_v8 = vadd.f32 %v6799_v7, %v7142_v21 }
 0x29a   :  { %v7263_v24 = vmax.f32 %v2455_v13, %v2649_v43  ;;  %v5588_v3 = vpop.f32.mrb[96].mxu0  ;;  %v2630_v43 = vadd.f32 %v6799_v7, %v7144_v37  ;;  %v2633_v13 = vadd.f32 %v6799_v7, %v7148_v20  ;;  %v5960_v37 = vld [vmem:[%s7883_s0 + $0x458] sm:$0xff]  }
 0x29b   :  { %v2428_v51 = vadd.f32 %v6799_v7, %v5588_v3  ;;  %v2419_v10 = vpop.f32.mrb[97].mxu0  ;;  %v2658_v41 = vmax.f32 %v2638_v8, 0.0  ;;  %5729 = vmatmul.mubr.msk.bf16.gmra.mrb[156].mxu0 %vm94_vm1, %v5960_v37 }
 0x29c   :  { %v2420_v28 = vadd.f32 %v6799_v7, %v2419_v10  ;;  %v5589_v47 = vpop.f32.mrb[98].mxu0 }
 0x29d   :  { %v2460_v63 = vmax.f32 %v2428_v51, 0.0  ;;  %v2431_v58 = vadd.f32 %v6799_v7, %v5589_v47  ;;  %v2422_v34 = vpop.f32.mrb[99].mxu0  ;;  %v2656_v51 = vmax.f32 %v2630_v43, 0.0  ;;  %v2657_v47 = vmax.f32 %v2633_v13, 0.0 }
 0x29e   :  { %v2458_v53 = vmax.f32 %v2420_v28, 0.0  ;;  %v2423_v33 = vadd.f32 %v6799_v7, %v2422_v34 }
 0x29f   :  { %v7276_v48 = vmax.f32 %v2460_v63, %v2654_v30  ;;  %v2461_v9 = vmax.f32 %v2431_v58, 0.0 }
 0x2a0   :  { %v7283_v22 = vmax.f32 %v2458_v53, %v2652_v60  ;;  %v2459_v42 = vmax.f32 %v2423_v33, 0.0 }
 0x2a1   :  { %v7287_v6 = vmax.f32 %v2461_v9, %v2655_v55  ;;  %v5962_v55 = vld [vmem:[%s7883_s0 + $0x460] sm:$0xff]  }
 0x2a2   :  { %v7292_v50 = vmax.f32 %v2459_v42, %v2653_v38  ;;  %v5592_v21 = vpop.f32.mrb[100].mxu0  ;;  %v3010_v38 = vadd.f32 %v6799_v7, %v7150_v54  ;;  %5732 = vmatprep.mubr.msk.bf16.mxu0 %vm94_vm1, %v5962_v55 }
 0x2a3   :  { %v2444_v11 = vadd.f32 %v6799_v7, %v5592_v21  ;;  %v2435_v3 = vpop.f32.mrb[101].mxu0  ;;  %v5964_v21 = vld [vmem:[%s7883_s0 + $0x468] sm:$0xff]  }
 0x2a4   :  { %v2436_v14 = vadd.f32 %v6799_v7, %v2435_v3  ;;  %v5593_v25 = vpop.f32.mrb[102].mxu0  ;;  %v3066_v15 = vmax.f32 %v3010_v38, 0.0  ;;  %5733 = vmatmul.mubr.msk.bf16.gmra.mrb[160].mxu0 %vm94_vm1, %v5964_v21  ;;  %v3018_v38 = vadd.f32 %v6799_v7, %v7160_v56  ;;  %v3021_v56 = vadd.f32 %v6799_v7, %v7164_v17 }
 0x2a5   :  { %v2464_v30 = vmax.f32 %v2444_v11, 0.0  ;;  %v2447_v10 = vadd.f32 %v6799_v7, %v5593_v25  ;;  %v2438_v28 = vpop.f32.mrb[103].mxu0  ;;  %v3005_v11 = vadd.f32 %v6799_v7, %v7156_v4 }
 0x2a6   :  { %v2462_v20 = vmax.f32 %v2436_v14, 0.0  ;;  %v2439_v60 = vadd.f32 %v6799_v7, %v2438_v28 }
 0x2a7   :  { %v7304_v63 = vmax.f32 %v2464_v30, %v2658_v41  ;;  %v2465_v58 = vmax.f32 %v2447_v10, 0.0  ;;  %v3067_v10 = vmax.f32 %v3013_v1, 0.0 }
 0x2a8   :  { %v7309_v34 = vmax.f32 %v2462_v20, %v2656_v51  ;;  %v2463_v53 = vmax.f32 %v2439_v60, 0.0  ;;  %v3064_v51 = vmax.f32 %v3002_v32, 0.0  ;;  %v3065_v20 = vmax.f32 %v3005_v11, 0.0 }
 0x2a9   :  { %v7311_v33 = vmax.f32 %v2465_v58, %v2659_v27  ;;  %v5966_v27 = vld [vmem:[%s7883_s0 + $0x470] sm:$0xff]   ;;  %v3026_v58 = vadd.f32 %v6799_v7, %v7158_v12  ;;  %v3029_v32 = vadd.f32 %v6799_v7, %v7162_v52  ;;  %v5968_v12 = vld [vmem:[%s7883_s0 + $0x478] sm:$0xff]  }
 0x2aa   :  { %v7316_v9 = vmax.f32 %v2463_v53, %v2657_v47  ;;  %v5616_v8 = vpop.f32.mrb[104].mxu0  ;;  %5736 = vmatprep.mubr.msk.bf16.mxu0 %vm94_vm1, %v5966_v27 }
 0x2ab   :  { %v2800_v42 = vadd.f32 %v6799_v7, %v5616_v8  ;;  %v2791_v43 = vpop.f32.mrb[105].mxu0 }
 0x2ac   :  { %v2792_v54 = vadd.f32 %v6799_v7, %v2791_v43  ;;  %v5617_v13 = vpop.f32.mrb[106].mxu0  ;;  %5737 = vmatmul.mubr.msk.bf16.gmra.mrb[164].mxu0 %vm94_vm1, %v5968_v12 }
 0x2ad   :  { %v2856_v41 = vmax.f32 %v2800_v42, 0.0  ;;  %v2803_v3 = vadd.f32 %v6799_v7, %v5617_v13  ;;  %v2794_v37 = vpop.f32.mrb[107].mxu0 }
 0x2ae   :  { %v2854_v14 = vmax.f32 %v2792_v54, 0.0  ;;  %v2795_v40 = vadd.f32 %v6799_v7, %v2794_v37  ;;  %v3070_v54 = vmax.f32 %v3026_v58, 0.0  ;;  %v3071_v37 = vmax.f32 %v3029_v32, 0.0 }
 0x2af   :  { %v2872_v25 = vmax.f32 %v7219_v18, %v2856_v41  ;;  %v2857_v30 = vmax.f32 %v2803_v3, 0.0  ;;  %v3068_v41 = vmax.f32 %v3018_v38, 0.0 }
 0x2b0   :  { %v2870_v4 = vmax.f32 %v7226_v5, %v2854_v14  ;;  %v2855_v28 = vmax.f32 %v2795_v40, 0.0  ;;  %v5970_v14 = vld [vmem:[%s7883_s0 + $0x4c0] sm:$0xff]  }
 0x2b1   :  { %v2873_v60 = vmax.f32 %v7230_v35, %v2857_v30  ;;  %v7338_v47 = vmax.f32 %v2872_v25, %v3066_v15  ;;  %5760 = vmatprep.mubr.msk.bf16.mxu0 %vm94_vm1, %v5970_v14 }
 0x2b2   :  { %v2871_v18 = vmax.f32 %v7235_v39, %v2855_v28  ;;  %v7344_v55 = vmax.f32 %v2870_v4, %v3064_v51  ;;  %v5620_v53 = vpop.f32.mrb[108].mxu0  ;;  %v3069_v51 = vmax.f32 %v3021_v56, 0.0  ;;  %v3034_v28 = vadd.f32 %v6799_v7, %v7174_v29 }
 0x2b3   :  { %v7348_v5 = vmax.f32 %v2873_v60, %v3067_v10  ;;  %v2816_v8 = vadd.f32 %v6799_v7, %v5620_v53  ;;  %v2807_v35 = vpop.f32.mrb[109].mxu0  ;;  %v3042_v10 = vadd.f32 %v6799_v7, %v7169_v45  ;;  %v3045_v60 = vadd.f32 %v6799_v7, %v7177_v36  ;;  %v5972_v45 = vld [vmem:[%s7883_s0 + $0x4c8] sm:$0xff]  }
 0x2b4   :  { %v7356_v42 = vmax.f32 %v2871_v18, %v3065_v20  ;;  %v2808_v39 = vadd.f32 %v6799_v7, %v2807_v35  ;;  %v5621_v43 = vpop.f32.mrb[110].mxu0  ;;  %v3037_v29 = vadd.f32 %v6799_v7, %v7180_v61  ;;  %5761 = vmatmul.mubr.msk.bf16.vlgmr.msra.gmra.mrb[168].mxu0 %vm94_vm1, %v5972_v45  ;;  %v3072_v12 = vmax.f32 %v3034_v28, 0.0  ;;  %v5976_v28 = vld [vmem:[%s7883_s0 + $0x4d8] sm:$0xff]  }
 0x2b5   :  { %v2860_v1 = vmax.f32 %v2816_v8, 0.0  ;;  %v2819_v21 = vadd.f32 %v6799_v7, %v5621_v43  ;;  %v2810_v13 = vpop.f32.mrb[111].mxu0  ;;  %v3074_v8 = vmax.f32 %v3042_v10, 0.0  ;;  %v3075_v56 = vmax.f32 %v3045_v60, 0.0  ;;  %v5975_v10 = vld [vmem:[%s7883_s0 + $0x4d0] sm:$0xff]  }
 0x2b6   :  { %v2858_v52 = vmax.f32 %v2808_v39, 0.0  ;;  %v2811_v11 = vadd.f32 %v6799_v7, %v2810_v13  ;;  %5764 = vmatprep.mubr.msk.bf16.mxu0 %vm94_vm1, %v5975_v10  ;;  %v5984_v10 = vld [vmem:[%s7883_s0 + $0x4f8] sm:$0xff]  }
 0x2b7   :  { %v2876_v3 = vmax.f32 %v7247_v62, %v2860_v1  ;;  %v2861_v15 = vmax.f32 %v2819_v21, 0.0 }
 0x2b8   :  { %v2874_v17 = vmax.f32 %v7254_v23, %v2858_v52  ;;  %v2859_v40 = vmax.f32 %v2811_v11, 0.0  ;;  %v7404_v52 = vld [vmem:[%s7884_s2] ss:$0 sm:$0xff] }
 0x2b9   :  { %v2877_v25 = vmax.f32 %v7258_v49, %v2861_v15  ;;  %v7370_v30 = vmax.f32 %v2876_v3, %v3070_v54  ;;  %v3073_v54 = vmax.f32 %v3037_v29, 0.0 }
 0x2ba   :  { %v2875_v62 = vmax.f32 %v7263_v24, %v2859_v40  ;;  %v7376_v27 = vmax.f32 %v2874_v17, %v3068_v41  ;;  %v5624_v4 = vpop.f32.mrb[112].mxu0 }
 0x2bb   :  { %v7380_v23 = vmax.f32 %v2877_v25, %v3071_v37  ;;  %v2832_v20 = vadd.f32 %v6799_v7, %v5624_v4  ;;  %v2823_v49 = vpop.f32.mrb[113].mxu0  ;;  %v3061_v37 = vadd.f32 %v7404_v52, %v7196_v0 }
 0x2bc   :  { %v7388_v58 = vmax.f32 %v2875_v62, %v3069_v51  ;;  %v2824_v24 = vadd.f32 %v6799_v7, %v2823_v49  ;;  %v5625_v18 = vpop.f32.mrb[114].mxu0  ;;  %5765 = vmatmul.mubr.msk.bf16.gmra.mrb[172].mxu0 %vm94_vm1, %v5976_v28 }
 0x2bd   :  { %v2864_v53 = vmax.f32 %v2832_v20, 0.0  ;;  %v2835_v38 = vadd.f32 %v6799_v7, %v5625_v18  ;;  %v2826_v35 = vpop.f32.mrb[115].mxu0  ;;  %v3079_v49 = vmax.f32 %v3061_v37, 0.0 }
 0x2be   :  { %v2862_v36 = vmax.f32 %v2824_v24, 0.0  ;;  %v2827_v32 = vadd.f32 %v6799_v7, %v2826_v35  ;;  %v3058_v7 = vadd.f32 %v7404_v52, %v7188_v31 }
 0x2bf   :  { %v2880_v39 = vmax.f32 %v7276_v48, %v2864_v53  ;;  %v2865_v43 = vmax.f32 %v2835_v38, 0.0 }
 0x2c0   :  { %v2878_v1 = vmax.f32 %v7283_v22, %v2862_v36  ;;  %v2863_v21 = vmax.f32 %v2827_v32, 0.0  ;;  %v3050_v22 = vadd.f32 %v7404_v52, %v7193_v16  ;;  %v3078_v16 = vmax.f32 %v3058_v7, 0.0 }
 0x2c1   :  { %v2881_v61 = vmax.f32 %v7287_v6, %v2865_v43  ;;  %v7399_v13 = vmax.f32 %v2880_v39, %v3074_v8 }
 0x2c2   :  { %v2879_v48 = vmax.f32 %v7292_v50, %v2863_v21  ;;  %v7409_v11 = vmax.f32 %v2878_v1, %v3072_v12  ;;  %v5628_v41 = vpop.f32.mrb[116].mxu0  ;;  %v3053_v50 = vadd.f32 %v7404_v52, %v7201_v44  ;;  %v3076_v4 = vmax.f32 %v3050_v22, 0.0  ;;  %v5980_v21 = vld [vmem:[%s7883_s0 + $0x4e8] sm:$0xff]  }
 0x2c3   :  { %v7413_v3 = vmax.f32 %v2881_v61, %v3075_v56  ;;  %v2848_v6 = vadd.f32 %v7404_v52, %v5628_v41  ;;  %v2839_v15 = vpop.f32.mrb[117].mxu0 }
 0x2c4   :  { %v7418_v14 = vmax.f32 %v2879_v48, %v3073_v54  ;;  %v2840_v31 = vadd.f32 %v7404_v52, %v2839_v15  ;;  %v5629_v17 = vpop.f32.mrb[118].mxu0  ;;  %v3077_v24 = vmax.f32 %v3053_v50, 0.0 }
 0x2c5   :  { %v2868_v40 = vmax.f32 %v2848_v6, 0.0  ;;  %v2851_v51 = vadd.f32 %v7404_v52, %v5629_v17  ;;  %v2842_v25 = vpop.f32.mrb[119].mxu0 }
 0x2c6   :  { %v2866_v62 = vmax.f32 %v2840_v31, 0.0  ;;  %v2843_v0 = vadd.f32 %v7404_v52, %v2842_v25 }
 0x2c7   :  { %v2884_v20 = vmax.f32 %v7304_v63, %v2868_v40  ;;  %v2869_v44 = vmax.f32 %v2851_v51, 0.0 }
 0x2c8   :  { %v2882_v60 = vmax.f32 %v7309_v34, %v2866_v62  ;;  %v2867_v45 = vmax.f32 %v2843_v0, 0.0 }
 0x2c9   :  { %v2885_v18 = vmax.f32 %v7311_v33, %v2869_v44  ;;  %v7436_v29 = vmax.f32 %v2884_v20, %v3078_v16  ;;  %v5983_v16 = vld [vmem:[%s7883_s0 + $0x4f0] sm:$0xff]  }
 0x2ca   :  { %v2883_v53 = vmax.f32 %v7316_v9, %v2867_v45  ;;  %v7439_v38 = vmax.f32 %v2882_v60, %v3076_v4  ;;  %v5652_v8 = vpop.f32.mrb[120].mxu0  ;;  %v5979_v9 = vld [vmem:[%s7883_s0 + $0x4e0] sm:$0xff]  }
 0x2cb   :  { %v7441_v63 = vmax.f32 %v2885_v18, %v3079_v49  ;;  %v3220_v35 = vadd.f32 %v7404_v52, %v5652_v8  ;;  %v3211_v36 = vpop.f32.mrb[121].mxu0  ;;  %5768 = vmatprep.mubr.msk.bf16.mxu0 %vm94_vm1, %v5979_v9 }
 0x2cc   :  { %v7444_v32 = vmax.f32 %v2883_v53, %v3077_v24  ;;  %v3212_v34 = vadd.f32 %v7404_v52, %v3211_v36  ;;  %v5653_v12 = vpop.f32.mrb[122].mxu0  ;;  %5769 = vmatmul.mubr.msk.bf16.gmra.mrb[176].mxu0 %vm94_vm1, %v5980_v21 }
 0x2cd   :  { %v3276_v39 = vmax.f32 %v3220_v35, 0.0  ;;  %v3223_v33 = vadd.f32 %v7404_v52, %v5653_v12  ;;  %v3214_v43 = vpop.f32.mrb[123].mxu0  ;;  %5772 = vmatprep.mubr.msk.bf16.mxu0 %vm94_vm1, %v5983_v16  ;;  %v3314_v16 = vrot.slane %v7004_v46, 1 }
 0x2ce   :  { %v3274_v56 = vmax.f32 %v3212_v34, 0.0  ;;  %v3215_v1 = vadd.f32 %v7404_v52, %v3214_v43 }
 0x2cf   :  { %v3292_v54 = vmax.f32 %v7338_v47, %v3276_v39  ;;  %v3277_v61 = vmax.f32 %v3223_v33, 0.0 }
 0x2d0   :  { %v3290_v7 = vmax.f32 %v7344_v55, %v3274_v56  ;;  %v3275_v48 = vmax.f32 %v3215_v1, 0.0 }
 0x2d1   :  { %v3293_v41 = vmax.f32 %v7348_v5, %v3277_v61 }
 0x2d2   :  { %v3291_v22 = vmax.f32 %v7356_v42, %v3275_v48  ;;  %v5656_v6 = vpop.f32.mrb[124].mxu0 }
 0x2d3   :  { %v3307_v15 = vpack.c.bf16 %v3293_v41, %v3292_v54  ;;  %v3236_v37 = vadd.f32 %v7404_v52, %v5656_v6  ;;  %v3227_v31 = vpop.f32.mrb[125].mxu0 }
 0x2d4   :  { %v3306_v17 = vpack.c.bf16 %v3291_v22, %v3290_v7  ;;  %v3228_v47 = vadd.f32 %v7404_v52, %v3227_v31  ;;  %v5657_v50 = vpop.f32.mrb[126].mxu0  ;;  %5773 = vmatmul.mubr.msk.bf16.gmra.mrb[180].mxu0 %vm94_vm1, %v5984_v10  ;;  %v5959_v10 = vld [vmem:[%s7883_s0 + $0x418] sm:$0xff]  }
 0x2d5   :  { %v3280_v40 = vmax.f32 %v3236_v37, 0.0  ;;  %v3239_v51 = vadd.f32 %v7404_v52, %v5657_v50  ;;  %v3230_v55 = vpop.f32.mrb[127].mxu0 }
 0x2d6   :  { %v3278_v5 = vmax.f32 %v3228_v47, 0.0  ;;  %v3231_v42 = vadd.f32 %v7404_v52, %v3230_v55  ;;  %v3319_v25 = vsel %vm2137_vm3, %v3306_v17, 0  ;;  %v5988_v55 = vld [vmem:[%s7882_s1] sm:$0x3f]  }
 0x2d7   :  { %v3296_v62 = vmax.f32 %v7370_v30, %v3280_v40  ;;  %v3281_v0 = vmax.f32 %v3239_v51, 0.0  ;;  %5667 = vmatpush3.bf16.xpose.msra.mxu1 %v3319_v25  ;;  %v5957_v25 = vld [vmem:[%s7883_s0 + $0x410] sm:$0xff]  }
 0x2d8   :  { %v3294_v4 = vmax.f32 %v7376_v27, %v3278_v5  ;;  %v3279_v28 = vmax.f32 %v3231_v42, 0.0  ;;  %5668 = vmatprep.subr.bf16.mxu1 %v7889_v19  ;;  %v5953_v5 = vld [vmem:[%s7883_s0 + $0x400] sm:$0xff]   ;;  %v5955_v42 = vld [vmem:[%s7883_s0 + $0x408] sm:$0xff]  }
 0x2d9   :  { %v3297_v20 = vmax.f32 %v7380_v23, %v3281_v0  ;;  %v3322_v23 = vsel %vm2137_vm3, %v3307_v15, 0  ;;  %v5965_v0 = vld [vmem:[%s7883_s0 + $0x430] sm:$0xff]  }
 0x2da   :  { %v3295_v44 = vmax.f32 %v7388_v58, %v3279_v28  ;;  %v5660_v49 = vpop.f32.mrb[128].mxu0  ;;  %v5969_v28 = vld [vmem:[%s7883_s0 + $0x480] sm:$0xff]  }
 0x2db   :  { %v3309_v60 = vpack.c.bf16 %v3297_v20, %v3296_v62  ;;  %v3252_v45 = vadd.f32 %v7404_v52, %v5660_v49  ;;  %v3243_v30 = vpop.f32.mrb[129].mxu0  ;;  %v5961_v62 = vld [vmem:[%s7883_s0 + $0x420] sm:$0xff]   ;;  %v5971_v20 = vld [vmem:[%s7883_s0 + $0x488] sm:$0xff]   ;;  %v5974_v49 = vld [vmem:[%s7883_s0 + $0x498] sm:$0xff]  }
 0x2dc   :  { %v3308_v24 = vpack.c.bf16 %v3295_v44, %v3294_v4  ;;  %v3244_v18 = vadd.f32 %v7404_v52, %v3243_v30  ;;  %v5661_v53 = vpop.f32.mrb[130].mxu0  ;;  %v5967_v4 = vld [vmem:[%s7883_s0 + $0x438] sm:$0xff]   ;;  %v5973_v44 = vld [vmem:[%s7883_s0 + $0x490] sm:$0xff]  }
 0x2dd   :  { %v3284_v8 = vmax.f32 %v3252_v45, 0.0  ;;  %v3255_v27 = vadd.f32 %v7404_v52, %v5661_v53  ;;  %v3246_v35 = vpop.f32.mrb[131].mxu0  ;;  %v3328_v51 = vsel %vm2137_vm3, %v3309_v60, 0  ;;  %v5977_v60 = vld [vmem:[%s7883_s0 + $0x4a0] sm:$0xff]   ;;  %v5978_v45 = vld [vmem:[%s7883_s0 + $0x4a8] sm:$0xff]   ;;  %v5981_v30 = vld [vmem:[%s7883_s0 + $0x4b0] sm:$0xff]  }
 0x2de   :  { %v3282_v36 = vmax.f32 %v3244_v18, 0.0  ;;  %v3247_v34 = vadd.f32 %v7404_v52, %v3246_v35 }
 0x2df   :  { %v3300_v58 = vmax.f32 %v7399_v13, %v3284_v8  ;;  %v3285_v12 = vmax.f32 %v3255_v27, 0.0  ;;  %5669 = vmatpush3.bf16.xpose.msra.mxu1 %v3322_v23  ;;  %v5982_v27 = vld [vmem:[%s7883_s0 + $0x4b8] sm:$0xff]  }
 0x2e0   :  { %v3298_v39 = vmax.f32 %v7409_v11, %v3282_v36  ;;  %v3283_v33 = vmax.f32 %v3247_v34, 0.0  ;;  %5670 = vmatprep.subr.bf16.mxu1 %v7889_v19 }
 0x2e1   :  { %v3301_v43 = vmax.f32 %v7413_v3, %v3285_v12  ;;  %v3325_v3 = vsel %vm2137_vm3, %v3308_v24, 0 }
 0x2e2   :  { %v3299_v9 = vmax.f32 %v7418_v14, %v3283_v33  ;;  %v5664_v56 = vpop.f32.mrb[132].mxu0 }
 0x2e3   :  { %v3311_v1 = vpack.c.bf16 %v3301_v43, %v3300_v58  ;;  %v3268_v21 = vadd.f32 %v7404_v52, %v5664_v56  ;;  %v3259_v54 = vpop.f32.mrb[133].mxu0 }
 0x2e4   :  { %v3310_v61 = vpack.c.bf16 %v3299_v9, %v3298_v39  ;;  %v3260_v7 = vadd.f32 %v7404_v52, %v3259_v54  ;;  %v5665_v13 = vpop.f32.mrb[134].mxu0 }
 0x2e5   :  { %v3288_v48 = vmax.f32 %v3268_v21, 0.0  ;;  %v3271_v41 = vadd.f32 %v7404_v52, %v5665_v13  ;;  %v3262_v11 = vpop.f32.mrb[135].mxu0 }
 0x2e6   :  { %v3286_v22 = vmax.f32 %v3260_v7, 0.0  ;;  %v3263_v6 = vadd.f32 %v7404_v52, %v3262_v11 }
 0x2e7   :  { %v3304_v14 = vmax.f32 %v7436_v29, %v3288_v48  ;;  %v3289_v15 = vmax.f32 %v3271_v41, 0.0  ;;  %5671 = vmatpush3.bf16.xpose.msra.mxu1 %v3325_v3  ;;  %v3331_v29 = vsel %vm2137_vm3, %v3310_v61, 0 }
 0x2e8   :  { %v3302_v37 = vmax.f32 %v7439_v38, %v3286_v22  ;;  %v3287_v31 = vmax.f32 %v3263_v6, 0.0  ;;  %5672 = vmatprep.subr.bf16.mxu1 %v7889_v19  ;;  %v3334_v38 = vsel %vm2137_vm3, %v3311_v1, 0 }
 0x2e9   :  { %v3305_v17 = vmax.f32 %v7441_v63, %v3289_v15 }
 0x2ea   :  { %v3303_v47 = vmax.f32 %v7444_v32, %v3287_v31  ;;  %v7576_v24 = vpop.f32.mrb[136].mxu0 }
 0x2eb   :  { %v3313_v50 = vpack.c.bf16 %v3305_v17, %v3304_v14  ;;  %v7579_v18 = vpop.f32.mrb[137].mxu0 }
 0x2ec   :  { %v3312_v40 = vpack.c.bf16 %v3303_v47, %v3302_v37  ;;  %v7582_v53 = vpop.f32.mrb[138].mxu0 }
 0x2ed   :  { %v3340_v32 = vsel %vm2137_vm3, %v3313_v50, 0  ;;  %v7584_v8 = vpop.f32.mrb[139].mxu0 }
 0x2ee   :  { %v3337_v63 = vsel %vm2137_vm3, %v3312_v40, 0 }
 0x2ef   :  { %5673 = vmatpush3.bf16.xpose.msra.mxu1 %v3328_v51 }
 0x2f0   :  { %5674 = vmatprep.subr.bf16.mxu1 %v7889_v19 }
 0x2f2   :  { %v7589_v35 = vpop.f32.mrb[140].mxu0 }
 0x2f3   :  { %v7592_v36 = vpop.f32.mrb[141].mxu0 }
 0x2f4   :  { %v7594_v34 = vpop.f32.mrb[142].mxu0 }
 0x2f5   :  { %v7598_v23 = vpop.f32.mrb[143].mxu0 }
 0x2f7   :  { %5675 = vmatpush3.bf16.xpose.msra.mxu1 %v3331_v29 }
 0x2f8   :  { %5676 = vmatprep.subr.bf16.mxu1 %v7889_v19 }
 0x2fa   :  { %v7600_v58 = vpop.f32.mrb[144].mxu0 }
 0x2fb   :  { %v7602_v12 = vpop.f32.mrb[145].mxu0 }
 0x2fc   :  { %v7604_v39 = vpop.f32.mrb[146].mxu0 }
 0x2fd   :  { %v7606_v33 = vpop.f32.mrb[147].mxu0 }
 0x2ff   :  { %5677 = vmatpush3.bf16.xpose.msra.mxu1 %v3334_v38 }
 0x300   :  { %5678 = vmatprep.subr.bf16.mxu1 %v7889_v19 }
 0x307   :  { %5679 = vmatpush3.bf16.xpose.msra.mxu1 %v3337_v63 }
 0x308   :  { %5680 = vmatprep.subr.bf16.mxu1 %v7889_v19 }
 0x30f   :  { %5681 = vmatpush3.bf16.xpose.msra.mxu1 %v3340_v32 }
 0x310   :  { %5815 = vmatprep.subr.msk.bf16.mxu1 %vm119_vm0, %v5988_v55 }
 0x316   :  { %5683 = vmatmul.mubr.msk.bf16.vlgmr.msra.gmra.mrb[112].mxu1 %vm2137_vm3, %v3314_v16 }
 0x317   :  { %5705 = vmatpush3.bf16.msra.mxu1 %v6035_v2  ;;  %5706 = vmatprep.mubr.msk.bf16.mxu1 %vm94_vm1, %v5953_v5 }
 0x318   :  { %5817 = vmatprep.subr.msk.bf16.mxu1 %vm119_vm0, %v5988_v55 }
 0x31e   :  { %5707 = vmatmul.mubr.msk.bf16.vlgmr.msra.gmra.mrb[116].mxu1 %vm94_vm1, %v5955_v42 }
 0x31f   :  { %5741 = vmatpush3.bf16.msra.mxu1 %v6035_v2  ;;  %5710 = vmatprep.mubr.msk.bf16.mxu1 %vm94_vm1, %v5957_v25  ;;  %v5963_v2 = vld [vmem:[%s7883_s0 + $0x428] sm:$0xff]  }
 0x320   :  { %5776 = vmatprep.subr.bf16.mxu1 %v7889_v19 }
 0x326   :  { %5711 = vmatmul.mubr.msk.bf16.gmra.mrb[120].mxu1 %vm94_vm1, %v5959_v10 }
 0x327   :  { %5714 = vmatprep.mubr.msk.bf16.mxu1 %vm94_vm1, %v5961_v62 }
 0x32e   :  { %5715 = vmatmul.mubr.msk.bf16.gmra.mrb[124].mxu1 %vm94_vm1, %v5963_v2 }
 0x32f   :  { %5718 = vmatprep.mubr.msk.bf16.mxu1 %vm94_vm1, %v5965_v0  ;;  %v5992_v0 = vmov 0  }
 0x330   :  { %5823 = vset.pattern.permute.xlu0 %v5992_v0 }
 0x336   :  { %5719 = vmatmul.mubr.msk.bf16.gmra.mrb[128].mxu1 %vm94_vm1, %v5967_v4  ;;  %v10_v4 = vstv %s7886_s4 }
 0x337   :  { %5742 = vmatprep.mubr.msk.bf16.mxu1 %vm94_vm1, %v5969_v28  ;;  %11 = vst [vmem:[#allocation2] sm:$0x1] %v10_v4 }
 0x33e   :  { %5743 = vmatmul.mubr.msk.bf16.vlgmr.msra.gmra.mrb[132].mxu1 %vm94_vm1, %v5971_v20  ;;  %v4494_v28 = vld [vmem:[#allocation2] sm:$0x1] }
 0x33f   :  { %5746 = vmatprep.mubr.msk.bf16.mxu1 %vm94_vm1, %v5973_v44  ;;  %4497 = vperm.xlu0 %5823, %v4494_v28   ;;  %v3510_v28 = vadd.f32 %v7404_v52, %v7582_v53 }
 0x346   :  { %5747 = vmatmul.mubr.msk.bf16.gmra.mrb[136].mxu1 %vm94_vm1, %v5974_v49 }
 0x347   :  { %5750 = vmatprep.mubr.msk.bf16.mxu1 %vm94_vm1, %v5977_v60 }
 0x34e   :  { %5751 = vmatmul.mubr.msk.bf16.gmra.mrb[140].mxu1 %vm94_vm1, %v5978_v45 }
 0x34f   :  { %5754 = vmatprep.mubr.msk.bf16.mxu1 %vm94_vm1, %v5981_v30  ;;  %v3507_v30 = vadd.f32 %v7404_v52, %v7576_v24 }
 0x356   :  { %5755 = vmatmul.mubr.msk.bf16.gmra.mrb[144].mxu1 %vm94_vm1, %v5982_v27  ;;  %v3499_v27 = vadd.f32 %v7404_v52, %v7579_v18 }
 0x357   :  { %5792 = vmatprep.mubr.msk.bf16.mxu1 %vm5990_vm2, %v7889_v19 }
 0x358   :  { %v7608_v43 = vpop.f32.mrb[148].mxu0 }
 0x359   :  { %v7610_v9 = vpop.f32.mrb[149].mxu0 }
 0x35a   :  { %v7612_v56 = vpop.f32.mrb[150].mxu0 }
 0x35b   :  { %v7614_v1 = vpop.f32.mrb[151].mxu0 }
 0x366   :  { %v5726_v21 = vpop.f32.mrb[152].mxu0 }
 0x367   :  { %v3902_v54 = vpop.f32.mrb[153].mxu0  ;;  %v3911_v0 = vadd.f32 %v7404_v52, %v5726_v21 }
 0x368   :  { %v5727_v61 = vpop.f32.mrb[154].mxu0  ;;  %v3903_v4 = vadd.f32 %v7404_v52, %v3902_v54 }
 0x369   :  { %v3905_v7 = vpop.f32.mrb[155].mxu0  ;;  %v3914_v54 = vadd.f32 %v7404_v52, %v5727_v61 }
 0x36a   :  { %v3965_v53 = vmax.f32 %v3903_v4, 0.0 }
 0x36b   :  { %v3968_v4 = vmax.f32 %v3914_v54, 0.0 }
 0x36e   :  { %v7616_v13 = vpop.f32.mrb[156].mxu0 }
 0x36f   :  { %v7618_v48 = vpop.f32.mrb[157].mxu0 }
 0x370   :  { %v7620_v41 = vpop.f32.mrb[158].mxu0 }
 0x371   :  { %v7622_v11 = vpop.f32.mrb[159].mxu0 }
 0x377   :  { %v7624_v22 = vpop.f32.mrb[160].mxu0 }
 0x378   :  { %v7626_v6 = vpop.f32.mrb[161].mxu0 }
 0x379   :  { %v7628_v3 = vpop.f32.mrb[162].mxu0 }
 0x37a   :  { %v7630_v14 = vpop.f32.mrb[163].mxu0 }
 0x37f   :  { %v7632_v15 = vpop.f32.mrb[164].mxu0 }
 0x380   :  { %v7634_v37 = vpop.f32.mrb[165].mxu0 }
 0x381   :  { %v7636_v31 = vpop.f32.mrb[166].mxu0 }
 0x382   :  { %v7638_v17 = vpop.f32.mrb[167].mxu0 }
 0x387   :  { %v7640_v47 = vpop.f32.mrb[168].mxu0 }
 0x388   :  { %v7642_v50 = vpop.f32.mrb[169].mxu0 }
 0x389   :  { %v7644_v40 = vpop.f32.mrb[170].mxu0 }
 0x38a   :  { %v7646_v51 = vpop.f32.mrb[171].mxu0 }
 0x38f   :  { %v7648_v29 = vpop.f32.mrb[172].mxu0 }
 0x390   :  { %v7650_v38 = vpop.f32.mrb[173].mxu0 }
 0x391   :  { %v7652_v63 = vpop.f32.mrb[174].mxu0 }
 0x392   :  { %v7654_v32 = vpop.f32.mrb[175].mxu0 }
 0x39f   :  { %v7656_v55 = vpop.f32.mrb[176].mxu0 }
 0x3a0   :  { %v7658_v16 = vpop.f32.mrb[177].mxu0 }
 0x3a1   :  { %v7660_v5 = vpop.f32.mrb[178].mxu0 }
 0x3a2   :  { %v7662_v42 = vpop.f32.mrb[179].mxu0 }
 0x3a7   :  { %v7664_v25 = vpop.f32.mrb[180].mxu0 }
 0x3a8   :  { %v7666_v10 = vpop.f32.mrb[181].mxu0 }
 0x3a9   :  { %7895 = vst [vmem:[#allocation5_spill] sm:$0xff] %v7666_v10  ;;  %v7668_v62 = vpop.f32.mrb[182].mxu0 }
 0x3aa   :  { %7896 = vst [vmem:[#allocation6_spill] sm:$0xff] %v7668_v62  ;;  %v7670_v2 = vpop.f32.mrb[183].mxu0 }
 0x3ab   :  { %7897 = vst [vmem:[#allocation7_spill] sm:$0xff] %v7670_v2 }
 0x3e9   :  { %v3376_v20 = vpop.f32.mrb[112].mxu1 }
 0x3ea   :  { %v7676_v44 = vadd.f32 %v3376_v20, %v7199_v57  ;;  %v5684_v49 = vpop.f32.mrb[113].mxu1 }
 0x3eb   :  { %v3379_v60 = vpop.f32.mrb[114].mxu1  ;;  %v3563_v49 = vmax.f32 %v3507_v30, 0.0  ;;  %v3906_v30 = vadd.f32 %v7404_v52, %v3905_v7 }
 0x3ec   :  { %7898 = vst [vmem:[#allocation8_spill] sm:$0xff] %v7676_v44  ;;  %v5685_v45 = vpop.f32.mrb[115].mxu1  ;;  %v3561_v60 = vmax.f32 %v3499_v27, 0.0  ;;  %v3967_v44 = vmax.f32 %v3911_v0, 0.0  ;;  %v3564_v27 = vmax.f32 %v3510_v28, 0.0  ;;  %v3515_v0 = vadd.f32 %v7404_v52, %v7592_v36 }
 0x3ed   :  { %v3502_v45 = vadd.f32 %v7404_v52, %v7584_v8  ;;  %v3523_v8 = vadd.f32 %v7404_v52, %v7589_v35  ;;  %v3966_v10 = vmax.f32 %v3906_v30, 0.0 }
 0x3ef   :  { %v3562_v62 = vmax.f32 %v3502_v45, 0.0  ;;  %v3567_v45 = vmax.f32 %v3523_v8, 0.0 }
 0x3f1   :  { %v5708_v26 = vpop.f32.mrb[116].mxu1 }
 0x3f2   :  { %v3701_v57 = vadd.f32 %v7404_v52, %v5708_v26  ;;  %v3692_v20 = vpop.f32.mrb[117].mxu1 }
 0x3f3   :  { %v3693_v24 = vadd.f32 %v7404_v52, %v3692_v20  ;;  %v5709_v19 = vpop.f32.mrb[118].mxu1 }
 0x3f4   :  { %v3757_v18 = vmax.f32 %v3701_v57, 0.0  ;;  %v3704_v21 = vadd.f32 %v7404_v52, %v5709_v19  ;;  %v3695_v59 = vpop.f32.mrb[119].mxu1 }
 0x3f5   :  { %v3755_v46 = vmax.f32 %v3693_v24, 0.0  ;;  %v3696_v26 = vadd.f32 %v7404_v52, %v3695_v59  ;;  %v3927_v59 = vadd.f32 %v7404_v52, %v7616_v13  ;;  %v3518_v13 = vadd.f32 %v7404_v52, %v7598_v23 }
 0x3f6   :  { %v3773_v2 = vmax.f32 %v3563_v49, %v3757_v18  ;;  %v3758_v20 = vmax.f32 %v3704_v21, 0.0  ;;  %v3919_v49 = vadd.f32 %v7404_v52, %v7618_v48  ;;  %v3922_v23 = vadd.f32 %v7404_v52, %v7622_v11 }
 0x3f7   :  { %v3771_v19 = vmax.f32 %v3561_v60, %v3755_v46  ;;  %v3756_v57 = vmax.f32 %v3696_v26, 0.0  ;;  %v3526_v46 = vadd.f32 %v7404_v52, %v7594_v34  ;;  %v3565_v60 = vmax.f32 %v3515_v0, 0.0 }
 0x3f8   :  { %v7698_v61 = vmax.f32 %v3773_v2, %v3967_v44  ;;  %v3774_v24 = vmax.f32 %v3564_v27, %v3758_v20  ;;  %v3971_v48 = vmax.f32 %v3927_v59, 0.0  ;;  %v3930_v34 = vadd.f32 %v7404_v52, %v7620_v41 }
 0x3f9   :  { %v7702_v7 = vmax.f32 %v3771_v19, %v3965_v53  ;;  %v3772_v28 = vmax.f32 %v3562_v62, %v3756_v57  ;;  %v5712_v35 = vpop.f32.mrb[120].mxu1  ;;  %v3969_v27 = vmax.f32 %v3919_v49, 0.0  ;;  %v3539_v20 = vadd.f32 %v7404_v52, %v7600_v58 }
 0x3fa   :  { %v7708_v36 = vmax.f32 %v3774_v24, %v3968_v4  ;;  %v3717_v2 = vadd.f32 %v7404_v52, %v5712_v35  ;;  %v3708_v44 = vpop.f32.mrb[121].mxu1  ;;  %v3566_v57 = vmax.f32 %v3518_v13, 0.0  ;;  %v3531_v24 = vadd.f32 %v7404_v52, %v7602_v12 }
 0x3fb   :  { %v7713_v18 = vmax.f32 %v3772_v28, %v3966_v10  ;;  %v3709_v62 = vadd.f32 %v7404_v52, %v3708_v44  ;;  %v5713_v21 = vpop.f32.mrb[122].mxu1  ;;  %v3568_v10 = vmax.f32 %v3526_v46, 0.0  ;;  %v3972_v35 = vmax.f32 %v3930_v34, 0.0 }
 0x3fc   :  { %v3761_v54 = vmax.f32 %v3717_v2, 0.0  ;;  %v3720_v53 = vadd.f32 %v7404_v52, %v5713_v21  ;;  %v3711_v26 = vpop.f32.mrb[123].mxu1  ;;  %v3943_v49 = vadd.f32 %v7404_v52, %v7624_v22  ;;  %v3970_v2 = vmax.f32 %v3922_v23, 0.0 }
 0x3fd   :  { %v3759_v30 = vmax.f32 %v3709_v62, 0.0  ;;  %v3712_v8 = vadd.f32 %v7404_v52, %v3711_v26  ;;  %v3571_v44 = vmax.f32 %v3539_v20, 0.0  ;;  %v3542_v12 = vadd.f32 %v7404_v52, %v7604_v39 }
 0x3fe   :  { %v3777_v0 = vmax.f32 %v3567_v45, %v3761_v54  ;;  %v3762_v19 = vmax.f32 %v3720_v53, 0.0  ;;  %v3935_v45 = vadd.f32 %v7404_v52, %v7626_v6  ;;  %v3569_v21 = vmax.f32 %v3531_v24, 0.0 }
 0x3ff   :  { %v3775_v4 = vmax.f32 %v3565_v60, %v3759_v30  ;;  %v3760_v41 = vmax.f32 %v3712_v8, 0.0  ;;  %v3534_v22 = vadd.f32 %v7404_v52, %v7606_v33  ;;  %v3975_v6 = vmax.f32 %v3943_v49, 0.0 }
 0x400   :  { %v7726_v59 = vmax.f32 %v3777_v0, %v3971_v48  ;;  %v3778_v28 = vmax.f32 %v3568_v10, %v3762_v19  ;;  %v3946_v39 = vadd.f32 %v7404_v52, %v7628_v3  ;;  %v3973_v8 = vmax.f32 %v3935_v45, 0.0 }
 0x401   :  { %v7730_v11 = vmax.f32 %v3775_v4, %v3969_v27  ;;  %v3776_v46 = vmax.f32 %v3566_v57, %v3760_v41  ;;  %v5716_v58 = vpop.f32.mrb[124].mxu1  ;;  %v3938_v33 = vadd.f32 %v7404_v52, %v7630_v14  ;;  %v3572_v10 = vmax.f32 %v3542_v12, 0.0 }
 0x402   :  { %v7736_v60 = vmax.f32 %v3778_v28, %v3972_v35  ;;  %v3733_v13 = vadd.f32 %v7404_v52, %v5716_v58  ;;  %v3724_v62 = vpop.f32.mrb[125].mxu1  ;;  %v3555_v20 = vadd.f32 %v7404_v52, %v7608_v43  ;;  %v3570_v57 = vmax.f32 %v3534_v22, 0.0 }
 0x403   :  { %v7741_v54 = vmax.f32 %v3776_v46, %v3970_v2  ;;  %v3725_v48 = vadd.f32 %v7404_v52, %v3724_v62  ;;  %v5717_v53 = vpop.f32.mrb[126].mxu1  ;;  %v3547_v24 = vadd.f32 %v7404_v52, %v7610_v9  ;;  %v3976_v35 = vmax.f32 %v3946_v39, 0.0 }
 0x404   :  { %v3765_v34 = vmax.f32 %v3733_v13, 0.0  ;;  %v3736_v26 = vadd.f32 %v7404_v52, %v5717_v53  ;;  %v3727_v30 = vpop.f32.mrb[127].mxu1  ;;  %v3959_v49 = vadd.f32 %v7404_v52, %v7632_v15  ;;  %v3974_v2 = vmax.f32 %v3938_v33, 0.0 }
 0x405   :  { %v3763_v27 = vmax.f32 %v3725_v48, 0.0  ;;  %v3728_v23 = vadd.f32 %v7404_v52, %v3727_v30  ;;  %v3951_v58 = vadd.f32 %v7404_v52, %v7634_v37  ;;  %v3575_v45 = vmax.f32 %v3555_v20, 0.0 }
 0x406   :  { %v3781_v0 = vmax.f32 %v3571_v44, %v3765_v34  ;;  %v3766_v19 = vmax.f32 %v3736_v26, 0.0  ;;  %v3558_v9 = vadd.f32 %v7404_v52, %v7612_v56  ;;  %v3573_v62 = vmax.f32 %v3547_v24, 0.0 }
 0x407   :  { %v3779_v4 = vmax.f32 %v3569_v21, %v3763_v27  ;;  %v3764_v3 = vmax.f32 %v3728_v23, 0.0  ;;  %v3550_v15 = vadd.f32 %v7404_v52, %v7614_v1  ;;  %v3979_v37 = vmax.f32 %v3959_v49, 0.0 }
 0x408   :  { %v7754_v41 = vmax.f32 %v3781_v0, %v3975_v6  ;;  %v3782_v28 = vmax.f32 %v3572_v10, %v3766_v19  ;;  %v3962_v56 = vadd.f32 %v7404_v52, %v7636_v31  ;;  %v3977_v39 = vmax.f32 %v3951_v58, 0.0 }
 0x409   :  { %v7758_v14 = vmax.f32 %v3779_v4, %v3973_v8  ;;  %v3780_v46 = vmax.f32 %v3570_v57, %v3764_v3  ;;  %v5720_v43 = vpop.f32.mrb[128].mxu1  ;;  %v3954_v1 = vadd.f32 %v7404_v52, %v7638_v17  ;;  %v3576_v27 = vmax.f32 %v3558_v9, 0.0 }
 0x40a   :  { %v7764_v44 = vmax.f32 %v3782_v28, %v3976_v35  ;;  %v3749_v12 = vadd.f32 %v7404_v52, %v5720_v43  ;;  %v3740_v13 = vpop.f32.mrb[129].mxu1  ;;  %v3574_v33 = vmax.f32 %v3550_v15, 0.0  ;;  %v3980_v57 = vmax.f32 %v3962_v56, 0.0 }
 0x40b   :  { %v7769_v21 = vmax.f32 %v3780_v46, %v3974_v2  ;;  %v3741_v22 = vadd.f32 %v7404_v52, %v3740_v13  ;;  %v5721_v48 = vpop.f32.mrb[130].mxu1  ;;  %v4331_v31 = vadd.f32 %v7404_v52, %v7640_v47  ;;  %v3978_v3 = vmax.f32 %v3954_v1, 0.0 }
 0x40c   :  { %v3769_v53 = vmax.f32 %v3749_v12, 0.0  ;;  %v3752_v34 = vadd.f32 %v7404_v52, %v5721_v48  ;;  %v3743_v6 = vpop.f32.mrb[131].mxu1  ;;  %v4323_v17 = vadd.f32 %v7404_v52, %v7642_v50  ;;  %v4334_v12 = vadd.f32 %v7404_v52, %v7644_v40 }
 0x40d   :  { %v3767_v26 = vmax.f32 %v3741_v22, 0.0  ;;  %v3744_v30 = vadd.f32 %v7404_v52, %v3743_v6  ;;  %v4387_v47 = vmax.f32 %v4331_v31, 0.0  ;;  %v4326_v22 = vadd.f32 %v7404_v52, %v7646_v51 }
 0x40e   :  { %v3785_v8 = vmax.f32 %v3575_v45, %v3769_v53  ;;  %v3770_v23 = vmax.f32 %v3752_v34, 0.0  ;;  %v4385_v50 = vmax.f32 %v4323_v17, 0.0  ;;  %v4347_v40 = vadd.f32 %v7404_v52, %v7648_v29 }
 0x40f   :  { %v3783_v10 = vmax.f32 %v3573_v62, %v3767_v26  ;;  %v3768_v20 = vmax.f32 %v3744_v30, 0.0  ;;  %v4388_v26 = vmax.f32 %v4334_v12, 0.0  ;;  %v4386_v1 = vmax.f32 %v4326_v22, 0.0 }
 0x410   :  { %v7778_v0 = vmax.f32 %v3785_v8, %v3979_v37  ;;  %v3786_v19 = vmax.f32 %v3576_v27, %v3770_v23  ;;  %v4339_v51 = vadd.f32 %v7404_v52, %v7650_v38  ;;  %v4350_v23 = vadd.f32 %v7404_v52, %v7652_v63 }
 0x411   :  { %v7782_v24 = vmax.f32 %v3783_v10, %v3977_v39  ;;  %v3784_v4 = vmax.f32 %v3574_v33, %v3768_v20  ;;  %v5744_v28 = vpop.f32.mrb[132].mxu1  ;;  %v4342_v29 = vadd.f32 %v7404_v52, %v7654_v32  ;;  %v4391_v38 = vmax.f32 %v4347_v40, 0.0 }
 0x412   :  { %v7786_v35 = vmax.f32 %v3786_v19, %v3980_v57  ;;  %v4121_v49 = vadd.f32 %v7404_v52, %v5744_v28  ;;  %v4112_v46 = vpop.f32.mrb[133].mxu1  ;;  %v4389_v28 = vmax.f32 %v4339_v51, 0.0  ;;  %v4366_v22 = vadd.f32 %v7404_v52, %v7660_v5 }
 0x413   :  { %v7789_v2 = vmax.f32 %v3784_v4, %v3978_v3  ;;  %v4113_v43 = vadd.f32 %v7404_v52, %v4112_v46  ;;  %v5745_v58 = vpop.f32.mrb[134].mxu1  ;;  %v4390_v32 = vmax.f32 %v4342_v29, 0.0 }
 0x414   :  { %v4177_v45 = vmax.f32 %v4121_v49, 0.0  ;;  %v4124_v9 = vadd.f32 %v7404_v52, %v5745_v58  ;;  %v4115_v13 = vpop.f32.mrb[135].mxu1  ;;  %v4392_v49 = vmax.f32 %v4350_v23, 0.0 }
 0x415   :  { %v4175_v62 = vmax.f32 %v4113_v43, 0.0  ;;  %v4116_v15 = vadd.f32 %v7404_v52, %v4115_v13 }
 0x416   :  { %v4193_v48 = vmax.f32 %v7698_v61, %v4177_v45  ;;  %v4178_v53 = vmax.f32 %v4124_v9, 0.0  ;;  %v4363_v9 = vadd.f32 %v7404_v52, %v7656_v55 }
 0x417   :  { %v4191_v37 = vmax.f32 %v7702_v7, %v4175_v62  ;;  %v4176_v34 = vmax.f32 %v4116_v15, 0.0  ;;  %v4355_v62 = vadd.f32 %v7404_v52, %v7658_v16 }
 0x418   :  { %v7800_v56 = vmax.f32 %v4193_v48, %v4387_v47  ;;  %v4194_v6 = vmax.f32 %v7708_v36, %v4178_v53 }
 0x419   :  { %v4401_v39 = vmax.f32 %v4191_v37, %v4385_v50  ;;  %v4192_v30 = vmax.f32 %v7713_v18, %v4176_v34  ;;  %v5748_v27 = vpop.f32.mrb[136].mxu1  ;;  %v4393_v5 = vmax.f32 %v4355_v62, 0.0 }
 0x41a   :  { %v4404_v61 = vmax.f32 %v4194_v6, %v4388_v26  ;;  %v4137_v7 = vadd.f32 %v7404_v52, %v5748_v27  ;;  %v4128_v8 = vpop.f32.mrb[137].mxu1  ;;  %v4396_v27 = vmax.f32 %v4366_v22, 0.0 }
 0x41b   :  { %v4402_v36 = vmax.f32 %v4192_v30, %v4386_v1  ;;  %v4129_v33 = vadd.f32 %v7404_v52, %v4128_v8  ;;  %v5749_v10 = vpop.f32.mrb[138].mxu1 }
 0x41c   :  { %v4418_v18 = vpack.c.bf16 %v4404_v61, %v7800_v56  ;;  %v4181_v20 = vmax.f32 %v4137_v7, 0.0  ;;  %v4140_v19 = vadd.f32 %v7404_v52, %v5749_v10  ;;  %v4131_v57 = vpop.f32.mrb[139].mxu1  ;;  %v4395_v56 = vmax.f32 %v4363_v9, 0.0 }
 0x41d   :  { %v4417_v31 = vpack.c.bf16 %v4402_v36, %v4401_v39  ;;  %v4179_v4 = vmax.f32 %v4129_v33, 0.0  ;;  %v4132_v3 = vadd.f32 %v7404_v52, %v4131_v57  ;;  %v4379_v36 = vadd.f32 %v7404_v52, %v7664_v25 }
 0x41e   :  { %v4197_v63 = vmax.f32 %v7726_v59, %v4181_v20  ;;  %v4182_v17 = vmax.f32 %v4140_v19, 0.0  ;;  %v4433_v7 = vsel %vm2137_vm3, %v4418_v18, 0 }
 0x41f   :  { %v4195_v46 = vmax.f32 %v7730_v11, %v4179_v4  ;;  %v4180_v43 = vmax.f32 %v4132_v3, 0.0  ;;  %v4430_v58 = vsel %vm2137_vm3, %v4417_v31, 0  ;;  %v7899_v11 = vmov 0.0   ;;  %v7902_v4 = vld [vmem:[#allocation7_spill] sm:$0xff] }
 0x420   :  { %v4198_v45 = vmax.f32 %v7736_v60, %v4182_v17  ;;  %v7821_v47 = vmax.f32 %v4197_v63, %v4391_v38  ;;  %5777 = vmatpush3.bf16.xpose.msra.mxu1 %v4430_v58  ;;  %v7901_v38 = vld [vmem:[#allocation6_spill] sm:$0xff]  ;;  %v4399_v17 = vmax.f32 %v4379_v36, 0.0 }
 0x421   :  { %v4196_v12 = vmax.f32 %v7741_v54, %v4180_v43  ;;  %v4405_v13 = vmax.f32 %v4195_v46, %v4389_v28  ;;  %v5752_v59 = vpop.f32.mrb[140].mxu1  ;;  %5778 = vmatprep.subr.bf16.mxu1 %v7899_v11  ;;  %v4358_v54 = vadd.f32 %v7404_v52, %v7662_v42 }
 0x422   :  { %v7829_v50 = vmax.f32 %v4198_v45, %v4392_v49  ;;  %v4153_v15 = vadd.f32 %v7404_v52, %v5752_v59  ;;  %v4144_v60 = vpop.f32.mrb[141].mxu1 }
 0x423   :  { %v4406_v48 = vmax.f32 %v4196_v12, %v4390_v32  ;;  %v4145_v55 = vadd.f32 %v7404_v52, %v4144_v60  ;;  %v5753_v53 = vpop.f32.mrb[142].mxu1  ;;  %v4394_v61 = vmax.f32 %v4358_v54, 0.0 }
 0x424   :  { %v4420_v16 = vpack.c.bf16 %v7829_v50, %v7821_v47  ;;  %v4185_v37 = vmax.f32 %v4153_v15, 0.0  ;;  %v4156_v34 = vadd.f32 %v7404_v52, %v5753_v53  ;;  %v4147_v6 = vpop.f32.mrb[143].mxu1 }
 0x425   :  { %v4419_v26 = vpack.c.bf16 %v4406_v48, %v4405_v13  ;;  %v4183_v40 = vmax.f32 %v4145_v55, 0.0  ;;  %v4148_v39 = vadd.f32 %v7404_v52, %v4147_v6 }
 0x426   :  { %v4201_v30 = vmax.f32 %v7754_v41, %v4185_v37  ;;  %v4186_v1 = vmax.f32 %v4156_v34, 0.0  ;;  %v7900_v41 = vld [vmem:[#allocation5_spill] sm:$0xff]  ;;  %v4439_v53 = vsel %vm2137_vm3, %v4420_v16, 0  ;;  %v7903_v16 = vld [vmem:[#allocation4_spill] sm:$0xff] }
 0x427   :  { %v4199_v51 = vmax.f32 %v7758_v14, %v4183_v40  ;;  %v4184_v42 = vmax.f32 %v4148_v39, 0.0  ;;  %v4371_v20 = vadd.f32 %v7404_v52, %v7900_v41  ;;  %v4436_v62 = vsel %vm2137_vm3, %v4419_v26, 0  ;;  %v4498_v26 = vpop.permute.xlu0 %4497 }
 0x428   :  { %v4202_v8 = vmax.f32 %v7764_v44, %v4186_v1  ;;  %v4411_v23 = vmax.f32 %v4201_v30, %v4395_v56  ;;  %5779 = vmatpush3.bf16.xpose.msra.mxu1 %v4433_v7  ;;  %v4382_v44 = vadd.f32 %v7404_v52, %v7901_v38  ;;  %v7904_v37 = vshrl.u32 %v7903_v16, 16  ;;  %v7905_v56 = vld [vmem:[#allocation3_spill] sm:$0xff] }
 0x429   :  { %v4200_v33 = vmax.f32 %v7769_v21, %v4184_v42  ;;  %v4409_v10 = vmax.f32 %v4199_v51, %v4393_v5  ;;  %v5756_v29 = vpop.f32.mrb[144].mxu1  ;;  %5780 = vmatprep.subr.bf16.mxu1 %v7899_v11  ;;  %v4374_v21 = vadd.f32 %v7404_v52, %v7902_v4  ;;  %v4397_v58 = vmax.f32 %v4371_v20, 0.0  ;;  %v7906_v5 = vld [vmem:[#allocation8_spill] sm:$0xff] }
 0x42a   :  { %v4412_v14 = vmax.f32 %v4202_v8, %v4396_v27  ;;  %v4169_v19 = vadd.f32 %v7404_v52, %v5756_v29  ;;  %v4160_v18 = vpop.f32.mrb[145].mxu1  ;;  %v4400_v9 = vmax.f32 %v4382_v44, 0.0  ;;  %v4425_v34 = vrot.slane %v7904_v37, 1 }
 0x42b   :  { %v4410_v57 = vmax.f32 %v4200_v33, %v4394_v61  ;;  %v4161_v31 = vadd.f32 %v7404_v52, %v4160_v18  ;;  %v5757_v25 = vpop.f32.mrb[146].mxu1  ;;  %v4398_v59 = vmax.f32 %v4374_v21, 0.0  ;;  %v4502_v6 = vsub.s32 0, %v7905_v56 }
 0x42c   :  { %v4422_v3 = vpack.c.bf16 %v4412_v14, %v4411_v23  ;;  %v4189_v28 = vmax.f32 %v4169_v19, 0.0  ;;  %v4172_v63 = vadd.f32 %v7404_v52, %v5757_v25  ;;  %v4163_v49 = vpop.f32.mrb[147].mxu1 }
 0x42d   :  { %v4421_v46 = vpack.c.bf16 %v4410_v57, %v4409_v10  ;;  %v4187_v43 = vmax.f32 %v4161_v31, 0.0  ;;  %v4164_v32 = vadd.f32 %v7404_v52, %v4163_v49  ;;  %v4503_v40 = vrot.slane %v4498_v26, %v4502_v6 }
 0x42e   :  { %v4205_v45 = vmax.f32 %v7778_v0, %v4189_v28  ;;  %v4190_v47 = vmax.f32 %v4172_v63, 0.0 }
 0x42f   :  { %v4203_v12 = vmax.f32 %v7782_v24, %v4187_v43  ;;  %v4188_v13 = vmax.f32 %v4164_v32, 0.0  ;;  %v4442_v24 = vsel %vm2137_vm3, %v4421_v46, 0 }
 0x430   :  { %v4206_v50 = vmax.f32 %v7786_v35, %v4190_v47  ;;  %v4415_v15 = vmax.f32 %v4205_v45, %v4399_v17  ;;  %5781 = vmatpush3.bf16.xpose.msra.mxu1 %v4436_v62  ;;  %v4445_v35 = vsel %vm2137_vm3, %v4422_v3, 0 }
 0x431   :  { %v4204_v60 = vmax.f32 %v7789_v2, %v4188_v13  ;;  %v4413_v22 = vmax.f32 %v4203_v12, %v4397_v58  ;;  %5782 = vmatprep.subr.bf16.mxu1 %v7899_v11 }
 0x432   :  { %v4416_v52 = vmax.f32 %v4206_v50, %v4400_v9 }
 0x433   :  { %v4414_v48 = vmax.f32 %v4204_v60, %v4398_v59 }
 0x434   :  { %v4424_v0 = vpack.c.bf16 %v4416_v52, %v4415_v15 }
 0x435   :  { %v4423_v55 = vpack.c.bf16 %v4414_v48, %v4413_v22 }
 0x436   :  { %v4451_v54 = vsel %vm2137_vm3, %v4424_v0, 0 }
 0x437   :  { %v4448_v2 = vsel %vm2137_vm3, %v4423_v55, 0 }
 0x438   :  { %5783 = vmatpush3.bf16.xpose.msra.mxu1 %v4439_v53 }
 0x439   :  { %5784 = vmatprep.subr.bf16.mxu1 %v7899_v11 }
 0x440   :  { %5785 = vmatpush3.bf16.xpose.msra.mxu1 %v4442_v24 }
 0x441   :  { %5786 = vmatprep.subr.bf16.mxu1 %v7899_v11 }
 0x448   :  { %5787 = vmatpush3.bf16.xpose.msra.mxu1 %v4445_v35 }
 0x449   :  { %5788 = vmatprep.subr.bf16.mxu1 %v7899_v11 }
 0x450   :  { %5789 = vmatpush3.bf16.xpose.msra.mxu1 %v4448_v2 }
 0x451   :  { %5790 = vmatprep.subr.bf16.mxu1 %v7899_v11 }
 0x458   :  { %5791 = vmatpush3.bf16.xpose.msra.mxu1 %v4451_v54 }
 0x45f   :  { %5793 = vmatmul.mubr.msk.bf16.vlgmr.msra.gmra.mrb[148].mxu1 %vm2137_vm3, %v4425_v34 }
 0x532   :  { %v4487_v39 = vpop.f32.mrb[148].mxu1 }
 0x533   :  { %v4493_v30 = vadd.f32 %v4487_v39, %v7906_v5  ;;  %v5794_v1 = vpop.f32.mrb[149].mxu1 }
 0x534   :  { %v4490_v27 = vpop.f32.mrb[150].mxu1 }
 0x535   :  { %v4504_v51 = vadd.f32 %v4503_v40, %v4493_v30  ;;  %v5795_v42 = vpop.f32.mrb[151].mxu1 }
 0x537   :  { %4505 = vst [vmem:[%s7887_s5] sm:$0x1] %v4504_v51 }

</bundles_post_ra>
